<compile_context>
chip_gen: v6e
topology: v6e:2x2x1
jax: 0.10.0
libtpu: 0.0.40
codegen_flags: <defaults>
</compile_context>

<pallas_src>
import jax
import jax.numpy as jnp
from jax.experimental import pallas as pl
from jax.experimental.pallas import tpu as pltpu

KSIZE = 5
DILATION = 2
PAD = DILATION * (KSIZE - 1) // 2        # = 4  ('same' padding of DilatedConvELU2D)
NEG = -1.0e30                            # pool padding value; ELU output >= -1, so safe


def _round_up(x, m):
    return (x + m - 1) // m * m


def _make_kernel(NB, Cin, Cout, H, W, CIN_AL, LPAD):
    HW = H * W
    Hq, Wq = (H + 1) // 2, (W + 1) // 2

    def kernel(x_ref, w_ref, b_ref, colid_ref, sel_ref,
               conv_ref, pool_ref, xe_ref, ye_ref, col_ref):
        w = w_ref[...]                    # (Cout, 25*CIN_AL)
        b = b_ref[...]                    # (Cout, 1)
        colid = colid_ref[...]            # (1, HW) int32 : flat index % W
        sel = sel_ref[...]                # (HW, Hq*Wq) 0/1 stride-2 selection

        # Column-validity masks for horizontal shifts (hoisted out of loops).
        conv_dx = {kw * DILATION - PAD for kw in range(KSIZE)}
        cmask = {}
        for dx in conv_dx | {-1, 1}:
            if dx != 0:
                cmask[dx] = (colid + dx >= 0) & (colid + dx < W)

        # Scratch init: zero margins for conv shifts, -inf-ish margins for the
        # pool shifts, zero padding rows of the im2col matrix.  (Interiors are
        # fully overwritten per image below.)
        xe_ref[...] = jnp.zeros(xe_ref.shape, xe_ref.dtype)
        ye_ref[...] = jnp.full(ye_ref.shape, NEG, ye_ref.dtype)
        col_ref[...] = jnp.zeros(col_ref.shape, col_ref.dtype)

        for bi in range(NB):
            # ---- dilated 5x5 conv as ONE im2col MXU matmul ------------------
            xe_ref[:, LPAD:LPAD + HW] = x_ref[bi]          # aligned store
            xev = xe_ref[...]                              # (Cin, HW + 2*LPAD)
            for kh in range(KSIZE):
                dy = kh * DILATION - PAD
                for kw in range(KSIZE):
                    dx = kw * DILATION - PAD
                    s = dy * W + dx                        # flat-space shift
                    patch = xev[:, LPAD + s:LPAD + s + HW]  # (Cin, HW)
                    if dx != 0:
                        patch = jnp.where(cmask[dx], patch, 0.0)
                    t = kh * KSIZE + kw
                    col_ref[t * CIN_AL:t * CIN_AL + Cin, :] = patch
            acc = jnp.dot(w, col_ref[...],
                          preferred_element_type=jnp.float32)   # (Cout, HW)
            y = acc + b
            # ELU, alpha=1.
            # TODO(synk): jnp.expm1 would be marginally more accurate near 0.
            y = jnp.where(y > 0.0, y, jnp.exp(y) - 1.0)
            conv_ref[bi] = y                               # lane-dense write

            # ---- fused 3x3 / stride-2 max pool (padding=1) ------------------
            ye_ref[:, LPAD:LPAD + HW] = y
            yev = ye_ref[...]
            m = y
            for di in (-1, 0, 1):
                for dj in (-1, 0, 1):
                    if di == 0 and dj == 0:
                        continue
                    s = di * W + dj
                    t2 = yev[:, LPAD + s:LPAD + s + HW]
                    if dj != 0:
                        t2 = jnp.where(cmask[dj], t2, NEG)
                    m = jnp.maximum(m, t2)
            # stride-2 downsample (both axes) via a 0/1 selection matmul.
            pool_ref[bi] = jnp.dot(m, sel, preferred_element_type=jnp.float32)

    return kernel


def l1sx_forward(x_nchw, weight, bias):
    """x_nchw: (N, Cin, H, W); weight: (Cout, Cin, 5, 5); bias: (Cout,).
    Returns (pooled, conved, upsampled) in NCHW, matching the PyTorch module."""
    N, Cin, H, W = x_nchw.shape
    Cout = weight.shape[0]
    HW = H * W
    Hq, Wq = (H + 1) // 2, (W + 1) // 2
    HWq = Hq * Wq
    CIN_AL = _round_up(Cin, 8)                      # sublane-aligned im2col rows
    LPAD = _round_up(PAD * (W + 1), 128)            # covers every shift, lane-aligned

    NB = 1
    for cand in (8, 4, 2):
        if N % cand == 0:
            NB = cand
            break

    x_flat = x_nchw.reshape(N, Cin, HW).astype(jnp.float32)

    # Weight packed for (Cout, 25*CIN_AL) @ (25*CIN_AL, HW); padded channels are 0.
    w_p = jnp.transpose(weight, (0, 2, 3, 1)).astype(jnp.float32)     # (Cout,K,K,Cin)
    w_p = jnp.pad(w_p, ((0, 0), (0, 0), (0, 0), (0, CIN_AL - Cin)))
    w_p = w_p.reshape(Cout, KSIZE * KSIZE * CIN_AL)
    b_p = bias.reshape(Cout, 1).astype(jnp.float32)

    # Flat column-index helper and the stride-2 selection matrix (built once).
    colid = (jnp.arange(HW, dtype=jnp.int32) % W).reshape(1, HW)
    q = jnp.arange(HWq)
    target = 2 * (q // Wq) * W + 2 * (q % Wq)                          # (HWq,)
    sel = (jnp.arange(HW)[:, None] == target[None, :]).astype(jnp.float32)

    kernel = _make_kernel(NB, Cin, Cout, H, W, CIN_AL, LPAD)
    conved_f, pooled_f = pl.pallas_call(
        kernel,
        out_shape=(jax.ShapeDtypeStruct((N, Cout, HW), jnp.float32),
                   jax.ShapeDtypeStruct((N, Cout, HWq), jnp.float32)),
        grid=(N // NB,),
        in_specs=[
            pl.BlockSpec((NB, Cin, HW), lambda n: (n, 0, 0)),
            pl.BlockSpec((Cout, KSIZE * KSIZE * CIN_AL), lambda n: (0, 0)),
            pl.BlockSpec((Cout, 1), lambda n: (0, 0)),
            pl.BlockSpec((1, HW), lambda n: (0, 0)),
            pl.BlockSpec((HW, HWq), lambda n: (0, 0)),
        ],
        out_specs=(
            pl.BlockSpec((NB, Cout, HW), lambda n: (n, 0, 0)),
            pl.BlockSpec((NB, Cout, HWq), lambda n: (n, 0, 0)),
        ),
        scratch_shapes=[
            pltpu.VMEM((Cin, HW + 2 * LPAD), jnp.float32),             # extended x
            pltpu.VMEM((Cout, HW + 2 * LPAD), jnp.float32),            # extended y
            pltpu.VMEM((KSIZE * KSIZE * CIN_AL, HW), jnp.float32),     # im2col
        ],
        compiler_params=pltpu.CompilerParams(
            dimension_semantics=("parallel",)),
    )(x_flat, w_p, b_p, colid, sel)

    conved = conved_f.reshape(N, Cout, H, W)           # free reshape (already NCHW)
    pooled = pooled_f.reshape(N, Cout, Hq, Wq)
    # Nearest-x2 upsample: pure replication of `conved`; single XLA broadcast+reshape.
    upsampled = jnp.broadcast_to(
        conved[:, :, :, None, :, None],
        (N, Cout, H, 2, W, 2)).reshape(N, Cout, 2 * H, 2 * W)
    return pooled, conved, upsampled


if __name__ == "__main__":
    base_width = 4
    N, Cin, H, W = 2, base_width, 16, 16
    Cout = 2 * base_width

    key = jax.random.PRNGKey(0)
    kx, kw, kb = jax.random.split(key, 3)
    x = jax.random.normal(kx, (N, Cin, H, W), jnp.float32)
    weight = jax.random.normal(kw, (Cout, Cin, KSIZE, KSIZE), jnp.float32) * 0.1
    bias = jax.random.normal(kb, (Cout,), jnp.float32) * 0.1

    pooled, conved, upsampled = jax.jit(l1sx_forward)(x, weight, bias)
    jax.block_until_ready((pooled, conved, upsampled))

    # pure-JAX reference for sanity
    conv_ref = jax.lax.conv_general_dilated(
        x, weight, window_strides=(1, 1), padding=((PAD, PAD), (PAD, PAD)),
        rhs_dilation=(DILATION, DILATION),
        dimension_numbers=('NCHW', 'OIHW', 'NCHW'))
    conv_ref = jax.nn.elu(conv_ref + bias[None, :, None, None])
    pool_ref = jax.lax.reduce_window(
        conv_ref, -jnp.inf, jax.lax.max,
        (1, 1, 3, 3), (1, 1, 2, 2), ((0, 0), (0, 0), (1, 1), (1, 1)))
    ups_ref = jnp.repeat(jnp.repeat(conv_ref, 2, axis=2), 2, axis=3)

    assert conved.shape == (N, Cout, H, W)
    assert pooled.shape == (N, Cout, H // 2, W // 2)
    assert upsampled.shape == (N, Cout, 2 * H, 2 * W)
    assert float(jnp.max(jnp.abs(conved - conv_ref))) < 1e-3
    assert float(jnp.max(jnp.abs(pooled - pool_ref))) < 1e-3
    assert float(jnp.max(jnp.abs(upsampled - ups_ref))) < 1e-3

    print("KERNEL_OK")
</pallas_src>

<mosaic_0001>
module attributes {stable_mosaic.version = 11 : i64} {
  func.func @kernel(%arg0: i32, %arg1: memref<2x4x256xf32, #tpu.memory_space<vmem>>, %arg2: memref<8x200xf32, #tpu.memory_space<vmem>>, %arg3: memref<8x1xf32, #tpu.memory_space<vmem>>, %arg4: memref<1x256xi32, #tpu.memory_space<vmem>>, %arg5: memref<256x64xf32, #tpu.memory_space<vmem>>, %arg6: memref<2x8x256xf32, #tpu.memory_space<vmem>>, %arg7: memref<2x8x64xf32, #tpu.memory_space<vmem>>, %arg8: memref<4x512xf32, #tpu.memory_space<vmem>>, %arg9: memref<8x512xf32, #tpu.memory_space<vmem>>, %arg10: memref<200x256xf32, #tpu.memory_space<vmem>>) attributes {dimension_semantics = [#tpu.dimension_semantics<parallel>], iteration_bounds = array<i64: 1>, scalar_prefetch = 0 : i64, scratch_operands = 3 : i64, tpu.core_type = #tpu.core_type<tc>, window_params = [{transform_indices = @transform_0, window_bounds = array<i64: 2, 4, 256>}, {pipeline_mode = #tpu.pipeline_mode<synchronous>, transform_indices = @transform_1, window_bounds = array<i64: 8, 200>}, {pipeline_mode = #tpu.pipeline_mode<synchronous>, transform_indices = @transform_2, window_bounds = array<i64: 8, 1>}, {pipeline_mode = #tpu.pipeline_mode<synchronous>, transform_indices = @transform_3, window_bounds = array<i64: 1, 256>}, {pipeline_mode = #tpu.pipeline_mode<synchronous>, transform_indices = @transform_4, window_bounds = array<i64: 256, 64>}, {transform_indices = @transform_5, window_bounds = array<i64: 2, 8, 256>}, {transform_indices = @transform_6, window_bounds = array<i64: 2, 8, 64>}]} {
    %c0 = arith.constant 0 : index
    %c0_0 = arith.constant 0 : index
    %0 = vector.load %arg2[%c0, %c0_0] : memref<8x200xf32, #tpu.memory_space<vmem>>, vector<8x200xf32>
    %c0_1 = arith.constant 0 : index
    %c0_2 = arith.constant 0 : index
    %1 = vector.load %arg3[%c0_1, %c0_2] : memref<8x1xf32, #tpu.memory_space<vmem>>, vector<8x1xf32>
    %c0_3 = arith.constant 0 : index
    %c0_4 = arith.constant 0 : index
    %2 = vector.load %arg4[%c0_3, %c0_4] : memref<1x256xi32, #tpu.memory_space<vmem>>, vector<1x256xi32>
    %c0_5 = arith.constant 0 : index
    %c0_6 = arith.constant 0 : index
    %3 = vector.load %arg5[%c0_5, %c0_6] : memref<256x64xf32, #tpu.memory_space<vmem>>, vector<256x64xf32>
    %c1_i32 = arith.constant 1 : i32
    %4 = vector.broadcast %c1_i32 : i32 to vector<1x256xi32>
    %5 = arith.addi %2, %4 : vector<1x256xi32>
    %c0_i32 = arith.constant 0 : i32
    %6 = vector.broadcast %c0_i32 : i32 to vector<1x256xi32>
    %7 = arith.cmpi sge, %5, %6 : vector<1x256xi32>
    %c1_i32_7 = arith.constant 1 : i32
    %8 = vector.broadcast %c1_i32_7 : i32 to vector<1x256xi32>
    %9 = arith.addi %2, %8 : vector<1x256xi32>
    %c16_i32 = arith.constant 16 : i32
    %10 = vector.broadcast %c16_i32 : i32 to vector<1x256xi32>
    %11 = arith.cmpi slt, %9, %10 : vector<1x256xi32>
    %12 = arith.andi %7, %11 : vector<1x256xi1>
    %c2_i32 = arith.constant 2 : i32
    %13 = vector.broadcast %c2_i32 : i32 to vector<1x256xi32>
    %14 = arith.addi %2, %13 : vector<1x256xi32>
    %c0_i32_8 = arith.constant 0 : i32
    %15 = vector.broadcast %c0_i32_8 : i32 to vector<1x256xi32>
    %16 = arith.cmpi sge, %14, %15 : vector<1x256xi32>
    %c2_i32_9 = arith.constant 2 : i32
    %17 = vector.broadcast %c2_i32_9 : i32 to vector<1x256xi32>
    %18 = arith.addi %2, %17 : vector<1x256xi32>
    %c16_i32_10 = arith.constant 16 : i32
    %19 = vector.broadcast %c16_i32_10 : i32 to vector<1x256xi32>
    %20 = arith.cmpi slt, %18, %19 : vector<1x256xi32>
    %21 = arith.andi %16, %20 : vector<1x256xi1>
    %c4_i32 = arith.constant 4 : i32
    %22 = vector.broadcast %c4_i32 : i32 to vector<1x256xi32>
    %23 = arith.addi %2, %22 : vector<1x256xi32>
    %c0_i32_11 = arith.constant 0 : i32
    %24 = vector.broadcast %c0_i32_11 : i32 to vector<1x256xi32>
    %25 = arith.cmpi sge, %23, %24 : vector<1x256xi32>
    %c4_i32_12 = arith.constant 4 : i32
    %26 = vector.broadcast %c4_i32_12 : i32 to vector<1x256xi32>
    %27 = arith.addi %2, %26 : vector<1x256xi32>
    %c16_i32_13 = arith.constant 16 : i32
    %28 = vector.broadcast %c16_i32_13 : i32 to vector<1x256xi32>
    %29 = arith.cmpi slt, %27, %28 : vector<1x256xi32>
    %30 = arith.andi %25, %29 : vector<1x256xi1>
    %c-1_i32 = arith.constant -1 : i32
    %31 = vector.broadcast %c-1_i32 : i32 to vector<1x256xi32>
    %32 = arith.addi %2, %31 : vector<1x256xi32>
    %c0_i32_14 = arith.constant 0 : i32
    %33 = vector.broadcast %c0_i32_14 : i32 to vector<1x256xi32>
    %34 = arith.cmpi sge, %32, %33 : vector<1x256xi32>
    %c-1_i32_15 = arith.constant -1 : i32
    %35 = vector.broadcast %c-1_i32_15 : i32 to vector<1x256xi32>
    %36 = arith.addi %2, %35 : vector<1x256xi32>
    %c16_i32_16 = arith.constant 16 : i32
    %37 = vector.broadcast %c16_i32_16 : i32 to vector<1x256xi32>
    %38 = arith.cmpi slt, %36, %37 : vector<1x256xi32>
    %39 = arith.andi %34, %38 : vector<1x256xi1>
    %c-4_i32 = arith.constant -4 : i32
    %40 = vector.broadcast %c-4_i32 : i32 to vector<1x256xi32>
    %41 = arith.addi %2, %40 : vector<1x256xi32>
    %c0_i32_17 = arith.constant 0 : i32
    %42 = vector.broadcast %c0_i32_17 : i32 to vector<1x256xi32>
    %43 = arith.cmpi sge, %41, %42 : vector<1x256xi32>
    %c-4_i32_18 = arith.constant -4 : i32
    %44 = vector.broadcast %c-4_i32_18 : i32 to vector<1x256xi32>
    %45 = arith.addi %2, %44 : vector<1x256xi32>
    %c16_i32_19 = arith.constant 16 : i32
    %46 = vector.broadcast %c16_i32_19 : i32 to vector<1x256xi32>
    %47 = arith.cmpi slt, %45, %46 : vector<1x256xi32>
    %48 = arith.andi %43, %47 : vector<1x256xi1>
    %c-2_i32 = arith.constant -2 : i32
    %49 = vector.broadcast %c-2_i32 : i32 to vector<1x256xi32>
    %50 = arith.addi %2, %49 : vector<1x256xi32>
    %c0_i32_20 = arith.constant 0 : i32
    %51 = vector.broadcast %c0_i32_20 : i32 to vector<1x256xi32>
    %52 = arith.cmpi sge, %50, %51 : vector<1x256xi32>
    %c-2_i32_21 = arith.constant -2 : i32
    %53 = vector.broadcast %c-2_i32_21 : i32 to vector<1x256xi32>
    %54 = arith.addi %2, %53 : vector<1x256xi32>
    %c16_i32_22 = arith.constant 16 : i32
    %55 = vector.broadcast %c16_i32_22 : i32 to vector<1x256xi32>
    %56 = arith.cmpi slt, %54, %55 : vector<1x256xi32>
    %57 = arith.andi %52, %56 : vector<1x256xi1>
    %cst = arith.constant 0.000000e+00 : f32
    %58 = vector.broadcast %cst : f32 to vector<4x512xf32>
    %c0_23 = arith.constant 0 : index
    %c0_24 = arith.constant 0 : index
    %59 = vector.load %arg8[%c0_23, %c0_24] : memref<4x512xf32, #tpu.memory_space<vmem>>, vector<4x512xf32>
    tpu.vector_store %arg8[%c0_23, %c0_24], %58 {strides = array<i32>} : memref<4x512xf32, #tpu.memory_space<vmem>>, vector<4x512xf32>,
    %cst_25 = arith.constant -1.000000e+30 : f32
    %60 = vector.broadcast %cst_25 : f32 to vector<8x512xf32>
    %c0_26 = arith.constant 0 : index
    %c0_27 = arith.constant 0 : index
    %61 = vector.load %arg9[%c0_26, %c0_27] : memref<8x512xf32, #tpu.memory_space<vmem>>, vector<8x512xf32>
    tpu.vector_store %arg9[%c0_26, %c0_27], %60 {strides = array<i32>} : memref<8x512xf32, #tpu.memory_space<vmem>>, vector<8x512xf32>,
    %cst_28 = arith.constant 0.000000e+00 : f32
    %62 = vector.broadcast %cst_28 : f32 to vector<200x256xf32>
    %c0_29 = arith.constant 0 : index
    %c0_30 = arith.constant 0 : index
    %63 = vector.load %arg10[%c0_29, %c0_30] : memref<200x256xf32, #tpu.memory_space<vmem>>, vector<200x256xf32>
    tpu.vector_store %arg10[%c0_29, %c0_30], %62 {strides = array<i32>} : memref<200x256xf32, #tpu.memory_space<vmem>>, vector<200x256xf32>,
    %c0_31 = arith.constant 0 : index
    %c0_32 = arith.constant 0 : index
    %c0_33 = arith.constant 0 : index
    %64 = vector.load %arg1[%c0_31, %c0_32, %c0_33] : memref<2x4x256xf32, #tpu.memory_space<vmem>>, vector<1x4x256xf32>
    %65 = vector.shape_cast %64 : vector<1x4x256xf32> to vector<4x256xf32>
    %c0_34 = arith.constant 0 : index
    %c128 = arith.constant 128 : index
    %66 = vector.load %arg8[%c0_34, %c128] : memref<4x512xf32, #tpu.memory_space<vmem>>, vector<4x256xf32>
    tpu.vector_store %arg8[%c0_34, %c128], %65 {strides = array<i32>} : memref<4x512xf32, #tpu.memory_space<vmem>>, vector<4x256xf32>,
    %c0_35 = arith.constant 0 : index
    %c0_36 = arith.constant 0 : index
    %67 = vector.load %arg8[%c0_35, %c0_36] : memref<4x512xf32, #tpu.memory_space<vmem>>, vector<4x512xf32>
    %68 = vector.extract_strided_slice %67 {offsets = [0, 60], sizes = [4, 256], strides = [1, 1]} : vector<4x512xf32> to vector<4x256xf32>
    %cst_37 = arith.constant 0.000000e+00 : f32
    %69 = vector.shape_cast %48 : vector<1x256xi1> to vector<1x256xi1>
    %70 = vector.broadcast %69 : vector<1x256xi1> to vector<4x256xi1>
    %71 = vector.broadcast %cst_37 : f32 to vector<4x256xf32>
    %72 = arith.select %70, %68, %71 : vector<4x256xi1>, vector<4x256xf32>
    %c0_38 = arith.constant 0 : index
    %c0_39 = arith.constant 0 : index
    %73 = vector.load %arg10[%c0_38, %c0_39] : memref<200x256xf32, #tpu.memory_space<vmem>>, vector<4x256xf32>
    tpu.vector_store %arg10[%c0_38, %c0_39], %72 {strides = array<i32>} : memref<200x256xf32, #tpu.memory_space<vmem>>, vector<4x256xf32>,
    %74 = vector.extract_strided_slice %67 {offsets = [0, 62], sizes = [4, 256], strides = [1, 1]} : vector<4x512xf32> to vector<4x256xf32>
    %cst_40 = arith.constant 0.000000e+00 : f32
    %75 = vector.shape_cast %57 : vector<1x256xi1> to vector<1x256xi1>
    %76 = vector.broadcast %75 : vector<1x256xi1> to vector<4x256xi1>
    %77 = vector.broadcast %cst_40 : f32 to vector<4x256xf32>
    %78 = arith.select %76, %74, %77 : vector<4x256xi1>, vector<4x256xf32>
    %c8 = arith.constant 8 : index
    %c0_41 = arith.constant 0 : index
    %79 = vector.load %arg10[%c8, %c0_41] : memref<200x256xf32, #tpu.memory_space<vmem>>, vector<4x256xf32>
    tpu.vector_store %arg10[%c8, %c0_41], %78 {strides = array<i32>} : memref<200x256xf32, #tpu.memory_space<vmem>>, vector<4x256xf32>,
    %80 = vector.extract_strided_slice %67 {offsets = [0, 64], sizes = [4, 256], strides = [1, 1]} : vector<4x512xf32> to vector<4x256xf32>
    %c16 = arith.constant 16 : index
    %c0_42 = arith.constant 0 : index
    %81 = vector.load %arg10[%c16, %c0_42] : memref<200x256xf32, #tpu.memory_space<vmem>>, vector<4x256xf32>
    tpu.vector_store %arg10[%c16, %c0_42], %80 {strides = array<i32>} : memref<200x256xf32, #tpu.memory_space<vmem>>, vector<4x256xf32>,
    %82 = vector.extract_strided_slice %67 {offsets = [0, 66], sizes = [4, 256], strides = [1, 1]} : vector<4x512xf32> to vector<4x256xf32>
    %cst_43 = arith.constant 0.000000e+00 : f32
    %83 = vector.shape_cast %21 : vector<1x256xi1> to vector<1x256xi1>
    %84 = vector.broadcast %83 : vector<1x256xi1> to vector<4x256xi1>
    %85 = vector.broadcast %cst_43 : f32 to vector<4x256xf32>
    %86 = arith.select %84, %82, %85 : vector<4x256xi1>, vector<4x256xf32>
    %c24 = arith.constant 24 : index
    %c0_44 = arith.constant 0 : index
    %87 = vector.load %arg10[%c24, %c0_44] : memref<200x256xf32, #tpu.memory_space<vmem>>, vector<4x256xf32>
    tpu.vector_store %arg10[%c24, %c0_44], %86 {strides = array<i32>} : memref<200x256xf32, #tpu.memory_space<vmem>>, vector<4x256xf32>,
    %88 = vector.extract_strided_slice %67 {offsets = [0, 68], sizes = [4, 256], strides = [1, 1]} : vector<4x512xf32> to vector<4x256xf32>
    %cst_45 = arith.constant 0.000000e+00 : f32
    %89 = vector.shape_cast %30 : vector<1x256xi1> to vector<1x256xi1>
    %90 = vector.broadcast %89 : vector<1x256xi1> to vector<4x256xi1>
    %91 = vector.broadcast %cst_45 : f32 to vector<4x256xf32>
    %92 = arith.select %90, %88, %91 : vector<4x256xi1>, vector<4x256xf32>
    %c32 = arith.constant 32 : index
    %c0_46 = arith.constant 0 : index
    %93 = vector.load %arg10[%c32, %c0_46] : memref<200x256xf32, #tpu.memory_space<vmem>>, vector<4x256xf32>
    tpu.vector_store %arg10[%c32, %c0_46], %92 {strides = array<i32>} : memref<200x256xf32, #tpu.memory_space<vmem>>, vector<4x256xf32>,
    %94 = vector.extract_strided_slice %67 {offsets = [0, 92], sizes = [4, 256], strides = [1, 1]} : vector<4x512xf32> to vector<4x256xf32>
    %cst_47 = arith.constant 0.000000e+00 : f32
    %95 = vector.shape_cast %48 : vector<1x256xi1> to vector<1x256xi1>
    %96 = vector.broadcast %95 : vector<1x256xi1> to vector<4x256xi1>
    %97 = vector.broadcast %cst_47 : f32 to vector<4x256xf32>
    %98 = arith.select %96, %94, %97 : vector<4x256xi1>, vector<4x256xf32>
    %c40 = arith.constant 40 : index
    %c0_48 = arith.constant 0 : index
    %99 = vector.load %arg10[%c40, %c0_48] : memref<200x256xf32, #tpu.memory_space<vmem>>, vector<4x256xf32>
    tpu.vector_store %arg10[%c40, %c0_48], %98 {strides = array<i32>} : memref<200x256xf32, #tpu.memory_space<vmem>>, vector<4x256xf32>,
    %100 = vector.extract_strided_slice %67 {offsets = [0, 94], sizes = [4, 256], strides = [1, 1]} : vector<4x512xf32> to vector<4x256xf32>
    %cst_49 = arith.constant 0.000000e+00 : f32
    %101 = vector.shape_cast %57 : vector<1x256xi1> to vector<1x256xi1>
    %102 = vector.broadcast %101 : vector<1x256xi1> to vector<4x256xi1>
    %103 = vector.broadcast %cst_49 : f32 to vector<4x256xf32>
    %104 = arith.select %102, %100, %103 : vector<4x256xi1>, vector<4x256xf32>
    %c48 = arith.constant 48 : index
    %c0_50 = arith.constant 0 : index
    %105 = vector.load %arg10[%c48, %c0_50] : memref<200x256xf32, #tpu.memory_space<vmem>>, vector<4x256xf32>
    tpu.vector_store %arg10[%c48, %c0_50], %104 {strides = array<i32>} : memref<200x256xf32, #tpu.memory_space<vmem>>, vector<4x256xf32>,
    %106 = vector.extract_strided_slice %67 {offsets = [0, 96], sizes = [4, 256], strides = [1, 1]} : vector<4x512xf32> to vector<4x256xf32>
    %c56 = arith.constant 56 : index
    %c0_51 = arith.constant 0 : index
    %107 = vector.load %arg10[%c56, %c0_51] : memref<200x256xf32, #tpu.memory_space<vmem>>, vector<4x256xf32>
    tpu.vector_store %arg10[%c56, %c0_51], %106 {strides = array<i32>} : memref<200x256xf32, #tpu.memory_space<vmem>>, vector<4x256xf32>,
    %108 = vector.extract_strided_slice %67 {offsets = [0, 98], sizes = [4, 256], strides = [1, 1]} : vector<4x512xf32> to vector<4x256xf32>
    %cst_52 = arith.constant 0.000000e+00 : f32
    %109 = vector.shape_cast %21 : vector<1x256xi1> to vector<1x256xi1>
    %110 = vector.broadcast %109 : vector<1x256xi1> to vector<4x256xi1>
    %111 = vector.broadcast %cst_52 : f32 to vector<4x256xf32>
    %112 = arith.select %110, %108, %111 : vector<4x256xi1>, vector<4x256xf32>
    %c64 = arith.constant 64 : index
    %c0_53 = arith.constant 0 : index
    %113 = vector.load %arg10[%c64, %c0_53] : memref<200x256xf32, #tpu.memory_space<vmem>>, vector<4x256xf32>
    tpu.vector_store %arg10[%c64, %c0_53], %112 {strides = array<i32>} : memref<200x256xf32, #tpu.memory_space<vmem>>, vector<4x256xf32>,
    %114 = vector.extract_strided_slice %67 {offsets = [0, 100], sizes = [4, 256], strides = [1, 1]} : vector<4x512xf32> to vector<4x256xf32>
    %cst_54 = arith.constant 0.000000e+00 : f32
    %115 = vector.shape_cast %30 : vector<1x256xi1> to vector<1x256xi1>
    %116 = vector.broadcast %115 : vector<1x256xi1> to vector<4x256xi1>
    %117 = vector.broadcast %cst_54 : f32 to vector<4x256xf32>
    %118 = arith.select %116, %114, %117 : vector<4x256xi1>, vector<4x256xf32>
    %c72 = arith.constant 72 : index
    %c0_55 = arith.constant 0 : index
    %119 = vector.load %arg10[%c72, %c0_55] : memref<200x256xf32, #tpu.memory_space<vmem>>, vector<4x256xf32>
    tpu.vector_store %arg10[%c72, %c0_55], %118 {strides = array<i32>} : memref<200x256xf32, #tpu.memory_space<vmem>>, vector<4x256xf32>,
    %120 = vector.extract_strided_slice %67 {offsets = [0, 124], sizes = [4, 256], strides = [1, 1]} : vector<4x512xf32> to vector<4x256xf32>
    %cst_56 = arith.constant 0.000000e+00 : f32
    %121 = vector.shape_cast %48 : vector<1x256xi1> to vector<1x256xi1>
    %122 = vector.broadcast %121 : vector<1x256xi1> to vector<4x256xi1>
    %123 = vector.broadcast %cst_56 : f32 to vector<4x256xf32>
    %124 = arith.select %122, %120, %123 : vector<4x256xi1>, vector<4x256xf32>
    %c80 = arith.constant 80 : index
    %c0_57 = arith.constant 0 : index
    %125 = vector.load %arg10[%c80, %c0_57] : memref<200x256xf32, #tpu.memory_space<vmem>>, vector<4x256xf32>
    tpu.vector_store %arg10[%c80, %c0_57], %124 {strides = array<i32>} : memref<200x256xf32, #tpu.memory_space<vmem>>, vector<4x256xf32>,
    %126 = vector.extract_strided_slice %67 {offsets = [0, 126], sizes = [4, 256], strides = [1, 1]} : vector<4x512xf32> to vector<4x256xf32>
    %cst_58 = arith.constant 0.000000e+00 : f32
    %127 = vector.shape_cast %57 : vector<1x256xi1> to vector<1x256xi1>
    %128 = vector.broadcast %127 : vector<1x256xi1> to vector<4x256xi1>
    %129 = vector.broadcast %cst_58 : f32 to vector<4x256xf32>
    %130 = arith.select %128, %126, %129 : vector<4x256xi1>, vector<4x256xf32>
    %c88 = arith.constant 88 : index
    %c0_59 = arith.constant 0 : index
    %131 = vector.load %arg10[%c88, %c0_59] : memref<200x256xf32, #tpu.memory_space<vmem>>, vector<4x256xf32>
    tpu.vector_store %arg10[%c88, %c0_59], %130 {strides = array<i32>} : memref<200x256xf32, #tpu.memory_space<vmem>>, vector<4x256xf32>,
    %132 = vector.extract_strided_slice %67 {offsets = [0, 128], sizes = [4, 256], strides = [1, 1]} : vector<4x512xf32> to vector<4x256xf32>
    %c96 = arith.constant 96 : index
    %c0_60 = arith.constant 0 : index
    %133 = vector.load %arg10[%c96, %c0_60] : memref<200x256xf32, #tpu.memory_space<vmem>>, vector<4x256xf32>
    tpu.vector_store %arg10[%c96, %c0_60], %132 {strides = array<i32>} : memref<200x256xf32, #tpu.memory_space<vmem>>, vector<4x256xf32>,
    %134 = vector.extract_strided_slice %67 {offsets = [0, 130], sizes = [4, 256], strides = [1, 1]} : vector<4x512xf32> to vector<4x256xf32>
    %cst_61 = arith.constant 0.000000e+00 : f32
    %135 = vector.shape_cast %21 : vector<1x256xi1> to vector<1x256xi1>
    %136 = vector.broadcast %135 : vector<1x256xi1> to vector<4x256xi1>
    %137 = vector.broadcast %cst_61 : f32 to vector<4x256xf32>
    %138 = arith.select %136, %134, %137 : vector<4x256xi1>, vector<4x256xf32>
    %c104 = arith.constant 104 : index
    %c0_62 = arith.constant 0 : index
    %139 = vector.load %arg10[%c104, %c0_62] : memref<200x256xf32, #tpu.memory_space<vmem>>, vector<4x256xf32>
    tpu.vector_store %arg10[%c104, %c0_62], %138 {strides = array<i32>} : memref<200x256xf32, #tpu.memory_space<vmem>>, vector<4x256xf32>,
    %140 = vector.extract_strided_slice %67 {offsets = [0, 132], sizes = [4, 256], strides = [1, 1]} : vector<4x512xf32> to vector<4x256xf32>
    %cst_63 = arith.constant 0.000000e+00 : f32
    %141 = vector.shape_cast %30 : vector<1x256xi1> to vector<1x256xi1>
    %142 = vector.broadcast %141 : vector<1x256xi1> to vector<4x256xi1>
    %143 = vector.broadcast %cst_63 : f32 to vector<4x256xf32>
    %144 = arith.select %142, %140, %143 : vector<4x256xi1>, vector<4x256xf32>
    %c112 = arith.constant 112 : index
    %c0_64 = arith.constant 0 : index
    %145 = vector.load %arg10[%c112, %c0_64] : memref<200x256xf32, #tpu.memory_space<vmem>>, vector<4x256xf32>
    tpu.vector_store %arg10[%c112, %c0_64], %144 {strides = array<i32>} : memref<200x256xf32, #tpu.memory_space<vmem>>, vector<4x256xf32>,
    %146 = vector.extract_strided_slice %67 {offsets = [0, 156], sizes = [4, 256], strides = [1, 1]} : vector<4x512xf32> to vector<4x256xf32>
    %cst_65 = arith.constant 0.000000e+00 : f32
    %147 = vector.shape_cast %48 : vector<1x256xi1> to vector<1x256xi1>
    %148 = vector.broadcast %147 : vector<1x256xi1> to vector<4x256xi1>
    %149 = vector.broadcast %cst_65 : f32 to vector<4x256xf32>
    %150 = arith.select %148, %146, %149 : vector<4x256xi1>, vector<4x256xf32>
    %c120 = arith.constant 120 : index
    %c0_66 = arith.constant 0 : index
    %151 = vector.load %arg10[%c120, %c0_66] : memref<200x256xf32, #tpu.memory_space<vmem>>, vector<4x256xf32>
    tpu.vector_store %arg10[%c120, %c0_66], %150 {strides = array<i32>} : memref<200x256xf32, #tpu.memory_space<vmem>>, vector<4x256xf32>,
    %152 = vector.extract_strided_slice %67 {offsets = [0, 158], sizes = [4, 256], strides = [1, 1]} : vector<4x512xf32> to vector<4x256xf32>
    %cst_67 = arith.constant 0.000000e+00 : f32
    %153 = vector.shape_cast %57 : vector<1x256xi1> to vector<1x256xi1>
    %154 = vector.broadcast %153 : vector<1x256xi1> to vector<4x256xi1>
    %155 = vector.broadcast %cst_67 : f32 to vector<4x256xf32>
    %156 = arith.select %154, %152, %155 : vector<4x256xi1>, vector<4x256xf32>
    %c128_68 = arith.constant 128 : index
    %c0_69 = arith.constant 0 : index
    %157 = vector.load %arg10[%c128_68, %c0_69] : memref<200x256xf32, #tpu.memory_space<vmem>>, vector<4x256xf32>
    tpu.vector_store %arg10[%c128_68, %c0_69], %156 {strides = array<i32>} : memref<200x256xf32, #tpu.memory_space<vmem>>, vector<4x256xf32>,
    %158 = vector.extract_strided_slice %67 {offsets = [0, 160], sizes = [4, 256], strides = [1, 1]} : vector<4x512xf32> to vector<4x256xf32>
    %c136 = arith.constant 136 : index
    %c0_70 = arith.constant 0 : index
    %159 = vector.load %arg10[%c136, %c0_70] : memref<200x256xf32, #tpu.memory_space<vmem>>, vector<4x256xf32>
    tpu.vector_store %arg10[%c136, %c0_70], %158 {strides = array<i32>} : memref<200x256xf32, #tpu.memory_space<vmem>>, vector<4x256xf32>,
    %160 = vector.extract_strided_slice %67 {offsets = [0, 162], sizes = [4, 256], strides = [1, 1]} : vector<4x512xf32> to vector<4x256xf32>
    %cst_71 = arith.constant 0.000000e+00 : f32
    %161 = vector.shape_cast %21 : vector<1x256xi1> to vector<1x256xi1>
    %162 = vector.broadcast %161 : vector<1x256xi1> to vector<4x256xi1>
    %163 = vector.broadcast %cst_71 : f32 to vector<4x256xf32>
    %164 = arith.select %162, %160, %163 : vector<4x256xi1>, vector<4x256xf32>
    %c144 = arith.constant 144 : index
    %c0_72 = arith.constant 0 : index
    %165 = vector.load %arg10[%c144, %c0_72] : memref<200x256xf32, #tpu.memory_space<vmem>>, vector<4x256xf32>
    tpu.vector_store %arg10[%c144, %c0_72], %164 {strides = array<i32>} : memref<200x256xf32, #tpu.memory_space<vmem>>, vector<4x256xf32>,
    %166 = vector.extract_strided_slice %67 {offsets = [0, 164], sizes = [4, 256], strides = [1, 1]} : vector<4x512xf32> to vector<4x256xf32>
    %cst_73 = arith.constant 0.000000e+00 : f32
    %167 = vector.shape_cast %30 : vector<1x256xi1> to vector<1x256xi1>
    %168 = vector.broadcast %167 : vector<1x256xi1> to vector<4x256xi1>
    %169 = vector.broadcast %cst_73 : f32 to vector<4x256xf32>
    %170 = arith.select %168, %166, %169 : vector<4x256xi1>, vector<4x256xf32>
    %c152 = arith.constant 152 : index
    %c0_74 = arith.constant 0 : index
    %171 = vector.load %arg10[%c152, %c0_74] : memref<200x256xf32, #tpu.memory_space<vmem>>, vector<4x256xf32>
    tpu.vector_store %arg10[%c152, %c0_74], %170 {strides = array<i32>} : memref<200x256xf32, #tpu.memory_space<vmem>>, vector<4x256xf32>,
    %172 = vector.extract_strided_slice %67 {offsets = [0, 188], sizes = [4, 256], strides = [1, 1]} : vector<4x512xf32> to vector<4x256xf32>
    %cst_75 = arith.constant 0.000000e+00 : f32
    %173 = vector.shape_cast %48 : vector<1x256xi1> to vector<1x256xi1>
    %174 = vector.broadcast %173 : vector<1x256xi1> to vector<4x256xi1>
    %175 = vector.broadcast %cst_75 : f32 to vector<4x256xf32>
    %176 = arith.select %174, %172, %175 : vector<4x256xi1>, vector<4x256xf32>
    %c160 = arith.constant 160 : index
    %c0_76 = arith.constant 0 : index
    %177 = vector.load %arg10[%c160, %c0_76] : memref<200x256xf32, #tpu.memory_space<vmem>>, vector<4x256xf32>
    tpu.vector_store %arg10[%c160, %c0_76], %176 {strides = array<i32>} : memref<200x256xf32, #tpu.memory_space<vmem>>, vector<4x256xf32>,
    %178 = vector.extract_strided_slice %67 {offsets = [0, 190], sizes = [4, 256], strides = [1, 1]} : vector<4x512xf32> to vector<4x256xf32>
    %cst_77 = arith.constant 0.000000e+00 : f32
    %179 = vector.shape_cast %57 : vector<1x256xi1> to vector<1x256xi1>
    %180 = vector.broadcast %179 : vector<1x256xi1> to vector<4x256xi1>
    %181 = vector.broadcast %cst_77 : f32 to vector<4x256xf32>
    %182 = arith.select %180, %178, %181 : vector<4x256xi1>, vector<4x256xf32>
    %c168 = arith.constant 168 : index
    %c0_78 = arith.constant 0 : index
    %183 = vector.load %arg10[%c168, %c0_78] : memref<200x256xf32, #tpu.memory_space<vmem>>, vector<4x256xf32>
    tpu.vector_store %arg10[%c168, %c0_78], %182 {strides = array<i32>} : memref<200x256xf32, #tpu.memory_space<vmem>>, vector<4x256xf32>,
    %184 = vector.extract_strided_slice %67 {offsets = [0, 192], sizes = [4, 256], strides = [1, 1]} : vector<4x512xf32> to vector<4x256xf32>
    %c176 = arith.constant 176 : index
    %c0_79 = arith.constant 0 : index
    %185 = vector.load %arg10[%c176, %c0_79] : memref<200x256xf32, #tpu.memory_space<vmem>>, vector<4x256xf32>
    tpu.vector_store %arg10[%c176, %c0_79], %184 {strides = array<i32>} : memref<200x256xf32, #tpu.memory_space<vmem>>, vector<4x256xf32>,
    %186 = vector.extract_strided_slice %67 {offsets = [0, 194], sizes = [4, 256], strides = [1, 1]} : vector<4x512xf32> to vector<4x256xf32>
    %cst_80 = arith.constant 0.000000e+00 : f32
    %187 = vector.shape_cast %21 : vector<1x256xi1> to vector<1x256xi1>
    %188 = vector.broadcast %187 : vector<1x256xi1> to vector<4x256xi1>
    %189 = vector.broadcast %cst_80 : f32 to vector<4x256xf32>
    %190 = arith.select %188, %186, %189 : vector<4x256xi1>, vector<4x256xf32>
    %c184 = arith.constant 184 : index
    %c0_81 = arith.constant 0 : index
    %191 = vector.load %arg10[%c184, %c0_81] : memref<200x256xf32, #tpu.memory_space<vmem>>, vector<4x256xf32>
    tpu.vector_store %arg10[%c184, %c0_81], %190 {strides = array<i32>} : memref<200x256xf32, #tpu.memory_space<vmem>>, vector<4x256xf32>,
    %192 = vector.extract_strided_slice %67 {offsets = [0, 196], sizes = [4, 256], strides = [1, 1]} : vector<4x512xf32> to vector<4x256xf32>
    %cst_82 = arith.constant 0.000000e+00 : f32
    %193 = vector.shape_cast %30 : vector<1x256xi1> to vector<1x256xi1>
    %194 = vector.broadcast %193 : vector<1x256xi1> to vector<4x256xi1>
    %195 = vector.broadcast %cst_82 : f32 to vector<4x256xf32>
    %196 = arith.select %194, %192, %195 : vector<4x256xi1>, vector<4x256xf32>
    %c192 = arith.constant 192 : index
    %c0_83 = arith.constant 0 : index
    %197 = vector.load %arg10[%c192, %c0_83] : memref<200x256xf32, #tpu.memory_space<vmem>>, vector<4x256xf32>
    tpu.vector_store %arg10[%c192, %c0_83], %196 {strides = array<i32>} : memref<200x256xf32, #tpu.memory_space<vmem>>, vector<4x256xf32>,
    %c0_84 = arith.constant 0 : index
    %c0_85 = arith.constant 0 : index
    %198 = vector.load %arg10[%c0_84, %c0_85] : memref<200x256xf32, #tpu.memory_space<vmem>>, vector<200x256xf32>
    %cst_86 = arith.constant dense<0.000000e+00> : vector<8x256xf32>
    %199 = tpu.matmul %0, %198, %cst_86 {dimension_numbers = #tpu.dot_dimension_numbers<[1], [0], [0], [1], [0, 0, 1, 1], [], []>} : vector<8x200xf32>, vector<200x256xf32>, vector<8x256xf32> -> vector<8x256xf32>
    %200 = vector.broadcast %1 : vector<8x1xf32> to vector<8x256xf32>
    %201 = arith.addf %199, %200 : vector<8x256xf32>
    %cst_87 = arith.constant 0.000000e+00 : f32
    %202 = vector.broadcast %cst_87 : f32 to vector<8x256xf32>
    %203 = arith.cmpf ogt, %201, %202 : vector<8x256xf32>
    %204 = math.exp %201 : vector<8x256xf32>
    %cst_88 = arith.constant 1.000000e+00 : f32
    %205 = vector.broadcast %cst_88 : f32 to vector<8x256xf32>
    %206 = arith.subf %204, %205 : vector<8x256xf32>
    %207 = arith.select %203, %201, %206 : vector<8x256xi1>, vector<8x256xf32>
    %c0_89 = arith.constant 0 : index
    %c0_90 = arith.constant 0 : index
    %c0_91 = arith.constant 0 : index
    %208 = vector.load %arg6[%c0_89, %c0_90, %c0_91] : memref<2x8x256xf32, #tpu.memory_space<vmem>>, vector<1x8x256xf32>
    %209 = vector.shape_cast %208 : vector<1x8x256xf32> to vector<8x256xf32>
    %210 = vector.shape_cast %207 : vector<8x256xf32> to vector<1x8x256xf32>
    tpu.vector_store %arg6[%c0_89, %c0_90, %c0_91], %210 {strides = array<i32>} : memref<2x8x256xf32, #tpu.memory_space<vmem>>, vector<1x8x256xf32>,
    %c0_92 = arith.constant 0 : index
    %c128_93 = arith.constant 128 : index
    %211 = vector.load %arg9[%c0_92, %c128_93] : memref<8x512xf32, #tpu.memory_space<vmem>>, vector<8x256xf32>
    tpu.vector_store %arg9[%c0_92, %c128_93], %207 {strides = array<i32>} : memref<8x512xf32, #tpu.memory_space<vmem>>, vector<8x256xf32>,
    %c0_94 = arith.constant 0 : index
    %c0_95 = arith.constant 0 : index
    %212 = vector.load %arg9[%c0_94, %c0_95] : memref<8x512xf32, #tpu.memory_space<vmem>>, vector<8x512xf32>
    %213 = vector.extract_strided_slice %212 {offsets = [0, 111], sizes = [8, 256], strides = [1, 1]} : vector<8x512xf32> to vector<8x256xf32>
    %cst_96 = arith.constant -1.000000e+30 : f32
    %214 = vector.shape_cast %39 : vector<1x256xi1> to vector<1x256xi1>
    %215 = vector.broadcast %214 : vector<1x256xi1> to vector<8x256xi1>
    %216 = vector.broadcast %cst_96 : f32 to vector<8x256xf32>
    %217 = arith.select %215, %213, %216 : vector<8x256xi1>, vector<8x256xf32>
    %218 = arith.maximumf %207, %217 : vector<8x256xf32>
    %219 = vector.extract_strided_slice %212 {offsets = [0, 112], sizes = [8, 256], strides = [1, 1]} : vector<8x512xf32> to vector<8x256xf32>
    %220 = arith.maximumf %218, %219 : vector<8x256xf32>
    %221 = vector.extract_strided_slice %212 {offsets = [0, 113], sizes = [8, 256], strides = [1, 1]} : vector<8x512xf32> to vector<8x256xf32>
    %cst_97 = arith.constant -1.000000e+30 : f32
    %222 = vector.shape_cast %12 : vector<1x256xi1> to vector<1x256xi1>
    %223 = vector.broadcast %222 : vector<1x256xi1> to vector<8x256xi1>
    %224 = vector.broadcast %cst_97 : f32 to vector<8x256xf32>
    %225 = arith.select %223, %221, %224 : vector<8x256xi1>, vector<8x256xf32>
    %226 = arith.maximumf %220, %225 : vector<8x256xf32>
    %227 = vector.extract_strided_slice %212 {offsets = [0, 127], sizes = [8, 256], strides = [1, 1]} : vector<8x512xf32> to vector<8x256xf32>
    %cst_98 = arith.constant -1.000000e+30 : f32
    %228 = vector.shape_cast %39 : vector<1x256xi1> to vector<1x256xi1>
    %229 = vector.broadcast %228 : vector<1x256xi1> to vector<8x256xi1>
    %230 = vector.broadcast %cst_98 : f32 to vector<8x256xf32>
    %231 = arith.select %229, %227, %230 : vector<8x256xi1>, vector<8x256xf32>
    %232 = arith.maximumf %226, %231 : vector<8x256xf32>
    %233 = vector.extract_strided_slice %212 {offsets = [0, 129], sizes = [8, 256], strides = [1, 1]} : vector<8x512xf32> to vector<8x256xf32>
    %cst_99 = arith.constant -1.000000e+30 : f32
    %234 = vector.shape_cast %12 : vector<1x256xi1> to vector<1x256xi1>
    %235 = vector.broadcast %234 : vector<1x256xi1> to vector<8x256xi1>
    %236 = vector.broadcast %cst_99 : f32 to vector<8x256xf32>
    %237 = arith.select %235, %233, %236 : vector<8x256xi1>, vector<8x256xf32>
    %238 = arith.maximumf %232, %237 : vector<8x256xf32>
    %239 = vector.extract_strided_slice %212 {offsets = [0, 143], sizes = [8, 256], strides = [1, 1]} : vector<8x512xf32> to vector<8x256xf32>
    %cst_100 = arith.constant -1.000000e+30 : f32
    %240 = vector.shape_cast %39 : vector<1x256xi1> to vector<1x256xi1>
    %241 = vector.broadcast %240 : vector<1x256xi1> to vector<8x256xi1>
    %242 = vector.broadcast %cst_100 : f32 to vector<8x256xf32>
    %243 = arith.select %241, %239, %242 : vector<8x256xi1>, vector<8x256xf32>
    %244 = arith.maximumf %238, %243 : vector<8x256xf32>
    %245 = vector.extract_strided_slice %212 {offsets = [0, 144], sizes = [8, 256], strides = [1, 1]} : vector<8x512xf32> to vector<8x256xf32>
    %246 = arith.maximumf %244, %245 : vector<8x256xf32>
    %247 = vector.extract_strided_slice %212 {offsets = [0, 145], sizes = [8, 256], strides = [1, 1]} : vector<8x512xf32> to vector<8x256xf32>
    %cst_101 = arith.constant -1.000000e+30 : f32
    %248 = vector.shape_cast %12 : vector<1x256xi1> to vector<1x256xi1>
    %249 = vector.broadcast %248 : vector<1x256xi1> to vector<8x256xi1>
    %250 = vector.broadcast %cst_101 : f32 to vector<8x256xf32>
    %251 = arith.select %249, %247, %250 : vector<8x256xi1>, vector<8x256xf32>
    %252 = arith.maximumf %246, %251 : vector<8x256xf32>
    %cst_102 = arith.constant dense<0.000000e+00> : vector<8x64xf32>
    %253 = tpu.matmul %252, %3, %cst_102 {dimension_numbers = #tpu.dot_dimension_numbers<[1], [0], [0], [1], [0, 0, 1, 1], [], []>} : vector<8x256xf32>, vector<256x64xf32>, vector<8x64xf32> -> vector<8x64xf32>
    %c0_103 = arith.constant 0 : index
    %c0_104 = arith.constant 0 : index
    %c0_105 = arith.constant 0 : index
    %254 = vector.load %arg7[%c0_103, %c0_104, %c0_105] : memref<2x8x64xf32, #tpu.memory_space<vmem>>, vector<1x8x64xf32>
    %255 = vector.shape_cast %254 : vector<1x8x64xf32> to vector<8x64xf32>
    %256 = vector.shape_cast %253 : vector<8x64xf32> to vector<1x8x64xf32>
    tpu.vector_store %arg7[%c0_103, %c0_104, %c0_105], %256 {strides = array<i32>} : memref<2x8x64xf32, #tpu.memory_space<vmem>>, vector<1x8x64xf32>,
    %c1 = arith.constant 1 : index
    %c0_106 = arith.constant 0 : index
    %c0_107 = arith.constant 0 : index
    %257 = vector.load %arg1[%c1, %c0_106, %c0_107] : memref<2x4x256xf32, #tpu.memory_space<vmem>>, vector<1x4x256xf32>
    %258 = vector.shape_cast %257 : vector<1x4x256xf32> to vector<4x256xf32>
    %c0_108 = arith.constant 0 : index
    %c128_109 = arith.constant 128 : index
    %259 = vector.load %arg8[%c0_108, %c128_109] : memref<4x512xf32, #tpu.memory_space<vmem>>, vector<4x256xf32>
    tpu.vector_store %arg8[%c0_108, %c128_109], %258 {strides = array<i32>} : memref<4x512xf32, #tpu.memory_space<vmem>>, vector<4x256xf32>,
    %c0_110 = arith.constant 0 : index
    %c0_111 = arith.constant 0 : index
    %260 = vector.load %arg8[%c0_110, %c0_111] : memref<4x512xf32, #tpu.memory_space<vmem>>, vector<4x512xf32>
    %261 = vector.extract_strided_slice %260 {offsets = [0, 60], sizes = [4, 256], strides = [1, 1]} : vector<4x512xf32> to vector<4x256xf32>
    %cst_112 = arith.constant 0.000000e+00 : f32
    %262 = vector.shape_cast %48 : vector<1x256xi1> to vector<1x256xi1>
    %263 = vector.broadcast %262 : vector<1x256xi1> to vector<4x256xi1>
    %264 = vector.broadcast %cst_112 : f32 to vector<4x256xf32>
    %265 = arith.select %263, %261, %264 : vector<4x256xi1>, vector<4x256xf32>
    %c0_113 = arith.constant 0 : index
    %c0_114 = arith.constant 0 : index
    %266 = vector.load %arg10[%c0_113, %c0_114] : memref<200x256xf32, #tpu.memory_space<vmem>>, vector<4x256xf32>
    tpu.vector_store %arg10[%c0_113, %c0_114], %265 {strides = array<i32>} : memref<200x256xf32, #tpu.memory_space<vmem>>, vector<4x256xf32>,
    %267 = vector.extract_strided_slice %260 {offsets = [0, 62], sizes = [4, 256], strides = [1, 1]} : vector<4x512xf32> to vector<4x256xf32>
    %cst_115 = arith.constant 0.000000e+00 : f32
    %268 = vector.shape_cast %57 : vector<1x256xi1> to vector<1x256xi1>
    %269 = vector.broadcast %268 : vector<1x256xi1> to vector<4x256xi1>
    %270 = vector.broadcast %cst_115 : f32 to vector<4x256xf32>
    %271 = arith.select %269, %267, %270 : vector<4x256xi1>, vector<4x256xf32>
    %c8_116 = arith.constant 8 : index
    %c0_117 = arith.constant 0 : index
    %272 = vector.load %arg10[%c8_116, %c0_117] : memref<200x256xf32, #tpu.memory_space<vmem>>, vector<4x256xf32>
    tpu.vector_store %arg10[%c8_116, %c0_117], %271 {strides = array<i32>} : memref<200x256xf32, #tpu.memory_space<vmem>>, vector<4x256xf32>,
    %273 = vector.extract_strided_slice %260 {offsets = [0, 64], sizes = [4, 256], strides = [1, 1]} : vector<4x512xf32> to vector<4x256xf32>
    %c16_118 = arith.constant 16 : index
    %c0_119 = arith.constant 0 : index
    %274 = vector.load %arg10[%c16_118, %c0_119] : memref<200x256xf32, #tpu.memory_space<vmem>>, vector<4x256xf32>
    tpu.vector_store %arg10[%c16_118, %c0_119], %273 {strides = array<i32>} : memref<200x256xf32, #tpu.memory_space<vmem>>, vector<4x256xf32>,
    %275 = vector.extract_strided_slice %260 {offsets = [0, 66], sizes = [4, 256], strides = [1, 1]} : vector<4x512xf32> to vector<4x256xf32>
    %cst_120 = arith.constant 0.000000e+00 : f32
    %276 = vector.shape_cast %21 : vector<1x256xi1> to vector<1x256xi1>
    %277 = vector.broadcast %276 : vector<1x256xi1> to vector<4x256xi1>
    %278 = vector.broadcast %cst_120 : f32 to vector<4x256xf32>
    %279 = arith.select %277, %275, %278 : vector<4x256xi1>, vector<4x256xf32>
    %c24_121 = arith.constant 24 : index
    %c0_122 = arith.constant 0 : index
    %280 = vector.load %arg10[%c24_121, %c0_122] : memref<200x256xf32, #tpu.memory_space<vmem>>, vector<4x256xf32>
    tpu.vector_store %arg10[%c24_121, %c0_122], %279 {strides = array<i32>} : memref<200x256xf32, #tpu.memory_space<vmem>>, vector<4x256xf32>,
    %281 = vector.extract_strided_slice %260 {offsets = [0, 68], sizes = [4, 256], strides = [1, 1]} : vector<4x512xf32> to vector<4x256xf32>
    %cst_123 = arith.constant 0.000000e+00 : f32
    %282 = vector.shape_cast %30 : vector<1x256xi1> to vector<1x256xi1>
    %283 = vector.broadcast %282 : vector<1x256xi1> to vector<4x256xi1>
    %284 = vector.broadcast %cst_123 : f32 to vector<4x256xf32>
    %285 = arith.select %283, %281, %284 : vector<4x256xi1>, vector<4x256xf32>
    %c32_124 = arith.constant 32 : index
    %c0_125 = arith.constant 0 : index
    %286 = vector.load %arg10[%c32_124, %c0_125] : memref<200x256xf32, #tpu.memory_space<vmem>>, vector<4x256xf32>
    tpu.vector_store %arg10[%c32_124, %c0_125], %285 {strides = array<i32>} : memref<200x256xf32, #tpu.memory_space<vmem>>, vector<4x256xf32>,
    %287 = vector.extract_strided_slice %260 {offsets = [0, 92], sizes = [4, 256], strides = [1, 1]} : vector<4x512xf32> to vector<4x256xf32>
    %cst_126 = arith.constant 0.000000e+00 : f32
    %288 = vector.shape_cast %48 : vector<1x256xi1> to vector<1x256xi1>
    %289 = vector.broadcast %288 : vector<1x256xi1> to vector<4x256xi1>
    %290 = vector.broadcast %cst_126 : f32 to vector<4x256xf32>
    %291 = arith.select %289, %287, %290 : vector<4x256xi1>, vector<4x256xf32>
    %c40_127 = arith.constant 40 : index
    %c0_128 = arith.constant 0 : index
    %292 = vector.load %arg10[%c40_127, %c0_128] : memref<200x256xf32, #tpu.memory_space<vmem>>, vector<4x256xf32>
    tpu.vector_store %arg10[%c40_127, %c0_128], %291 {strides = array<i32>} : memref<200x256xf32, #tpu.memory_space<vmem>>, vector<4x256xf32>,
    %293 = vector.extract_strided_slice %260 {offsets = [0, 94], sizes = [4, 256], strides = [1, 1]} : vector<4x512xf32> to vector<4x256xf32>
    %cst_129 = arith.constant 0.000000e+00 : f32
    %294 = vector.shape_cast %57 : vector<1x256xi1> to vector<1x256xi1>
    %295 = vector.broadcast %294 : vector<1x256xi1> to vector<4x256xi1>
    %296 = vector.broadcast %cst_129 : f32 to vector<4x256xf32>
    %297 = arith.select %295, %293, %296 : vector<4x256xi1>, vector<4x256xf32>
    %c48_130 = arith.constant 48 : index
    %c0_131 = arith.constant 0 : index
    %298 = vector.load %arg10[%c48_130, %c0_131] : memref<200x256xf32, #tpu.memory_space<vmem>>, vector<4x256xf32>
    tpu.vector_store %arg10[%c48_130, %c0_131], %297 {strides = array<i32>} : memref<200x256xf32, #tpu.memory_space<vmem>>, vector<4x256xf32>,
    %299 = vector.extract_strided_slice %260 {offsets = [0, 96], sizes = [4, 256], strides = [1, 1]} : vector<4x512xf32> to vector<4x256xf32>
    %c56_132 = arith.constant 56 : index
    %c0_133 = arith.constant 0 : index
    %300 = vector.load %arg10[%c56_132, %c0_133] : memref<200x256xf32, #tpu.memory_space<vmem>>, vector<4x256xf32>
    tpu.vector_store %arg10[%c56_132, %c0_133], %299 {strides = array<i32>} : memref<200x256xf32, #tpu.memory_space<vmem>>, vector<4x256xf32>,
    %301 = vector.extract_strided_slice %260 {offsets = [0, 98], sizes = [4, 256], strides = [1, 1]} : vector<4x512xf32> to vector<4x256xf32>
    %cst_134 = arith.constant 0.000000e+00 : f32
    %302 = vector.shape_cast %21 : vector<1x256xi1> to vector<1x256xi1>
    %303 = vector.broadcast %302 : vector<1x256xi1> to vector<4x256xi1>
    %304 = vector.broadcast %cst_134 : f32 to vector<4x256xf32>
    %305 = arith.select %303, %301, %304 : vector<4x256xi1>, vector<4x256xf32>
    %c64_135 = arith.constant 64 : index
    %c0_136 = arith.constant 0 : index
    %306 = vector.load %arg10[%c64_135, %c0_136] : memref<200x256xf32, #tpu.memory_space<vmem>>, vector<4x256xf32>
    tpu.vector_store %arg10[%c64_135, %c0_136], %305 {strides = array<i32>} : memref<200x256xf32, #tpu.memory_space<vmem>>, vector<4x256xf32>,
    %307 = vector.extract_strided_slice %260 {offsets = [0, 100], sizes = [4, 256], strides = [1, 1]} : vector<4x512xf32> to vector<4x256xf32>
    %cst_137 = arith.constant 0.000000e+00 : f32
    %308 = vector.shape_cast %30 : vector<1x256xi1> to vector<1x256xi1>
    %309 = vector.broadcast %308 : vector<1x256xi1> to vector<4x256xi1>
    %310 = vector.broadcast %cst_137 : f32 to vector<4x256xf32>
    %311 = arith.select %309, %307, %310 : vector<4x256xi1>, vector<4x256xf32>
    %c72_138 = arith.constant 72 : index
    %c0_139 = arith.constant 0 : index
    %312 = vector.load %arg10[%c72_138, %c0_139] : memref<200x256xf32, #tpu.memory_space<vmem>>, vector<4x256xf32>
    tpu.vector_store %arg10[%c72_138, %c0_139], %311 {strides = array<i32>} : memref<200x256xf32, #tpu.memory_space<vmem>>, vector<4x256xf32>,
    %313 = vector.extract_strided_slice %260 {offsets = [0, 124], sizes = [4, 256], strides = [1, 1]} : vector<4x512xf32> to vector<4x256xf32>
    %cst_140 = arith.constant 0.000000e+00 : f32
    %314 = vector.shape_cast %48 : vector<1x256xi1> to vector<1x256xi1>
    %315 = vector.broadcast %314 : vector<1x256xi1> to vector<4x256xi1>
    %316 = vector.broadcast %cst_140 : f32 to vector<4x256xf32>
    %317 = arith.select %315, %313, %316 : vector<4x256xi1>, vector<4x256xf32>
    %c80_141 = arith.constant 80 : index
    %c0_142 = arith.constant 0 : index
    %318 = vector.load %arg10[%c80_141, %c0_142] : memref<200x256xf32, #tpu.memory_space<vmem>>, vector<4x256xf32>
    tpu.vector_store %arg10[%c80_141, %c0_142], %317 {strides = array<i32>} : memref<200x256xf32, #tpu.memory_space<vmem>>, vector<4x256xf32>,
    %319 = vector.extract_strided_slice %260 {offsets = [0, 126], sizes = [4, 256], strides = [1, 1]} : vector<4x512xf32> to vector<4x256xf32>
    %cst_143 = arith.constant 0.000000e+00 : f32
    %320 = vector.shape_cast %57 : vector<1x256xi1> to vector<1x256xi1>
    %321 = vector.broadcast %320 : vector<1x256xi1> to vector<4x256xi1>
    %322 = vector.broadcast %cst_143 : f32 to vector<4x256xf32>
    %323 = arith.select %321, %319, %322 : vector<4x256xi1>, vector<4x256xf32>
    %c88_144 = arith.constant 88 : index
    %c0_145 = arith.constant 0 : index
    %324 = vector.load %arg10[%c88_144, %c0_145] : memref<200x256xf32, #tpu.memory_space<vmem>>, vector<4x256xf32>
    tpu.vector_store %arg10[%c88_144, %c0_145], %323 {strides = array<i32>} : memref<200x256xf32, #tpu.memory_space<vmem>>, vector<4x256xf32>,
    %325 = vector.extract_strided_slice %260 {offsets = [0, 128], sizes = [4, 256], strides = [1, 1]} : vector<4x512xf32> to vector<4x256xf32>
    %c96_146 = arith.constant 96 : index
    %c0_147 = arith.constant 0 : index
    %326 = vector.load %arg10[%c96_146, %c0_147] : memref<200x256xf32, #tpu.memory_space<vmem>>, vector<4x256xf32>
    tpu.vector_store %arg10[%c96_146, %c0_147], %325 {strides = array<i32>} : memref<200x256xf32, #tpu.memory_space<vmem>>, vector<4x256xf32>,
    %327 = vector.extract_strided_slice %260 {offsets = [0, 130], sizes = [4, 256], strides = [1, 1]} : vector<4x512xf32> to vector<4x256xf32>
    %cst_148 = arith.constant 0.000000e+00 : f32
    %328 = vector.shape_cast %21 : vector<1x256xi1> to vector<1x256xi1>
    %329 = vector.broadcast %328 : vector<1x256xi1> to vector<4x256xi1>
    %330 = vector.broadcast %cst_148 : f32 to vector<4x256xf32>
    %331 = arith.select %329, %327, %330 : vector<4x256xi1>, vector<4x256xf32>
    %c104_149 = arith.constant 104 : index
    %c0_150 = arith.constant 0 : index
    %332 = vector.load %arg10[%c104_149, %c0_150] : memref<200x256xf32, #tpu.memory_space<vmem>>, vector<4x256xf32>
    tpu.vector_store %arg10[%c104_149, %c0_150], %331 {strides = array<i32>} : memref<200x256xf32, #tpu.memory_space<vmem>>, vector<4x256xf32>,
    %333 = vector.extract_strided_slice %260 {offsets = [0, 132], sizes = [4, 256], strides = [1, 1]} : vector<4x512xf32> to vector<4x256xf32>
    %cst_151 = arith.constant 0.000000e+00 : f32
    %334 = vector.shape_cast %30 : vector<1x256xi1> to vector<1x256xi1>
    %335 = vector.broadcast %334 : vector<1x256xi1> to vector<4x256xi1>
    %336 = vector.broadcast %cst_151 : f32 to vector<4x256xf32>
    %337 = arith.select %335, %333, %336 : vector<4x256xi1>, vector<4x256xf32>
    %c112_152 = arith.constant 112 : index
    %c0_153 = arith.constant 0 : index
    %338 = vector.load %arg10[%c112_152, %c0_153] : memref<200x256xf32, #tpu.memory_space<vmem>>, vector<4x256xf32>
    tpu.vector_store %arg10[%c112_152, %c0_153], %337 {strides = array<i32>} : memref<200x256xf32, #tpu.memory_space<vmem>>, vector<4x256xf32>,
    %339 = vector.extract_strided_slice %260 {offsets = [0, 156], sizes = [4, 256], strides = [1, 1]} : vector<4x512xf32> to vector<4x256xf32>
    %cst_154 = arith.constant 0.000000e+00 : f32
    %340 = vector.shape_cast %48 : vector<1x256xi1> to vector<1x256xi1>
    %341 = vector.broadcast %340 : vector<1x256xi1> to vector<4x256xi1>
    %342 = vector.broadcast %cst_154 : f32 to vector<4x256xf32>
    %343 = arith.select %341, %339, %342 : vector<4x256xi1>, vector<4x256xf32>
    %c120_155 = arith.constant 120 : index
    %c0_156 = arith.constant 0 : index
    %344 = vector.load %arg10[%c120_155, %c0_156] : memref<200x256xf32, #tpu.memory_space<vmem>>, vector<4x256xf32>
    tpu.vector_store %arg10[%c120_155, %c0_156], %343 {strides = array<i32>} : memref<200x256xf32, #tpu.memory_space<vmem>>, vector<4x256xf32>,
    %345 = vector.extract_strided_slice %260 {offsets = [0, 158], sizes = [4, 256], strides = [1, 1]} : vector<4x512xf32> to vector<4x256xf32>
    %cst_157 = arith.constant 0.000000e+00 : f32
    %346 = vector.shape_cast %57 : vector<1x256xi1> to vector<1x256xi1>
    %347 = vector.broadcast %346 : vector<1x256xi1> to vector<4x256xi1>
    %348 = vector.broadcast %cst_157 : f32 to vector<4x256xf32>
    %349 = arith.select %347, %345, %348 : vector<4x256xi1>, vector<4x256xf32>
    %c128_158 = arith.constant 128 : index
    %c0_159 = arith.constant 0 : index
    %350 = vector.load %arg10[%c128_158, %c0_159] : memref<200x256xf32, #tpu.memory_space<vmem>>, vector<4x256xf32>
    tpu.vector_store %arg10[%c128_158, %c0_159], %349 {strides = array<i32>} : memref<200x256xf32, #tpu.memory_space<vmem>>, vector<4x256xf32>,
    %351 = vector.extract_strided_slice %260 {offsets = [0, 160], sizes = [4, 256], strides = [1, 1]} : vector<4x512xf32> to vector<4x256xf32>
    %c136_160 = arith.constant 136 : index
    %c0_161 = arith.constant 0 : index
    %352 = vector.load %arg10[%c136_160, %c0_161] : memref<200x256xf32, #tpu.memory_space<vmem>>, vector<4x256xf32>
    tpu.vector_store %arg10[%c136_160, %c0_161], %351 {strides = array<i32>} : memref<200x256xf32, #tpu.memory_space<vmem>>, vector<4x256xf32>,
    %353 = vector.extract_strided_slice %260 {offsets = [0, 162], sizes = [4, 256], strides = [1, 1]} : vector<4x512xf32> to vector<4x256xf32>
    %cst_162 = arith.constant 0.000000e+00 : f32
    %354 = vector.shape_cast %21 : vector<1x256xi1> to vector<1x256xi1>
    %355 = vector.broadcast %354 : vector<1x256xi1> to vector<4x256xi1>
    %356 = vector.broadcast %cst_162 : f32 to vector<4x256xf32>
    %357 = arith.select %355, %353, %356 : vector<4x256xi1>, vector<4x256xf32>
    %c144_163 = arith.constant 144 : index
    %c0_164 = arith.constant 0 : index
    %358 = vector.load %arg10[%c144_163, %c0_164] : memref<200x256xf32, #tpu.memory_space<vmem>>, vector<4x256xf32>
    tpu.vector_store %arg10[%c144_163, %c0_164], %357 {strides = array<i32>} : memref<200x256xf32, #tpu.memory_space<vmem>>, vector<4x256xf32>,
    %359 = vector.extract_strided_slice %260 {offsets = [0, 164], sizes = [4, 256], strides = [1, 1]} : vector<4x512xf32> to vector<4x256xf32>
    %cst_165 = arith.constant 0.000000e+00 : f32
    %360 = vector.shape_cast %30 : vector<1x256xi1> to vector<1x256xi1>
    %361 = vector.broadcast %360 : vector<1x256xi1> to vector<4x256xi1>
    %362 = vector.broadcast %cst_165 : f32 to vector<4x256xf32>
    %363 = arith.select %361, %359, %362 : vector<4x256xi1>, vector<4x256xf32>
    %c152_166 = arith.constant 152 : index
    %c0_167 = arith.constant 0 : index
    %364 = vector.load %arg10[%c152_166, %c0_167] : memref<200x256xf32, #tpu.memory_space<vmem>>, vector<4x256xf32>
    tpu.vector_store %arg10[%c152_166, %c0_167], %363 {strides = array<i32>} : memref<200x256xf32, #tpu.memory_space<vmem>>, vector<4x256xf32>,
    %365 = vector.extract_strided_slice %260 {offsets = [0, 188], sizes = [4, 256], strides = [1, 1]} : vector<4x512xf32> to vector<4x256xf32>
    %cst_168 = arith.constant 0.000000e+00 : f32
    %366 = vector.shape_cast %48 : vector<1x256xi1> to vector<1x256xi1>
    %367 = vector.broadcast %366 : vector<1x256xi1> to vector<4x256xi1>
    %368 = vector.broadcast %cst_168 : f32 to vector<4x256xf32>
    %369 = arith.select %367, %365, %368 : vector<4x256xi1>, vector<4x256xf32>
    %c160_169 = arith.constant 160 : index
    %c0_170 = arith.constant 0 : index
    %370 = vector.load %arg10[%c160_169, %c0_170] : memref<200x256xf32, #tpu.memory_space<vmem>>, vector<4x256xf32>
    tpu.vector_store %arg10[%c160_169, %c0_170], %369 {strides = array<i32>} : memref<200x256xf32, #tpu.memory_space<vmem>>, vector<4x256xf32>,
    %371 = vector.extract_strided_slice %260 {offsets = [0, 190], sizes = [4, 256], strides = [1, 1]} : vector<4x512xf32> to vector<4x256xf32>
    %cst_171 = arith.constant 0.000000e+00 : f32
    %372 = vector.shape_cast %57 : vector<1x256xi1> to vector<1x256xi1>
    %373 = vector.broadcast %372 : vector<1x256xi1> to vector<4x256xi1>
    %374 = vector.broadcast %cst_171 : f32 to vector<4x256xf32>
    %375 = arith.select %373, %371, %374 : vector<4x256xi1>, vector<4x256xf32>
    %c168_172 = arith.constant 168 : index
    %c0_173 = arith.constant 0 : index
    %376 = vector.load %arg10[%c168_172, %c0_173] : memref<200x256xf32, #tpu.memory_space<vmem>>, vector<4x256xf32>
    tpu.vector_store %arg10[%c168_172, %c0_173], %375 {strides = array<i32>} : memref<200x256xf32, #tpu.memory_space<vmem>>, vector<4x256xf32>,
    %377 = vector.extract_strided_slice %260 {offsets = [0, 192], sizes = [4, 256], strides = [1, 1]} : vector<4x512xf32> to vector<4x256xf32>
    %c176_174 = arith.constant 176 : index
    %c0_175 = arith.constant 0 : index
    %378 = vector.load %arg10[%c176_174, %c0_175] : memref<200x256xf32, #tpu.memory_space<vmem>>, vector<4x256xf32>
    tpu.vector_store %arg10[%c176_174, %c0_175], %377 {strides = array<i32>} : memref<200x256xf32, #tpu.memory_space<vmem>>, vector<4x256xf32>,
    %379 = vector.extract_strided_slice %260 {offsets = [0, 194], sizes = [4, 256], strides = [1, 1]} : vector<4x512xf32> to vector<4x256xf32>
    %cst_176 = arith.constant 0.000000e+00 : f32
    %380 = vector.shape_cast %21 : vector<1x256xi1> to vector<1x256xi1>
    %381 = vector.broadcast %380 : vector<1x256xi1> to vector<4x256xi1>
    %382 = vector.broadcast %cst_176 : f32 to vector<4x256xf32>
    %383 = arith.select %381, %379, %382 : vector<4x256xi1>, vector<4x256xf32>
    %c184_177 = arith.constant 184 : index
    %c0_178 = arith.constant 0 : index
    %384 = vector.load %arg10[%c184_177, %c0_178] : memref<200x256xf32, #tpu.memory_space<vmem>>, vector<4x256xf32>
    tpu.vector_store %arg10[%c184_177, %c0_178], %383 {strides = array<i32>} : memref<200x256xf32, #tpu.memory_space<vmem>>, vector<4x256xf32>,
    %385 = vector.extract_strided_slice %260 {offsets = [0, 196], sizes = [4, 256], strides = [1, 1]} : vector<4x512xf32> to vector<4x256xf32>
    %cst_179 = arith.constant 0.000000e+00 : f32
    %386 = vector.shape_cast %30 : vector<1x256xi1> to vector<1x256xi1>
    %387 = vector.broadcast %386 : vector<1x256xi1> to vector<4x256xi1>
    %388 = vector.broadcast %cst_179 : f32 to vector<4x256xf32>
    %389 = arith.select %387, %385, %388 : vector<4x256xi1>, vector<4x256xf32>
    %c192_180 = arith.constant 192 : index
    %c0_181 = arith.constant 0 : index
    %390 = vector.load %arg10[%c192_180, %c0_181] : memref<200x256xf32, #tpu.memory_space<vmem>>, vector<4x256xf32>
    tpu.vector_store %arg10[%c192_180, %c0_181], %389 {strides = array<i32>} : memref<200x256xf32, #tpu.memory_space<vmem>>, vector<4x256xf32>,
    %c0_182 = arith.constant 0 : index
    %c0_183 = arith.constant 0 : index
    %391 = vector.load %arg10[%c0_182, %c0_183] : memref<200x256xf32, #tpu.memory_space<vmem>>, vector<200x256xf32>
    %cst_184 = arith.constant dense<0.000000e+00> : vector<8x256xf32>
    %392 = tpu.matmul %0, %391, %cst_184 {dimension_numbers = #tpu.dot_dimension_numbers<[1], [0], [0], [1], [0, 0, 1, 1], [], []>} : vector<8x200xf32>, vector<200x256xf32>, vector<8x256xf32> -> vector<8x256xf32>
    %393 = vector.broadcast %1 : vector<8x1xf32> to vector<8x256xf32>
    %394 = arith.addf %392, %393 : vector<8x256xf32>
    %cst_185 = arith.constant 0.000000e+00 : f32
    %395 = vector.broadcast %cst_185 : f32 to vector<8x256xf32>
    %396 = arith.cmpf ogt, %394, %395 : vector<8x256xf32>
    %397 = math.exp %394 : vector<8x256xf32>
    %cst_186 = arith.constant 1.000000e+00 : f32
    %398 = vector.broadcast %cst_186 : f32 to vector<8x256xf32>
    %399 = arith.subf %397, %398 : vector<8x256xf32>
    %400 = arith.select %396, %394, %399 : vector<8x256xi1>, vector<8x256xf32>
    %c1_187 = arith.constant 1 : index
    %c0_188 = arith.constant 0 : index
    %c0_189 = arith.constant 0 : index
    %401 = vector.load %arg6[%c1_187, %c0_188, %c0_189] : memref<2x8x256xf32, #tpu.memory_space<vmem>>, vector<1x8x256xf32>
    %402 = vector.shape_cast %401 : vector<1x8x256xf32> to vector<8x256xf32>
    %403 = vector.shape_cast %400 : vector<8x256xf32> to vector<1x8x256xf32>
    tpu.vector_store %arg6[%c1_187, %c0_188, %c0_189], %403 {strides = array<i32>} : memref<2x8x256xf32, #tpu.memory_space<vmem>>, vector<1x8x256xf32>,
    %c0_190 = arith.constant 0 : index
    %c128_191 = arith.constant 128 : index
    %404 = vector.load %arg9[%c0_190, %c128_191] : memref<8x512xf32, #tpu.memory_space<vmem>>, vector<8x256xf32>
    tpu.vector_store %arg9[%c0_190, %c128_191], %400 {strides = array<i32>} : memref<8x512xf32, #tpu.memory_space<vmem>>, vector<8x256xf32>,
    %c0_192 = arith.constant 0 : index
    %c0_193 = arith.constant 0 : index
    %405 = vector.load %arg9[%c0_192, %c0_193] : memref<8x512xf32, #tpu.memory_space<vmem>>, vector<8x512xf32>
    %406 = vector.extract_strided_slice %405 {offsets = [0, 111], sizes = [8, 256], strides = [1, 1]} : vector<8x512xf32> to vector<8x256xf32>
    %cst_194 = arith.constant -1.000000e+30 : f32
    %407 = vector.shape_cast %39 : vector<1x256xi1> to vector<1x256xi1>
    %408 = vector.broadcast %407 : vector<1x256xi1> to vector<8x256xi1>
    %409 = vector.broadcast %cst_194 : f32 to vector<8x256xf32>
    %410 = arith.select %408, %406, %409 : vector<8x256xi1>, vector<8x256xf32>
    %411 = arith.maximumf %400, %410 : vector<8x256xf32>
    %412 = vector.extract_strided_slice %405 {offsets = [0, 112], sizes = [8, 256], strides = [1, 1]} : vector<8x512xf32> to vector<8x256xf32>
    %413 = arith.maximumf %411, %412 : vector<8x256xf32>
    %414 = vector.extract_strided_slice %405 {offsets = [0, 113], sizes = [8, 256], strides = [1, 1]} : vector<8x512xf32> to vector<8x256xf32>
    %cst_195 = arith.constant -1.000000e+30 : f32
    %415 = vector.shape_cast %12 : vector<1x256xi1> to vector<1x256xi1>
    %416 = vector.broadcast %415 : vector<1x256xi1> to vector<8x256xi1>
    %417 = vector.broadcast %cst_195 : f32 to vector<8x256xf32>
    %418 = arith.select %416, %414, %417 : vector<8x256xi1>, vector<8x256xf32>
    %419 = arith.maximumf %413, %418 : vector<8x256xf32>
    %420 = vector.extract_strided_slice %405 {offsets = [0, 127], sizes = [8, 256], strides = [1, 1]} : vector<8x512xf32> to vector<8x256xf32>
    %cst_196 = arith.constant -1.000000e+30 : f32
    %421 = vector.shape_cast %39 : vector<1x256xi1> to vector<1x256xi1>
    %422 = vector.broadcast %421 : vector<1x256xi1> to vector<8x256xi1>
    %423 = vector.broadcast %cst_196 : f32 to vector<8x256xf32>
    %424 = arith.select %422, %420, %423 : vector<8x256xi1>, vector<8x256xf32>
    %425 = arith.maximumf %419, %424 : vector<8x256xf32>
    %426 = vector.extract_strided_slice %405 {offsets = [0, 129], sizes = [8, 256], strides = [1, 1]} : vector<8x512xf32> to vector<8x256xf32>
    %cst_197 = arith.constant -1.000000e+30 : f32
    %427 = vector.shape_cast %12 : vector<1x256xi1> to vector<1x256xi1>
    %428 = vector.broadcast %427 : vector<1x256xi1> to vector<8x256xi1>
    %429 = vector.broadcast %cst_197 : f32 to vector<8x256xf32>
    %430 = arith.select %428, %426, %429 : vector<8x256xi1>, vector<8x256xf32>
    %431 = arith.maximumf %425, %430 : vector<8x256xf32>
    %432 = vector.extract_strided_slice %405 {offsets = [0, 143], sizes = [8, 256], strides = [1, 1]} : vector<8x512xf32> to vector<8x256xf32>
    %cst_198 = arith.constant -1.000000e+30 : f32
    %433 = vector.shape_cast %39 : vector<1x256xi1> to vector<1x256xi1>
    %434 = vector.broadcast %433 : vector<1x256xi1> to vector<8x256xi1>
    %435 = vector.broadcast %cst_198 : f32 to vector<8x256xf32>
    %436 = arith.select %434, %432, %435 : vector<8x256xi1>, vector<8x256xf32>
    %437 = arith.maximumf %431, %436 : vector<8x256xf32>
    %438 = vector.extract_strided_slice %405 {offsets = [0, 144], sizes = [8, 256], strides = [1, 1]} : vector<8x512xf32> to vector<8x256xf32>
    %439 = arith.maximumf %437, %438 : vector<8x256xf32>
    %440 = vector.extract_strided_slice %405 {offsets = [0, 145], sizes = [8, 256], strides = [1, 1]} : vector<8x512xf32> to vector<8x256xf32>
    %cst_199 = arith.constant -1.000000e+30 : f32
    %441 = vector.shape_cast %12 : vector<1x256xi1> to vector<1x256xi1>
    %442 = vector.broadcast %441 : vector<1x256xi1> to vector<8x256xi1>
    %443 = vector.broadcast %cst_199 : f32 to vector<8x256xf32>
    %444 = arith.select %442, %440, %443 : vector<8x256xi1>, vector<8x256xf32>
    %445 = arith.maximumf %439, %444 : vector<8x256xf32>
    %cst_200 = arith.constant dense<0.000000e+00> : vector<8x64xf32>
    %446 = tpu.matmul %445, %3, %cst_200 {dimension_numbers = #tpu.dot_dimension_numbers<[1], [0], [0], [1], [0, 0, 1, 1], [], []>} : vector<8x256xf32>, vector<256x64xf32>, vector<8x64xf32> -> vector<8x64xf32>
    %c1_201 = arith.constant 1 : index
    %c0_202 = arith.constant 0 : index
    %c0_203 = arith.constant 0 : index
    %447 = vector.load %arg7[%c1_201, %c0_202, %c0_203] : memref<2x8x64xf32, #tpu.memory_space<vmem>>, vector<1x8x64xf32>
    %448 = vector.shape_cast %447 : vector<1x8x64xf32> to vector<8x64xf32>
    %449 = vector.shape_cast %446 : vector<8x64xf32> to vector<1x8x64xf32>
    tpu.vector_store %arg7[%c1_201, %c0_202, %c0_203], %449 {strides = array<i32>} : memref<2x8x64xf32, #tpu.memory_space<vmem>>, vector<1x8x64xf32>,
    return
  }
  func.func @transform_0(%arg0: i32) -> (i32, i32, i32) {
    %c0_i32 = arith.constant 0 : i32
    %c0_i32_0 = arith.constant 0 : i32
    %c0_i32_1 = arith.constant 0 : i32
    return %arg0, %c0_i32, %c0_i32_0 : i32, i32, i32
  }
  func.func @transform_1(%arg0: i32) -> (i32, i32) {
    %c0_i32 = arith.constant 0 : i32
    %c0_i32_0 = arith.constant 0 : i32
    %c0_i32_1 = arith.constant 0 : i32
    return %c0_i32, %c0_i32_0 : i32, i32
  }
  func.func @transform_2(%arg0: i32) -> (i32, i32) {
    %c0_i32 = arith.constant 0 : i32
    %c0_i32_0 = arith.constant 0 : i32
    %c0_i32_1 = arith.constant 0 : i32
    return %c0_i32, %c0_i32_0 : i32, i32
  }
  func.func @transform_3(%arg0: i32) -> (i32, i32) {
    %c0_i32 = arith.constant 0 : i32
    %c0_i32_0 = arith.constant 0 : i32
    %c0_i32_1 = arith.constant 0 : i32
    return %c0_i32, %c0_i32_0 : i32, i32
  }
  func.func @transform_4(%arg0: i32) -> (i32, i32) {
    %c0_i32 = arith.constant 0 : i32
    %c0_i32_0 = arith.constant 0 : i32
    %c0_i32_1 = arith.constant 0 : i32
    return %c0_i32, %c0_i32_0 : i32, i32
  }
  func.func @transform_5(%arg0: i32) -> (i32, i32, i32) {
    %c0_i32 = arith.constant 0 : i32
    %c0_i32_0 = arith.constant 0 : i32
    %c0_i32_1 = arith.constant 0 : i32
    return %arg0, %c0_i32, %c0_i32_0 : i32, i32, i32
  }
  func.func @transform_6(%arg0: i32) -> (i32, i32, i32) {
    %c0_i32 = arith.constant 0 : i32
    %c0_i32_0 = arith.constant 0 : i32
    %c0_i32_1 = arith.constant 0 : i32
    return %arg0, %c0_i32, %c0_i32_0 : i32, i32, i32
  }
}

</mosaic_0001>

<bundles_post_ra>
// kernel: l1sx_forward.1
= control target key start
LH: loop header
LB: loop body
LE: loop exit
PB: predicated region body
PF: predicated region fallthrough
CT: control target
= control target key end

     0   :  { %v1720_v0 = vmov 0.0   ;;  %v1721_v2 = vmov 0   ;;  %s1722_s23 = smov 124   ;;  %s1723_s24 = smov 100   ;;  %v143_v15 = vlaneseq  ;;  %vm405_vm9 = vcmask 818176   ;;  %s2731_s0 = inlined_call_operand.vmem [shape: f32[2,4,256], index: 0, kind: input, shape index: {}]   ;;  %s2732_s3 = inlined_call_operand.vmem [shape: s32[1,256], index: 3, kind: input, shape index: {}]   ;;  %s2733_s1 = inlined_call_operand.vmem [shape: f32[8,200], index: 1, kind: input, shape index: {}]   ;;  %s2734_s2 = inlined_call_operand.vmem [shape: f32[8,1], index: 2, kind: input, shape index: {}]   ;;  %s2735_s4 = inlined_call_operand.vmem [shape: f32[256,64], index: 4, kind: input, shape index: {}]   ;;  %s2736_s5 = inlined_call_operand.vmem [shape: f32[2,8,256], index: 5, kind: output, shape index: {0}]   ;;  %s2737_s6 = inlined_call_operand.vmem [shape: f32[2,8,64], index: 6, kind: output, shape index: {1}]  }
   0x1   :  { %82 = vst [vmem:[#allocation2] sm:$0xff] %v1720_v0  ;;  %83 = vst [vmem:[#allocation2 + $0x8] sm:$0xff] %v1720_v0  ;;  %v138_v1 = vld [vmem:[%s2731_s0] sm:$0xff]  ;;  %1623 = vset.pattern.permute.xlu0 %v1721_v2  ;;  %s1724_s25 = smov 126   ;;  %s1725_s26 = smov 2   ;;  %v1516_v7 = vld [vmem:[%s2731_s0 + $0x8] sm:$0xff] }
   0x2   :  { %88 = vst [vmem:[#allocation4 + $0xb0] sm:$0xff] %v1720_v0  ;;  %89 = vst [vmem:[#allocation4 + $0xd0] sm:$0xff] %v1720_v0  ;;  %s1726_s29 = smov 4   ;;  %s1727_s0 = smov 28   ;;  %v25_v13 = vld [vmem:[%s2732_s3] sm:$0x3] }
   0x3   :  { %90 = vst [vmem:[#allocation4 + $0x10] sm:$0xff] %v1720_v0  ;;  %91 = vst [vmem:[#allocation4 + $0x48] sm:$0xff] %v1720_v0  ;;  %s1728_s30 = smov 30   ;;  %s1729_s7 = smov 32   ;;  %v74_v14 = vadd.s32 4294967292, %v25_v13  ;;  %v66_v16 = vadd.s32 4, %v25_v13 }
   0x4   :  { %92 = vst [vmem:[#allocation4 + $0x160] sm:$0xff] %v1720_v0  ;;  %93 = vst [vmem:[#allocation4 + $0x128] sm:$0xff] %v1720_v0  ;;  %s1730_s8 = smov 34   ;;  %s1731_s9 = smov 36   ;;  %v144_v17 = vshrl.u32 %v143_v15, 7  ;;  %v62_v18 = vadd.s32 2, %v25_v13 }
   0x5   :  { %94 = vst [vmem:[#allocation4 + $0x40] sm:$0xff] %v1720_v0  ;;  %95 = vst [vmem:[#allocation4 + $0x178] sm:$0xff] %v1720_v0  ;;  %s1732_s10 = smov 60   ;;  %s1733_s11 = smov 62   ;;  %vm75_vm0 = vcmp.ge.s32.totalorder %v74_v14, 0  ;;  %vm76_vm1 = vcmp.lt.s32.totalorder %v74_v14, 16 }
   0x6   :  { %96 = vst [vmem:[#allocation4 + $0x108] sm:$0xff] %v1720_v0  ;;  %97 = vst [vmem:[#allocation4 + $0x110] sm:$0xff] %v1720_v0  ;;  %s1734_s12 = smov 64   ;;  %s1735_s13 = smov 66   ;;  %vm67_vm3 = vcmp.ge.s32.totalorder %v66_v16, 0  ;;  %vm68_vm4 = vcmp.lt.s32.totalorder %v66_v16, 16 }
   0x7   :  { %98 = vst [vmem:[#allocation4 + $0x90] sm:$0xff] %v1720_v0  ;;  %99 = vst [vmem:[#allocation4 + $0x118] sm:$0xff] %v1720_v0  ;;  %s1736_s14 = smov 68   ;;  %s1737_s17 = smov 92   ;;  %v1935_v19 = vsub.s32 0, %v144_v17  ;;  %vm63_vm6 = vcmp.ge.s32.totalorder %v62_v18, 0 }
   0x8   :  { %100 = vst [vmem:[#allocation4 + $0x148] sm:$0xff] %v1720_v0  ;;  %101 = vst [vmem:[#allocation4 + $0x100] sm:$0xff] %v1720_v0  ;;  %s1738_s18 = smov 94   ;;  %s1739_s19 = smov 96   ;;  %vm64_vm7 = vcmp.lt.s32.totalorder %v62_v18, 16  ;;  %v1943_v22 = vsub.s32 1, %v144_v17 }
   0x9   :  { %102 = vst [vmem:[#allocation4 + $0x58] sm:$0xff] %v1720_v0  ;;  %103 = vst [vmem:[#allocation4 + $0xd8] sm:$0xff] %v1720_v0  ;;  %s1740_s20 = smov 98   ;;  %v78_v26 = vadd.s32 4294967294, %v25_v13  ;;  %v23_v30 = vld [vmem:[%s2733_s1 + $0x8] sm:$0xff]  ;;  %vm2738_vm11 = vcmask 588800  }
   0xa   :  { %104 = vst [vmem:[#allocation4 + $0x180] sm:$0xff] %v1720_v0  ;;  %105 = vst [vmem:[#allocation4 + $0x130] sm:$0xff] %v1720_v0  ;;  %1513 = vmatprep.mubr.msk.f32.mxu0 %vm2738_vm11, %v23_v30  ;;  %vm390_vm12 = vcmask 1014784   ;;  %v24_v40 = vld [vmem:[%s2734_s2] sm:$0xff]  ;;  %v1741_v48 = vmov -1e+30  }
   0xb   :  { %106 = vst [vmem:[#allocation4 + $0x138] sm:$0xff] %v1720_v0  ;;  %107 = vst [vmem:[#allocation4 + $0x120] sm:$0xff] %v1720_v0  ;;  %vm79_vm13 = vcmp.ge.s32.totalorder %v78_v26, 0  ;;  %vm80_vm14 = vcmp.lt.s32.totalorder %v78_v26, 16  ;;  %s1742_s2 = smov 17   ;;  %s1743_s15 = smov 16  }
   0xc   :  { %108 = vst [vmem:[#allocation4 + $0xe0] sm:$0xff] %v1720_v0  ;;  %109 = vst [vmem:[#allocation4 + $0xa8] sm:$0xff] %v1720_v0  ;;  %s1744_s16 = smov 15   ;;  %s1745_s21 = smov 1   ;;  %vm2740_vm11 = vcmask 261120  }
   0xd   :  { %110 = vst [vmem:[#allocation4 + $0xb8] sm:$0xff] %v1720_v0  ;;  %111 = vst [vmem:[#allocation4 + $0x168] sm:$0xff] %v1720_v0 }
   0xe   :  { %112 = vst [vmem:[#allocation4 + $0xe8] sm:$0xff] %v1720_v0  ;;  %113 = vst [vmem:[#allocation4 + $0xf8] sm:$0xff] %v1720_v0 }
   0xf   :  { %114 = vst [vmem:[#allocation4 + $0x20] sm:$0xff] %v1720_v0  ;;  %115 = vst [vmem:[#allocation4 + $0x88] sm:$0xff] %v1720_v0 }
  0x10   :  { %116 = vst [vmem:[#allocation4 + $0xa0] sm:$0xff] %v1720_v0  ;;  %117 = vst [vmem:[#allocation4 + $0x170] sm:$0xff] %v1720_v0 }
  0x11   :  { %118 = vst [vmem:[#allocation4 + $0xf0] sm:$0xff] %v1720_v0  ;;  %119 = vst [vmem:[#allocation4 + $0x140] sm:$0xff] %v1720_v0 }
  0x12   :  { %120 = vst [vmem:[#allocation4 + $0x50] sm:$0xff] %v1720_v0  ;;  %121 = vst [vmem:[#allocation4] sm:$0xff] %v1720_v0 }
  0x13   :  { %122 = vst [vmem:[#allocation4 + $0x8] sm:$0xff] %v1720_v0  ;;  %123 = vst [vmem:[#allocation4 + $0xc0] sm:$0xff] %v1720_v0 }
  0x14   :  { %124 = vst [vmem:[#allocation4 + $0x98] sm:$0xff] %v1720_v0  ;;  %125 = vst [vmem:[#allocation4 + $0x30] sm:$0xff] %v1720_v0 }
  0x15   :  { %126 = vst [vmem:[#allocation4 + $0x188] sm:$0xff] %v1720_v0  ;;  %127 = vst [vmem:[#allocation4 + $0x18] sm:$0xff] %v1720_v0 }
  0x16   :  { %128 = vst [vmem:[#allocation4 + $0x28] sm:$0xff] %v1720_v0  ;;  %129 = vst [vmem:[#allocation4 + $0x158] sm:$0xff] %v1720_v0 }
  0x17   :  { %130 = vst [vmem:[#allocation4 + $0x38] sm:$0xff] %v1720_v0  ;;  %131 = vst [vmem:[#allocation4 + $0x70] sm:$0xff] %v1720_v0 }
  0x18   :  { %132 = vst [vmem:[#allocation4 + $0x68] sm:$0xff] %v1720_v0  ;;  %133 = vst [vmem:[#allocation4 + $0x80] sm:$0xff] %v1720_v0 }
  0x19   :  { %134 = vst [vmem:[#allocation4 + $0xc8] sm:$0xff] %v1720_v0  ;;  %135 = vst [vmem:[#allocation4 + $0x60] sm:$0xff] %v1720_v0 }
  0x1a   :  { %136 = vst [vmem:[#allocation4 + $0x78] sm:$0xff] %v1720_v0  ;;  %137 = vst [vmem:[#allocation4 + $0x150] sm:$0xff] %v1720_v0 }
  0x1b   :  { %139 = vst [vmem:[#allocation2 + $0x4] sm:$0xff] %v138_v1  ;;  %vm77_vm2 = vmand %vm75_vm0, %vm76_vm1 }
  0x1c   :  { %v142_v20 = vsel %vm77_vm2, 1, %v1721_v2  ;;  %vm69_vm5 = vmand %vm67_vm3, %vm68_vm4  ;;  %vm375_vm2 = vcmask 1031168  }
  0x1d   :  { %v146_v21 = vrot.slane %v142_v20, %v1935_v19  ;;  %v236_v25 = vsel %vm69_vm5, 1, %v1721_v2  ;;  %vm65_vm8 = vmand %vm63_vm6, %vm64_vm7  ;;  %v150_v28 = vrot.slane %v142_v20, %v1943_v22  ;;  %vm2745_vm6 = vcmask 15360  }
  0x1e   :  { %v240_v29 = vrot.slane %v236_v25, %v1935_v19  ;;  %v210_v33 = vsel %vm65_vm8, 1, %v1721_v2  ;;  %v244_v36 = vrot.slane %v236_v25, %v1943_v22  ;;  %vm1983_vm1 = vmand %vm79_vm13, %vm80_vm14  ;;  %vm2744_vm13 = vcmask 31744  }
  0x1f   :  { %vm1950_vm10 = vcmp.eq.s32.totalorder %v146_v21, 1  ;;  %vm1969_vm15 = vcmp.eq.s32.totalorder %v150_v28, 1  ;;  %v218_v39 = vrot.slane %v210_v33, %v1943_v22  ;;  %v214_v52 = vrot.slane %v210_v33, %v1935_v19 }
  0x20   :  { %vm1973_vm0 = vcmp.eq.s32.totalorder %v240_v29, 1  ;;  %vm1997_vm3 = vcmp.eq.s32.totalorder %v244_v36, 1  ;;  %v171_v55 = vsel %vm1983_vm1, 1, %v1721_v2  ;;  %vm2743_vm14 = vcmask 228352  }
  0x21   :  { %vm2001_vm4 = vcmp.eq.s32.totalorder %v218_v39, 1  ;;  %vm2019_vm5 = vcmp.eq.s32.totalorder %v214_v52, 1  ;;  %v179_v61 = vrot.slane %v171_v55, %v1943_v22  ;;  %v175_v62 = vrot.slane %v171_v55, %v1935_v19 }
  0x22   :  { %v1789_v3 = vld [vmem:[#allocation2 + $0x8] sm:$0xff]  ;;  %v1791_v4 = vld [vmem:[#allocation2] sm:$0xff]  ;;  %vm2739_vm1 = vcmask 244736  }
  0x23   :  { %386 = vrot.lane.b32.xlu1 %v1789_v3, %s1722_s23  ;;  %401 = vrot.lane.b32.xlu0 %v1789_v3, %s1723_s24  ;;  %367 = vst [vmem:[#allocation4 + $0xf8] sm:$0xf] %v1789_v3  ;;  %v1800_v5 = vcombine.high %v1791_v4, %v1791_v4  ;;  %v1809_v6 = vcombine.high %v1789_v3, %v1789_v3  ;;  %873 = vst [vmem:[#allocation2 + $0x4] sm:$0xff] %v1516_v7  ;;  %vm2032_vm7 = vcmp.eq.s32.totalorder %v179_v61, 1  ;;  %v2777_v7 = vmov 0 }
  0x24   :  { %vm2036_vm8 = vcmp.eq.s32.totalorder %v175_v62, 1 }
  0x25   :  { %366 = vst [vmem:[#allocation4 + $0xe8] sm:$0xf] %v1800_v5  ;;  %v2778_v7 = vsel %vm2036_vm8, 4294967295, %v2777_v7 }
  0x27   :  { %371 = vrot.lane.b32.xlu0 %v1789_v3, %s1724_s25  ;;  %399 = vrot.lane.b32.xlu1 %v1800_v5, %s1723_s24 }
  0x2a   :  { %v1834_v8 = vld [vmem:[#allocation4 + $0xf8] sm:$0xff]  ;;  %v1836_v9 = vld [vmem:[#allocation2] sm:$0xff] }
  0x2b   :  { %403 = vrot.lane.b32.xlu0 %v1809_v6, %s1723_s24  ;;  %384 = vrot.lane.b32.xlu1 %v1800_v5, %s1722_s23  ;;  %v1838_v10 = vld [vmem:[#allocation2 + $0x8] sm:$0xff]  ;;  %v1843_v11 = vcombine.high %v1836_v9, %v1836_v9 }
  0x2c   :  { %1045 = vst [vmem:[#allocation4 + $0xf8] sm:$0xf] %v1838_v10  ;;  %v1845_v12 = vld [vmem:[#allocation4 + $0xe8] sm:$0xff]  ;;  %v1995_v49 = vcombine.high %v1838_v10, %v1838_v10 }
  0x2d   :  { %1044 = vst [vmem:[#allocation4 + $0xe8] sm:$0xf] %v1843_v11 }
  0x2f   :  { %388 = vrot.lane.b32.xlu0 %v1809_v6, %s1722_s23  ;;  %373 = vrot.lane.b32.xlu1 %v1809_v6, %s1724_s25 }
  0x33   :  { %369 = vrot.lane.b32.xlu0 %v1800_v5, %s1724_s25  ;;  %352 = vrot.lane.b32.xlu1 %v1800_v5, %s1725_s26 }
  0x37   :  { %354 = vrot.lane.b32.xlu0 %v1789_v3, %s1725_s26  ;;  %350 = vrot.lane.b32.xlu1 %v1791_v4, %s1725_s26 }
  0x3b   :  { %337 = vrot.lane.b32.xlu0 %v1800_v5, %s1726_s29  ;;  %339 = vrot.lane.b32.xlu1 %v1789_v3, %s1726_s29 }
  0x3f   :  { %335 = vrot.lane.b32.xlu0 %v1791_v4, %s1726_s29  ;;  %322 = vrot.lane.b32.xlu1 %v1800_v5, %s1727_s0 }
  0x43   :  { %324 = vrot.lane.b32.xlu0 %v1789_v3, %s1727_s0  ;;  %320 = vrot.lane.b32.xlu1 %v1791_v4, %s1727_s0 }
  0x47   :  { %307 = vrot.lane.b32.xlu0 %v1800_v5, %s1728_s30  ;;  %309 = vrot.lane.b32.xlu1 %v1789_v3, %s1728_s30 }
  0x4b   :  { %305 = vrot.lane.b32.xlu0 %v1791_v4, %s1728_s30  ;;  %294 = vrot.lane.b32.xlu1 %v1800_v5, %s1729_s7 }
  0x4f   :  { %296 = vrot.lane.b32.xlu0 %v1789_v3, %s1729_s7  ;;  %279 = vrot.lane.b32.xlu1 %v1800_v5, %s1730_s8 }
  0x53   :  { %281 = vrot.lane.b32.xlu0 %v1789_v3, %s1730_s8  ;;  %292 = vrot.lane.b32.xlu1 %v1791_v4, %s1729_s7 }
  0x57   :  { %277 = vrot.lane.b32.xlu0 %v1791_v4, %s1730_s8  ;;  %264 = vrot.lane.b32.xlu1 %v1800_v5, %s1731_s9 }
  0x5b   :  { %266 = vrot.lane.b32.xlu0 %v1789_v3, %s1731_s9  ;;  %262 = vrot.lane.b32.xlu1 %v1791_v4, %s1731_s9 }
  0x5f   :  { %249 = vrot.lane.b32.xlu0 %v1800_v5, %s1732_s10  ;;  %251 = vrot.lane.b32.xlu1 %v1789_v3, %s1732_s10 }
  0x63   :  { %247 = vrot.lane.b32.xlu0 %v1791_v4, %s1732_s10  ;;  %223 = vrot.lane.b32.xlu1 %v1800_v5, %s1733_s11 }
  0x67   :  { %225 = vrot.lane.b32.xlu0 %v1789_v3, %s1733_s11  ;;  %221 = vrot.lane.b32.xlu1 %v1791_v4, %s1733_s11 }
  0x6b   :  { %199 = vrot.lane.b32.xlu0 %v1800_v5, %s1734_s12  ;;  %201 = vrot.lane.b32.xlu1 %v1789_v3, %s1734_s12 }
  0x6f   :  { %184 = vrot.lane.b32.xlu0 %v1800_v5, %s1735_s13  ;;  %186 = vrot.lane.b32.xlu1 %v1789_v3, %s1735_s13 }
  0x73   :  { %197 = vrot.lane.b32.xlu0 %v1791_v4, %s1734_s12  ;;  %182 = vrot.lane.b32.xlu1 %v1791_v4, %s1735_s13 }
  0x77   :  { %158 = vrot.lane.b32.xlu0 %v1800_v5, %s1736_s14  ;;  %160 = vrot.lane.b32.xlu1 %v1789_v3, %s1736_s14 }
  0x7b   :  { %156 = vrot.lane.b32.xlu0 %v1791_v4, %s1736_s14  ;;  %502 = vrot.lane.b32.xlu1 %v1809_v6, %s1732_s10 }
  0x7f   :  { %494 = vrot.lane.b32.xlu0 %v1809_v6, %s1733_s11  ;;  %488 = vrot.lane.b32.xlu1 %v1809_v6, %s1734_s12 }
  0x83   :  { %480 = vrot.lane.b32.xlu0 %v1809_v6, %s1735_s13  ;;  %472 = vrot.lane.b32.xlu1 %v1809_v6, %s1736_s14 }
  0x87   :  { %459 = vrot.lane.b32.xlu0 %v1789_v3, %s1737_s17  ;;  %461 = vrot.lane.b32.xlu1 %v1809_v6, %s1737_s17 }
  0x8b   :  { %457 = vrot.lane.b32.xlu0 %v1800_v5, %s1737_s17  ;;  %444 = vrot.lane.b32.xlu1 %v1789_v3, %s1738_s18 }
  0x8f   :  { %446 = vrot.lane.b32.xlu0 %v1809_v6, %s1738_s18  ;;  %442 = vrot.lane.b32.xlu1 %v1800_v5, %s1738_s18 }
  0x93   :  { %431 = vrot.lane.b32.xlu0 %v1789_v3, %s1739_s19  ;;  %433 = vrot.lane.b32.xlu1 %v1809_v6, %s1739_s19 }
  0x95   :  { %v387_v23 = vpop.permute.xlu1 %386  ;;  %v402_v24 = vpop.permute.xlu0 %401 }
  0x97   :  { %416 = vrot.lane.b32.xlu0 %v1789_v3, %s1740_s20  ;;  %418 = vrot.lane.b32.xlu1 %v1809_v6, %s1740_s20 }
  0x99   :  { %v372_v31 = vpop.permute.xlu0 %371  ;;  %v400_v32 = vpop.permute.xlu1 %399 }
  0x9a   :  { %v406_v34 = vsel %vm405_vm9, %v400_v32, %v402_v24 }
  0x9b   :  { %v410_v35 = vsel %vm1950_vm10, %v406_v34, 0.0  ;;  %429 = vrot.lane.b32.xlu0 %v1800_v5, %s1739_s19  ;;  %414 = vrot.lane.b32.xlu1 %v1800_v5, %s1740_s20 }
  0x9c   :  { %412 = vst [vmem:[#allocation4 + $0xf0] sm:$0xf] %v410_v35 }
  0x9d   :  { %v404_v41 = vpop.permute.xlu0 %403  ;;  %v385_v42 = vpop.permute.xlu1 %384 }
  0x9e   :  { %v407_v43 = vsel %vm405_vm9, %v402_v24, %v404_v41  ;;  %v391_v44 = vsel %vm390_vm12, %v385_v42, %v387_v23 }
  0x9f   :  { %v411_v46 = vsel %vm1969_vm15, %v407_v43, 0.0  ;;  %v395_v47 = vsel %vm1973_vm0, %v391_v44, 0.0  ;;  %562 = vperm.xlu0 %1623, %v24_v40   ;;  %672 = vrot.lane.b32.xlu1 %v1741_v48, %s1742_s2 }
  0xa0   :  { %413 = vst [vmem:[#allocation4 + $0x140] sm:$0xf] %v411_v46  ;;  %397 = vst [vmem:[#allocation4 + $0xa0] sm:$0xf] %v395_v47 }
  0xa1   :  { %v389_v53 = vpop.permute.xlu0 %388  ;;  %v374_v54 = vpop.permute.xlu1 %373 }
  0xa2   :  { %v392_v56 = vsel %vm390_vm12, %v387_v23, %v389_v53  ;;  %v377_v57 = vsel %vm375_vm2, %v372_v31, %v374_v54 }
  0xa3   :  { %v396_v58 = vsel %vm1997_vm3, %v392_v56, 0.0  ;;  %v381_v59 = vsel %vm2001_vm4, %v377_v57, 0.0  ;;  %687 = vrot.lane.b32.xlu1 %v1741_v48, %s1743_s15  ;;  %1079 = vrot.lane.b32.xlu0 %v1995_v49, %s1723_s24  ;;  %v540_v6 = vld [vmem:[#allocation4 + $0xf0] sm:$0xff] }
  0xa4   :  { %398 = vst [vmem:[#allocation4 + $0x170] sm:$0xf] %v396_v58  ;;  %383 = vst [vmem:[#allocation4 + $0x88] sm:$0xf] %v381_v59 }
  0xa5   :  { %v370_v63 = vpop.permute.xlu0 %369  ;;  %v353_v0 = vpop.permute.xlu1 %352 }
  0xa6   :  { %v376_v1 = vsel %vm375_vm2, %v370_v63, %v372_v31 }
  0xa7   :  { %v380_v3 = vsel %vm2019_vm5, %v376_v1, 0.0  ;;  %v541_v4 = vld [vmem:[#allocation4 + $0x140] sm:$0xff]  ;;  %711 = vrot.lane.b32.xlu1 %v1741_v48, %s1744_s16  ;;  %1075 = vrot.lane.b32.xlu0 %v1843_v11, %s1723_s24 }
  0xa8   :  { %382 = vst [vmem:[#allocation4 + $0x20] sm:$0xf] %v380_v3  ;;  %569 = vmatprep.subr.mxu0 %v541_v4  ;;  %v538_v21 = vld [vmem:[#allocation4 + $0xa0] sm:$0xff] }
  0xa9   :  { %v355_v13 = vpop.permute.xlu0 %354  ;;  %570 = vmatpush1.msra.mxu0 %v540_v6  ;;  %v351_v14 = vpop.permute.xlu1 %350 }
  0xaa   :  { %v358_v15 = vsel %vm2745_vm6, %v353_v0, %v355_v13  ;;  %v357_v16 = vsel %vm2745_vm6, %v351_v14, %v353_v0  ;;  %vm2747_vm6 = vcmask 556032  }
  0xab   :  { %v362_v17 = vsel %vm2032_vm7, %v358_v15, 0.0  ;;  %v361_v18 = vsel %vm2036_vm8, %v357_v16, 0.0  ;;  %v539_v20 = vld [vmem:[#allocation4 + $0x170] sm:$0xff]  ;;  %726 = vrot.lane.b32.xlu1 %v1741_v48, %s1745_s21  ;;  %1063 = vrot.lane.b32.xlu0 %v1838_v10, %s1722_s23  ;;  %v537_v25 = vld [vmem:[#allocation4 + $0x88] sm:$0xff] }
  0xac   :  { %364 = vst [vmem:[#allocation4 + $0x168] sm:$0xf] %v362_v17  ;;  %363 = vst [vmem:[#allocation4 + $0xb8] sm:$0xf] %v361_v18  ;;  %571 = vmatprep.subr.mxu0 %v539_v20 }
  0xad   :  { %v338_v23 = vpop.permute.xlu0 %337  ;;  %572 = vmatpush1.msra.mxu0 %v538_v21  ;;  %v340_v24 = vpop.permute.xlu1 %339 }
  0xae   :  { %v343_v26 = vsel %vm2744_vm13, %v338_v23, %v340_v24  ;;  %573 = vmatprep.subr.mxu0 %v537_v25 }
  0xaf   :  { %v347_v28 = vsel %vm1969_vm15, %v343_v26, 0.0  ;;  %v536_v29 = vld [vmem:[#allocation4 + $0x20] sm:$0xff]  ;;  %1077 = vrot.lane.b32.xlu1 %v1838_v10, %s1723_s24  ;;  %1049 = vrot.lane.b32.xlu0 %v1838_v10, %s1724_s25 }
  0xb0   :  { %349 = vst [vmem:[#allocation4 + $0xa8] sm:$0xf] %v347_v28  ;;  %574 = vmatpush1.msra.mxu0 %v536_v29 }
  0xb1   :  { %v336_v30 = vpop.permute.xlu0 %335  ;;  %v323_v31 = vpop.permute.xlu1 %322  ;;  %575 = vmatprep.subr.mxu0 %v1834_v8 }
  0xb2   :  { %v342_v32 = vsel %vm2744_vm13, %v336_v30, %v338_v23  ;;  %576 = vmatpush1.msra.mxu0 %v1845_v12  ;;  %vm2758_vm13 = vcmask 539648  }
  0xb3   :  { %v346_v33 = vsel %vm1950_vm10, %v342_v32, 0.0  ;;  %v533_v34 = vld [vmem:[#allocation4 + $0x168] sm:$0xff]  ;;  %v532_v35 = vld [vmem:[#allocation4 + $0xb8] sm:$0xff]  ;;  %1065 = vrot.lane.b32.xlu1 %v1995_v49, %s1722_s23  ;;  %1033 = vrot.lane.b32.xlu0 %v1838_v10, %s1725_s26 }
  0xb4   :  { %348 = vst [vmem:[#allocation4 + $0xe0] sm:$0xf] %v346_v33  ;;  %577 = vmatprep.subr.mxu0 %v533_v34 }
  0xb5   :  { %v325_v36 = vpop.permute.xlu0 %324  ;;  %v321_v8 = vpop.permute.xlu1 %320  ;;  %578 = vmatpush1.msra.mxu0 %v532_v35 }
  0xb6   :  { %v328_v39 = vsel %vm2743_vm14, %v323_v31, %v325_v36  ;;  %v327_v12 = vsel %vm2743_vm14, %v321_v8, %v323_v31  ;;  %vm2746_vm14 = vcmask 523264  }
  0xb7   :  { %v332_v40 = vsel %vm1997_vm3, %v328_v39, 0.0  ;;  %v331_v41 = vsel %vm1973_vm0, %v327_v12, 0.0  ;;  %v531_v42 = vld [vmem:[#allocation4 + $0xa8] sm:$0xff]  ;;  %1061 = vrot.lane.b32.xlu1 %v1843_v11, %s1722_s23  ;;  %1017 = vrot.lane.b32.xlu0 %v1843_v11, %s1726_s29 }
  0xb8   :  { %334 = vst [vmem:[#allocation4 + $0x120] sm:$0xf] %v332_v40  ;;  %333 = vst [vmem:[#allocation4 + $0x138] sm:$0xf] %v331_v41  ;;  %579 = vmatprep.subr.mxu0 %v531_v42 }
  0xb9   :  { %v308_v43 = vpop.permute.xlu0 %307  ;;  %v310_v44 = vpop.permute.xlu1 %309 }
  0xba   :  { %v313_v45 = vsel %vm2739_vm1, %v308_v43, %v310_v44 }
  0xbb   :  { %v317_v46 = vsel %vm2001_vm4, %v313_v45, 0.0  ;;  %v530_v47 = vld [vmem:[#allocation4 + $0xe0] sm:$0xff]  ;;  %1051 = vrot.lane.b32.xlu1 %v1995_v49, %s1724_s25  ;;  %1015 = vrot.lane.b32.xlu0 %v1836_v9, %s1726_s29 }
  0xbc   :  { %319 = vst [vmem:[#allocation4 + $0x130] sm:$0xf] %v317_v46  ;;  %580 = vmatpush1.msra.mxu0 %v530_v47 }
  0xbd   :  { %v306_v52 = vpop.permute.xlu0 %305  ;;  %v295_v53 = vpop.permute.xlu1 %294 }
  0xbe   :  { %v312_v54 = vsel %vm2739_vm1, %v306_v52, %v308_v43  ;;  %vm2741_vm1 = vcmask 277504  }
  0xbf   :  { %v316_v55 = vsel %vm2019_vm5, %v312_v54, 0.0  ;;  %v529_v56 = vld [vmem:[#allocation4 + $0x120] sm:$0xff]  ;;  %v528_v57 = vld [vmem:[#allocation4 + $0x138] sm:$0xff]  ;;  %1047 = vrot.lane.b32.xlu1 %v1843_v11, %s1724_s25  ;;  %1005 = vrot.lane.b32.xlu0 %v1838_v10, %s1727_s0  ;;  %s1746_s25 = smov 113  }
  0xc0   :  { %318 = vst [vmem:[#allocation4 + $0x180] sm:$0xf] %v316_v55  ;;  %581 = vmatprep.subr.mxu0 %v529_v56 }
  0xc1   :  { %v297_v58 = vpop.permute.xlu0 %296  ;;  %v280_v59 = vpop.permute.xlu1 %279  ;;  %582 = vmatpush1.msra.mxu0 %v528_v57 }
  0xc2   :  { %v300_v61 = vsel %vm2740_vm11, %v295_v53, %v297_v58 }
  0xc3   :  { %304 = vst [vmem:[#allocation4 + $0xd8] sm:$0xf] %v300_v61  ;;  %v527_v62 = vld [vmem:[#allocation4 + $0x130] sm:$0xff]  ;;  %1031 = vrot.lane.b32.xlu1 %v1843_v11, %s1725_s26  ;;  %989 = vrot.lane.b32.xlu0 %v1843_v11, %s1728_s30 }
  0xc4   :  { %583 = vmatprep.subr.mxu0 %v527_v62 }
  0xc5   :  { %v282_v63 = vpop.permute.xlu0 %281  ;;  %v293_v0 = vpop.permute.xlu1 %292 }
  0xc6   :  { %v285_v1 = vsel %vm2741_vm1, %v280_v59, %v282_v63  ;;  %v299_v3 = vsel %vm2740_vm11, %v293_v0, %v295_v53  ;;  %vm2742_vm11 = vcmask 293888  }
  0xc7   :  { %v289_v4 = vsel %vm2032_vm7, %v285_v1, 0.0  ;;  %303 = vst [vmem:[#allocation4 + $0x58] sm:$0xf] %v299_v3  ;;  %v526_v6 = vld [vmem:[#allocation4 + $0x180] sm:$0xff]  ;;  %1029 = vrot.lane.b32.xlu1 %v1836_v9, %s1725_s26  ;;  %987 = vrot.lane.b32.xlu0 %v1836_v9, %s1728_s30  ;;  %s1747_s26 = smov 127  }
  0xc8   :  { %291 = vst [vmem:[#allocation4 + $0x100] sm:$0xf] %v289_v4  ;;  %584 = vmatpush1.msra.mxu0 %v526_v6 }
  0xc9   :  { %v278_v13 = vpop.permute.xlu0 %277  ;;  %v265_v14 = vpop.permute.xlu1 %264 }
  0xca   :  { %v284_v15 = vsel %vm2741_vm1, %v278_v13, %v280_v59  ;;  %v525_v16 = vld [vmem:[#allocation4 + $0xd8] sm:$0xff]  ;;  %vm2754_vm1 = vcmask 490496  }
  0xcb   :  { %v288_v17 = vsel %vm2036_vm8, %v284_v15, 0.0  ;;  %585 = vmatprep.subr.mxu0 %v525_v16  ;;  %1019 = vrot.lane.b32.xlu1 %v1838_v10, %s1726_s29 }
  0xcc   :  { %290 = vst [vmem:[#allocation4 + $0x148] sm:$0xf] %v288_v17  ;;  %979 = vrot.lane.b32.xlu0 %v1838_v10, %s1729_s7 }
  0xcd   :  { %v267_v18 = vpop.permute.xlu0 %266  ;;  %v263_v20 = vpop.permute.xlu1 %262 }
  0xce   :  { %v270_v21 = vsel %vm2742_vm11, %v265_v14, %v267_v18  ;;  %v269_v23 = vsel %vm2742_vm11, %v263_v20, %v265_v14  ;;  %v524_v24 = vld [vmem:[#allocation4 + $0x58] sm:$0xff]  ;;  %vm2752_vm11 = vcmask 506880  }
  0xcf   :  { %v274_v25 = vsel %vm1969_vm15, %v270_v21, 0.0  ;;  %v273_v26 = vsel %vm1950_vm10, %v269_v23, 0.0  ;;  %586 = vmatpush1.msra.mxu0 %v524_v24  ;;  %v523_v28 = vld [vmem:[#allocation4 + $0x100] sm:$0xff]  ;;  %1003 = vrot.lane.b32.xlu1 %v1843_v11, %s1727_s0 }
  0xd0   :  { %276 = vst [vmem:[#allocation4 + $0x118] sm:$0xf] %v274_v25  ;;  %275 = vst [vmem:[#allocation4 + $0x90] sm:$0xf] %v273_v26  ;;  %587 = vmatprep.subr.mxu0 %v523_v28  ;;  %965 = vrot.lane.b32.xlu0 %v1838_v10, %s1730_s8 }
  0xd1   :  { %v250_v29 = vpop.permute.xlu0 %249  ;;  %v2120_v30 = vpop.permute.xlu1 %251 }
  0xd2   :  { %v255_v31 = vsel %vm2754_vm1, %v250_v29, %v2120_v30 }
  0xd3   :  { %v259_v32 = vsel %vm1997_vm3, %v255_v31, 0.0  ;;  %v506_v33 = vsel %vm1973_vm0, %v255_v31, 0.0  ;;  %v522_v34 = vld [vmem:[#allocation4 + $0x148] sm:$0xff]  ;;  %1001 = vrot.lane.b32.xlu1 %v1836_v9, %s1727_s0 }
  0xd4   :  { %261 = vst [vmem:[#allocation4 + $0x110] sm:$0xf] %v259_v32  ;;  %508 = vst [vmem:[#allocation4 + $0x78] sm:$0xf] %v506_v33  ;;  %588 = vmatpush1.msra.mxu0 %v522_v34  ;;  %961 = vrot.lane.b32.xlu0 %v1836_v9, %s1730_s8 }
  0xd5   :  { %v248_v35 = vpop.permute.xlu0 %247  ;;  %v224_v36 = vpop.permute.xlu1 %223 }
  0xd6   :  { %v254_v8 = vsel %vm2754_vm1, %v248_v35, %v250_v29 }
  0xd7   :  { %v258_v39 = vsel %vm1973_vm0, %v254_v8, 0.0  ;;  %v521_v12 = vld [vmem:[#allocation4 + $0x118] sm:$0xff]  ;;  %v520_v40 = vld [vmem:[#allocation4 + $0x90] sm:$0xff]  ;;  %991 = vrot.lane.b32.xlu1 %v1838_v10, %s1728_s30  ;;  %s1748_s30 = smov 112  }
  0xd8   :  { %260 = vst [vmem:[#allocation4 + $0x108] sm:$0xf] %v258_v39  ;;  %589 = vmatprep.subr.mxu0 %v521_v12  ;;  %951 = vrot.lane.b32.xlu0 %v1838_v10, %s1731_s9 }
  0xd9   :  { %v2139_v41 = vpop.permute.xlu0 %225  ;;  %v222_v42 = vpop.permute.xlu1 %221  ;;  %590 = vmatpush1.msra.mxu0 %v520_v40 }
  0xda   :  { %v229_v43 = vsel %vm2752_vm11, %v224_v36, %v2139_v41  ;;  %v228_v44 = vsel %vm2752_vm11, %v222_v42, %v224_v36 }
  0xdb   :  { %v233_v45 = vsel %vm2001_vm4, %v229_v43, 0.0  ;;  %v498_v46 = vsel %vm2019_vm5, %v229_v43, 0.0  ;;  %v232_v47 = vsel %vm2019_vm5, %v228_v44, 0.0  ;;  %v519_v52 = vld [vmem:[#allocation4 + $0x110] sm:$0xff]  ;;  %977 = vrot.lane.b32.xlu1 %v1843_v11, %s1729_s7 }
  0xdc   :  { %235 = vst [vmem:[#allocation4 + $0x178] sm:$0xf] %v233_v45  ;;  %500 = vst [vmem:[#allocation4 + $0xc8] sm:$0xf] %v498_v46  ;;  %591 = vmatprep.subr.mxu0 %v519_v52  ;;  %935 = vrot.lane.b32.xlu0 %v1843_v11, %s1732_s10  ;;  %v558_v52 = vld [vmem:[#allocation4 + $0x78] sm:$0xff] }
  0xdd   :  { %234 = vst [vmem:[#allocation4 + $0x40] sm:$0xf] %v232_v47  ;;  %v200_v53 = vpop.permute.xlu0 %199  ;;  %v202_v54 = vpop.permute.xlu1 %201 }
  0xde   :  { %v205_v55 = vsel %vm2746_vm14, %v200_v53, %v202_v54 }
  0xdf   :  { %209 = vst [vmem:[#allocation4 + $0x128] sm:$0xf] %v205_v55  ;;  %492 = vst [vmem:[#allocation4 + $0x68] sm:$0xf] %v205_v55  ;;  %v518_v56 = vld [vmem:[#allocation4 + $0x108] sm:$0xff]  ;;  %963 = vrot.lane.b32.xlu1 %v1843_v11, %s1730_s8 }
  0xe0   :  { %592 = vmatpush1.msra.mxu0 %v518_v56  ;;  %933 = vrot.lane.b32.xlu0 %v1836_v9, %s1732_s10 }
  0xe1   :  { %v185_v57 = vpop.permute.xlu0 %184  ;;  %v187_v58 = vpop.permute.xlu1 %186 }
  0xe2   :  { %v190_v59 = vsel %vm2758_vm13, %v185_v57, %v187_v58 }
  0xe3   :  { %v194_v61 = vsel %vm2032_vm7, %v190_v59, 0.0  ;;  %v484_v62 = vsel %vm2036_vm8, %v190_v59, 0.0  ;;  %v517_v63 = vld [vmem:[#allocation4 + $0x178] sm:$0xff]  ;;  %975 = vrot.lane.b32.xlu1 %v1836_v9, %s1729_s7  ;;  %v556_v56 = vld [vmem:[#allocation4 + $0xc8] sm:$0xff]  ;;  %s1749_s7 = smov 111  }
  0xe4   :  { %v516_v0 = vld [vmem:[#allocation4 + $0x40] sm:$0xff]  ;;  %196 = vst [vmem:[#allocation4 + $0x48] sm:$0xf] %v194_v61  ;;  %486 = vst [vmem:[#allocation4 + $0x38] sm:$0xf] %v484_v62  ;;  %593 = vmatprep.subr.mxu0 %v517_v63  ;;  %923 = vrot.lane.b32.xlu0 %v1838_v10, %s1733_s11 }
  0xe5   :  { %v198_v1 = vpop.permute.xlu0 %197  ;;  %v183_v3 = vpop.permute.xlu1 %182  ;;  %594 = vmatpush1.msra.mxu0 %v516_v0 }
  0xe6   :  { %v204_v4 = vsel %vm2746_vm14, %v198_v1, %v200_v53  ;;  %v189_v6 = vsel %vm2758_vm13, %v183_v3, %v185_v57  ;;  %v515_v13 = vld [vmem:[#allocation4 + $0x128] sm:$0xff] }
  0xe7   :  { %208 = vst [vmem:[#allocation4 + $0x160] sm:$0xf] %v204_v4  ;;  %v193_v14 = vsel %vm2036_vm8, %v189_v6, 0.0  ;;  %595 = vmatprep.subr.mxu0 %v515_v13  ;;  %949 = vrot.lane.b32.xlu1 %v1843_v11, %s1731_s9  ;;  %v554_v61 = vld [vmem:[#allocation4 + $0x68] sm:$0xff] }
  0xe8   :  { %195 = vst [vmem:[#allocation4 + $0x10] sm:$0xf] %v193_v14  ;;  %909 = vrot.lane.b32.xlu0 %v1843_v11, %s1734_s12 }
  0xe9   :  { %v159_v15 = vpop.permute.xlu0 %158  ;;  %v161_v16 = vpop.permute.xlu1 %160 }
  0xea   :  { %v164_v17 = vsel %vm2747_vm6, %v159_v15, %v161_v16 }
  0xeb   :  { %v168_v18 = vsel %vm1969_vm15, %v164_v17, 0.0  ;;  %v476_v20 = vsel %vm1950_vm10, %v164_v17, 0.0  ;;  %947 = vrot.lane.b32.xlu1 %v1836_v9, %s1731_s9  ;;  %v513_v31 = vld [vmem:[#allocation4 + $0x48] sm:$0xff]  ;;  %v552_v0 = vld [vmem:[#allocation4 + $0x38] sm:$0xff] }
  0xec   :  { %170 = vst [vmem:[#allocation4 + $0xd0] sm:$0xf] %v168_v18  ;;  %478 = vst [vmem:[#allocation4 + $0x28] sm:$0xf] %v476_v20 }
  0xed   :  { %v157_v21 = vpop.permute.xlu0 %156  ;;  %v503_v23 = vpop.permute.xlu1 %502 }
  0xee   :  { %v163_v24 = vsel %vm2747_vm6, %v157_v21, %v159_v15  ;;  %v504_v25 = vsel %vm2754_vm1, %v2120_v30, %v503_v23  ;;  %v514_v26 = vld [vmem:[#allocation4 + $0x160] sm:$0xff] }
  0xef   :  { %v167_v28 = vsel %vm1950_vm10, %v163_v24, 0.0  ;;  %v507_v29 = vsel %vm1997_vm3, %v504_v25, 0.0  ;;  %596 = vmatpush1.msra.mxu0 %v514_v26  ;;  %v512_v32 = vld [vmem:[#allocation4 + $0x10] sm:$0xff]  ;;  %937 = vrot.lane.b32.xlu1 %v1838_v10, %s1732_s10 }
  0xf0   :  { %169 = vst [vmem:[#allocation4 + $0xb0] sm:$0xf] %v167_v28  ;;  %509 = vst [vmem:[#allocation4 + $0x150] sm:$0xf] %v507_v29  ;;  %597 = vmatprep.subr.mxu0 %v513_v31 }
  0xf1   :  { %v495_v33 = vpop.permute.xlu0 %494  ;;  %v489_v34 = vpop.permute.xlu1 %488  ;;  %598 = vmatpush1.msra.mxu0 %v512_v32 }
  0xf2   :  { %v496_v30 = vsel %vm2752_vm11, %v2139_v41, %v495_v33  ;;  %v490_v35 = vsel %vm2746_vm14, %v202_v54, %v489_v34  ;;  %vm2748_vm14 = vcmask 752640  }
  0xf3   :  { %v499_v36 = vsel %vm2001_vm4, %v496_v30, 0.0  ;;  %493 = vst [vmem:[#allocation4 + $0x80] sm:$0xf] %v490_v35  ;;  %v511_v8 = vld [vmem:[#allocation4 + $0xd0] sm:$0xff]  ;;  %921 = vrot.lane.b32.xlu1 %v1843_v11, %s1733_s11  ;;  %v550_v14 = vld [vmem:[#allocation4 + $0x28] sm:$0xff] }
  0xf4   :  { %501 = vst [vmem:[#allocation4 + $0x60] sm:$0xf] %v499_v36  ;;  %599 = vmatprep.subr.mxu0 %v511_v8 }
  0xf5   :  { %v481_v39 = vpop.permute.xlu0 %480  ;;  %v473_v12 = vpop.permute.xlu1 %472 }
  0xf6   :  { %v482_v40 = vsel %vm2758_vm13, %v187_v58, %v481_v39  ;;  %v474_v42 = vsel %vm2747_vm6, %v161_v16, %v473_v12  ;;  %vm2749_vm6 = vcmask 769024  }
  0xf7   :  { %v485_v41 = vsel %vm2032_vm7, %v482_v40, 0.0  ;;  %v477_v43 = vsel %vm1969_vm15, %v474_v42, 0.0  ;;  %v510_v44 = vld [vmem:[#allocation4 + $0xb0] sm:$0xff]  ;;  %919 = vrot.lane.b32.xlu1 %v1836_v9, %s1733_s11 }
  0xf8   :  { %v559_v45 = vld [vmem:[#allocation4 + $0x150] sm:$0xff]  ;;  %487 = vst [vmem:[#allocation4 + $0x70] sm:$0xf] %v485_v41  ;;  %479 = vst [vmem:[#allocation4 + $0x158] sm:$0xf] %v477_v43  ;;  %600 = vmatpush1.msra.mxu0 %v510_v44  ;;  %v57_v43 = vld [vmem:[%s2735_s4 + $0xf8] sm:$0xff] }
  0xf9   :  { %v460_v46 = vpop.permute.xlu0 %459  ;;  %v462_v47 = vpop.permute.xlu1 %461  ;;  %615 = vmatprep.subr.mxu0 %v559_v45  ;;  %v22_v40 = vld [vmem:[%s2733_s1] sm:$0xff]  ;;  %v41_v44 = vld [vmem:[%s2735_s4 + $0x78] sm:$0xff]  ;;  %v56_v45 = vld [vmem:[%s2735_s4 + $0xf0] sm:$0xff]  ;;  %1523 = vmatprep.subr.mxu1 %v57_v43 }
  0xfa   :  { %v465_v53 = vsel %vm2748_vm14, %v460_v46, %v462_v47  ;;  %616 = vmatpush2.msra.mxu0 %v558_v52  ;;  %v555_v9 = vld [vmem:[#allocation4 + $0x80] sm:$0xff]  ;;  %1524 = vmatpush3.msra.mxu1 %v41_v44  ;;  %v55_v47 = vld [vmem:[%s2735_s4 + $0xe8] sm:$0xff] }
  0xfb   :  { %v469_v54 = vsel %vm1997_vm3, %v465_v53, 0.0  ;;  %v557_v55 = vld [vmem:[#allocation4 + $0x60] sm:$0xff]  ;;  %1525 = vmatprep.subr.mxu1 %v56_v45  ;;  %v39_v52 = vld [vmem:[%s2735_s4 + $0x68] sm:$0xff] }
  0xfc   :  { %471 = vst [vmem:[#allocation4 + $0x18] sm:$0xf] %v469_v54  ;;  %617 = vmatprep.subr.mxu0 %v557_v55  ;;  %v54_v54 = vld [vmem:[%s2735_s4 + $0xe0] sm:$0xff] }
  0xfd   :  { %v458_v57 = vpop.permute.xlu0 %457  ;;  %v445_v58 = vpop.permute.xlu1 %444  ;;  %618 = vmatpush2.msra.mxu0 %v556_v56  ;;  %v38_v55 = vld [vmem:[%s2735_s4 + $0x60] sm:$0xff]  ;;  %v53_v56 = vld [vmem:[%s2735_s4 + $0xd8] sm:$0xff] }
  0xfe   :  { %v464_v59 = vsel %vm2748_vm14, %v458_v57, %v460_v46  ;;  %619 = vmatprep.subr.mxu0 %v555_v9  ;;  %vm2751_vm14 = vcmask 785408   ;;  %v40_v46 = vld [vmem:[%s2735_s4 + $0x70] sm:$0xff]  ;;  %v37_v57 = vld [vmem:[%s2735_s4 + $0x58] sm:$0xff] }
  0xff   :  { %v468_v62 = vsel %vm1973_vm0, %v464_v59, 0.0  ;;  %620 = vmatpush2.msra.mxu0 %v554_v61  ;;  %v553_v63 = vld [vmem:[#allocation4 + $0x70] sm:$0xff]  ;;  %v551_v4 = vld [vmem:[#allocation4 + $0x158] sm:$0xff]  ;;  %1526 = vmatpush3.msra.mxu1 %v40_v46  ;;  %v52_v9 = vld [vmem:[%s2735_s4 + $0xd0] sm:$0xff] }
 0x100   :  { %470 = vst [vmem:[#allocation4 + $0x188] sm:$0xf] %v468_v62  ;;  %621 = vmatprep.subr.mxu0 %v553_v63  ;;  %1527 = vmatprep.subr.mxu1 %v55_v47  ;;  %v36_v59 = vld [vmem:[%s2735_s4 + $0x50] sm:$0xff]  ;;  %v51_v62 = vld [vmem:[%s2735_s4 + $0xc8] sm:$0xff] }
 0x101   :  { %v447_v1 = vpop.permute.xlu0 %446  ;;  %v443_v3 = vpop.permute.xlu1 %442  ;;  %622 = vmatpush2.msra.mxu0 %v552_v0  ;;  %1528 = vmatpush3.msra.mxu1 %v39_v52  ;;  %v35_v63 = vld [vmem:[%s2735_s4 + $0x48] sm:$0xff] }
 0x102   :  { %v450_v6 = vsel %vm2749_vm6, %v445_v58, %v447_v1  ;;  %v449_v13 = vsel %vm2749_vm6, %v443_v3, %v445_v58  ;;  %623 = vmatprep.subr.mxu0 %v551_v4  ;;  %vm2750_vm6 = vcmask 801792   ;;  %1529 = vmatprep.subr.mxu1 %v54_v54  ;;  %v50_v1 = vld [vmem:[%s2735_s4 + $0xc0] sm:$0xff]  ;;  %v49_v4 = vld [vmem:[%s2735_s4 + $0xb8] sm:$0xff] }
 0x103   :  { %v454_v15 = vsel %vm2001_vm4, %v450_v6, 0.0  ;;  %v453_v16 = vsel %vm2019_vm5, %v449_v13, 0.0  ;;  %624 = vmatpush2.msra.mxu0 %v550_v14  ;;  %v549_v17 = vld [vmem:[#allocation4 + $0x18] sm:$0xff]  ;;  %1530 = vmatpush3.msra.mxu1 %v38_v55  ;;  %v34_v3 = vld [vmem:[%s2735_s4 + $0x40] sm:$0xff]  ;;  %v33_v6 = vld [vmem:[%s2735_s4 + $0x38] sm:$0xff] }
 0x104   :  { %456 = vst [vmem:[#allocation4 + $0x30] sm:$0xf] %v454_v15  ;;  %455 = vst [vmem:[#allocation4 + $0x98] sm:$0xf] %v453_v16  ;;  %625 = vmatprep.subr.mxu0 %v549_v17  ;;  %1531 = vmatprep.subr.mxu1 %v53_v56  ;;  %v48_v16 = vld [vmem:[%s2735_s4 + $0xb0] sm:$0xff] }
 0x105   :  { %v432_v18 = vpop.permute.xlu0 %431  ;;  %v434_v20 = vpop.permute.xlu1 %433  ;;  %1532 = vmatpush3.msra.mxu1 %v37_v57 }
 0x106   :  { %v437_v21 = vsel %vm2751_vm14, %v432_v18, %v434_v20  ;;  %1533 = vmatprep.subr.mxu1 %v52_v9  ;;  %v47_v20 = vld [vmem:[%s2735_s4 + $0xa8] sm:$0xff] }
 0x107   :  { %441 = vst [vmem:[#allocation4 + $0xc0] sm:$0xf] %v437_v21  ;;  %v548_v23 = vld [vmem:[#allocation4 + $0x188] sm:$0xff]  ;;  %1534 = vmatpush3.msra.mxu1 %v36_v59  ;;  %v31_v21 = vld [vmem:[%s2735_s4 + $0x28] sm:$0xff] }
 0x108   :  { %626 = vmatpush2.msra.mxu0 %v548_v23  ;;  %1535 = vmatprep.subr.mxu1 %v51_v62 }
 0x109   :  { %v417_v24 = vpop.permute.xlu0 %416  ;;  %v419_v25 = vpop.permute.xlu1 %418  ;;  %1536 = vmatpush3.msra.mxu1 %v35_v63 }
 0x10a   :  { %v422_v26 = vsel %vm2750_vm6, %v417_v24, %v419_v25  ;;  %1537 = vmatprep.subr.mxu1 %v50_v1 }
 0x10b   :  { %v426_v28 = vsel %vm2032_vm7, %v422_v26, 0.0  ;;  %v547_v29 = vld [vmem:[#allocation4 + $0x30] sm:$0xff]  ;;  %v546_v31 = vld [vmem:[#allocation4 + $0x98] sm:$0xff]  ;;  %1538 = vmatpush3.msra.mxu1 %v34_v3 }
 0x10c   :  { %428 = vst [vmem:[#allocation4] sm:$0xf] %v426_v28  ;;  %627 = vmatprep.subr.mxu0 %v547_v29  ;;  %1539 = vmatprep.subr.mxu1 %v49_v4  ;;  %v46_v26 = vld [vmem:[%s2735_s4 + $0xa0] sm:$0xff] }
 0x10d   :  { %v430_v32 = vpop.permute.xlu0 %429  ;;  %v415_v33 = vpop.permute.xlu1 %414  ;;  %628 = vmatpush2.msra.mxu0 %v546_v31  ;;  %1540 = vmatpush3.msra.mxu1 %v33_v6  ;;  %v30_v29 = vld [vmem:[%s2735_s4 + $0x20] sm:$0xff]  ;;  %v45_v31 = vld [vmem:[%s2735_s4 + $0x98] sm:$0xff] }
 0x10e   :  { %v436_v34 = vsel %vm2751_vm14, %v430_v32, %v432_v18  ;;  %v421_v30 = vsel %vm2750_vm6, %v415_v33, %v417_v24  ;;  %v545_v35 = vld [vmem:[#allocation4 + $0xc0] sm:$0xff]  ;;  %1541 = vmatprep.subr.mxu1 %v48_v16  ;;  %v29_v32 = vld [vmem:[%s2735_s4 + $0x18] sm:$0xff] }
 0x10f   :  { %440 = vst [vmem:[#allocation4 + $0x8] sm:$0xf] %v436_v34  ;;  %v425_v36 = vsel %vm2036_vm8, %v421_v30, 0.0  ;;  %629 = vmatprep.subr.mxu0 %v545_v35  ;;  %v32_v18 = vld [vmem:[%s2735_s4 + $0x30] sm:$0xff] }
 0x110   :  { %427 = vst [vmem:[#allocation4 + $0x50] sm:$0xf] %v425_v36  ;;  %1542 = vmatpush3.msra.mxu1 %v32_v18  ;;  %v44_v36 = vld [vmem:[%s2735_s4 + $0x90] sm:$0xff] }
 0x111   :  { %v2230_v42 = vpop.permute.xlu1 %672  ;;  %1543 = vmatprep.subr.mxu1 %v47_v20 }
 0x112   :  { %1544 = vmatpush3.msra.mxu1 %v31_v21 }
 0x113   :  { %v543_v39 = vld [vmem:[#allocation4] sm:$0xff]  ;;  %1545 = vmatprep.subr.mxu1 %v46_v26 }
 0x114   :  { %1546 = vmatpush3.msra.mxu1 %v30_v29 }
 0x115   :  { %v2232_v41 = vpop.permute.xlu1 %687  ;;  %1547 = vmatprep.subr.mxu1 %v45_v31 }
 0x116   :  { %v544_v8 = vld [vmem:[#allocation4 + $0x8] sm:$0xff]  ;;  %1548 = vmatpush3.msra.mxu1 %v29_v32 }
 0x117   :  { %630 = vmatpush2.msra.mxu0 %v544_v8  ;;  %v542_v12 = vld [vmem:[#allocation4 + $0x50] sm:$0xff]  ;;  %1549 = vmatprep.subr.mxu1 %v44_v36 }
 0x118   :  { %631 = vmatprep.subr.mxu0 %v543_v39 }
 0x119   :  { %632 = vmatpush2.msra.mxu0 %v542_v12  ;;  %v2252_v53 = vpop.permute.xlu1 %711  ;;  %v28_v12 = vld [vmem:[%s2735_s4 + $0x10] sm:$0xff] }
 0x11a   :  { %634 = vmatmul.mubr.f32.vlgmr.msra.gmra.mxu0 %v22_v40  ;;  %1558 = vmatprep.subr.mxu0 %v57_v43  ;;  %v2274_v61 = vpop.permute.xlu0 %562  ;;  %v43_v40 = vld [vmem:[%s2735_s4 + $0x88] sm:$0xff] }
 0x11b   :  { %1559 = vmatpush3.msra.mxu0 %v41_v44  ;;  %v27_v43 = vld [vmem:[%s2735_s4 + $0x8] sm:$0xff]  ;;  %1550 = vmatpush3.msra.mxu1 %v28_v12 }
 0x11c   :  { %1560 = vmatprep.subr.mxu0 %v56_v45  ;;  %1551 = vmatprep.subr.mxu1 %v43_v40 }
 0x11d   :  { %1561 = vmatpush3.msra.mxu0 %v40_v46  ;;  %v2266_v58 = vpop.permute.xlu1 %726  ;;  %1552 = vmatpush3.msra.mxu1 %v27_v43 }
 0x11e   :  { %1562 = vmatprep.subr.mxu0 %v55_v47  ;;  %v1080_v13 = vpop.permute.xlu0 %1079 }
 0x11f   :  { %1563 = vmatpush3.msra.mxu0 %v39_v52  ;;  %v42_v52 = vld [vmem:[%s2735_s4 + $0x80] sm:$0xff] }
 0x120   :  { %1564 = vmatprep.subr.mxu0 %v54_v54  ;;  %1553 = vmatprep.subr.mxu1 %v42_v52 }
 0x121   :  { %1565 = vmatpush3.msra.mxu0 %v38_v55  ;;  %v1078_v0 = vpop.permute.xlu1 %1077 }
 0x122   :  { %1566 = vmatprep.subr.mxu0 %v53_v56  ;;  %v1082_v15 = vsel %vm405_vm9, %v1078_v0, %v1080_v13  ;;  %v1076_v23 = vpop.permute.xlu0 %1075  ;;  %v26_v56 = vld [vmem:[%s2735_s4] sm:$0xff] }
 0x123   :  { %1567 = vmatpush3.msra.mxu0 %v37_v57  ;;  %v1086_v17 = vsel %vm1969_vm15, %v1082_v15, 0.0  ;;  %v1081_v25 = vsel %vm405_vm9, %v1076_v23, %v1078_v0  ;;  %1554 = vmatpush3.msra.mxu1 %v26_v56  ;;  %vm2779_vm9 = vcmask 15360  }
 0x124   :  { %1568 = vmatprep.subr.mxu0 %v52_v9  ;;  %1088 = vst [vmem:[#allocation4 + $0x140] sm:$0xf] %v1086_v17  ;;  %v1085_v28 = vsel %vm1950_vm10, %v1081_v25, 0.0 }
 0x125   :  { %1569 = vmatpush3.msra.mxu0 %v36_v59  ;;  %v1066_v14 = vpop.permute.xlu1 %1065  ;;  %1087 = vst [vmem:[#allocation4 + $0xf0] sm:$0xf] %v1085_v28 }
 0x126   :  { %1570 = vmatprep.subr.mxu0 %v51_v62  ;;  %v1064_v33 = vpop.permute.xlu0 %1063 }
 0x127   :  { %1571 = vmatpush3.msra.mxu0 %v35_v63  ;;  %v1068_v35 = vsel %vm390_vm12, %v1064_v33, %v1066_v14 }
 0x128   :  { %1572 = vmatprep.subr.mxu0 %v50_v1  ;;  %v1072_v39 = vsel %vm1997_vm3, %v1068_v35, 0.0 }
 0x129   :  { %1573 = vmatpush3.msra.mxu0 %v34_v3  ;;  %v1062_v24 = vpop.permute.xlu1 %1061  ;;  %1074 = vst [vmem:[#allocation4 + $0x170] sm:$0xf] %v1072_v39 }
 0x12a   :  { %1574 = vmatprep.subr.mxu0 %v49_v4  ;;  %v1067_v30 = vsel %vm390_vm12, %v1062_v24, %v1064_v33  ;;  %v1050_v44 = vpop.permute.xlu0 %1049  ;;  %vm2780_vm12 = vmmov %vm2779_vm9 }
 0x12b   :  { %1575 = vmatpush3.msra.mxu0 %v33_v6  ;;  %v1071_v8 = vsel %vm1973_vm0, %v1067_v30, 0.0  ;;  %v1212_v57 = vld [vmem:[#allocation4 + $0x140] sm:$0xff] }
 0x12c   :  { %1576 = vmatprep.subr.mxu0 %v48_v16  ;;  %1073 = vst [vmem:[#allocation4 + $0xa0] sm:$0xf] %v1071_v8  ;;  %1231 = vmatprep.subr.mxu1 %v1212_v57 }
 0x12d   :  { %1577 = vmatpush3.msra.mxu0 %v32_v18  ;;  %v1052_v34 = vpop.permute.xlu1 %1051 }
 0x12e   :  { %1578 = vmatprep.subr.mxu0 %v47_v20  ;;  %v1054_v46 = vsel %vm375_vm2, %v1050_v44, %v1052_v34  ;;  %v1034_v9 = vpop.permute.xlu0 %1033 }
 0x12f   :  { %1579 = vmatpush3.msra.mxu0 %v31_v21  ;;  %v1058_v54 = vsel %vm2001_vm4, %v1054_v46, 0.0 }
 0x130   :  { %1580 = vmatprep.subr.mxu0 %v46_v26  ;;  %1060 = vst [vmem:[#allocation4 + $0x88] sm:$0xf] %v1058_v54 }
 0x131   :  { %1581 = vmatpush3.msra.mxu0 %v30_v29  ;;  %v1048_v45 = vpop.permute.xlu1 %1047 }
 0x132   :  { %1582 = vmatprep.subr.mxu0 %v45_v31  ;;  %v1053_v47 = vsel %vm375_vm2, %v1048_v45, %v1050_v44  ;;  %v1018_v0 = vpop.permute.xlu0 %1017  ;;  %vm2781_vm2 = vcmask 31744  }
 0x133   :  { %1583 = vmatpush3.msra.mxu0 %v29_v32  ;;  %v1057_v55 = vsel %vm2019_vm5, %v1053_v47, 0.0  ;;  %vm2782_vm6 = vmmov %vm2781_vm2  ;;  %v1209_v37 = vld [vmem:[#allocation4 + $0xa0] sm:$0xff] }
 0x134   :  { %1584 = vmatprep.subr.mxu0 %v44_v36  ;;  %1059 = vst [vmem:[#allocation4 + $0x20] sm:$0xf] %v1057_v55 }
 0x135   :  { %1585 = vmatpush3.msra.mxu0 %v28_v12  ;;  %v1032_v59 = vpop.permute.xlu1 %1031 }
 0x136   :  { %1586 = vmatprep.subr.mxu0 %v43_v40  ;;  %v1036_v62 = vsel %vm2779_vm9, %v1032_v59, %v1034_v9  ;;  %v1016_v6 = vpop.permute.xlu0 %1015  ;;  %vm2783_vm9 = vcmask 228352  }
 0x137   :  { %1587 = vmatpush3.msra.mxu0 %v27_v43  ;;  %v1040_v63 = vsel %vm2032_vm7, %v1036_v62, 0.0  ;;  %v1021_v14 = vsel %vm2781_vm2, %v1016_v6, %v1018_v0 }
 0x138   :  { %1588 = vmatprep.subr.mxu0 %v42_v52  ;;  %1042 = vst [vmem:[#allocation4 + $0x168] sm:$0xf] %v1040_v63  ;;  %v1025_v16 = vsel %vm1950_vm10, %v1021_v14, 0.0 }
 0x139   :  { %1589 = vmatpush3.msra.mxu0 %v26_v56  ;;  %v1030_v1 = vpop.permute.xlu1 %1029  ;;  %1027 = vst [vmem:[#allocation4 + $0xe0] sm:$0xf] %v1025_v16 }
 0x13a   :  { %v1035_v3 = vsel %vm2780_vm12, %v1030_v1, %v1032_v59  ;;  %v1006_v18 = vpop.permute.xlu0 %1005  ;;  %vm2784_vm12 = vmmov %vm2783_vm9 }
 0x13b   :  { %v1039_v4 = vsel %vm2036_vm8, %v1035_v3, 0.0 }
 0x13c   :  { %1041 = vst [vmem:[#allocation4 + $0xb8] sm:$0xf] %v1039_v4 }
 0x13d   :  { %v1020_v13 = vpop.permute.xlu1 %1019 }
 0x13e   :  { %v1022_v15 = vsel %vm2782_vm6, %v1018_v0, %v1020_v13  ;;  %v990_v24 = vpop.permute.xlu0 %989  ;;  %vm2785_vm6 = vcmask 244736  }
 0x13f   :  { %v1026_v17 = vsel %vm1969_vm15, %v1022_v15, 0.0  ;;  %vm2786_vm2 = vmmov %vm2785_vm6  ;;  %v1204_v27 = vld [vmem:[#allocation4 + $0x168] sm:$0xff] }
 0x140   :  { %1028 = vst [vmem:[#allocation4 + $0xa8] sm:$0xf] %v1026_v17 }
 0x141   :  { %v1004_v20 = vpop.permute.xlu1 %1003 }
 0x142   :  { %v1008_v21 = vsel %vm2783_vm9, %v1004_v20, %v1006_v18  ;;  %v988_v29 = vpop.permute.xlu0 %987  ;;  %vm2787_vm9 = vcmask 261120  }
 0x143   :  { %v1012_v23 = vsel %vm1997_vm3, %v1008_v21, 0.0  ;;  %v993_v32 = vsel %vm2785_vm6, %v988_v29, %v990_v24 }
 0x144   :  { %1014 = vst [vmem:[#allocation4 + $0x120] sm:$0xf] %v1012_v23  ;;  %v997_v34 = vsel %vm2019_vm5, %v993_v32, 0.0 }
 0x145   :  { %v1002_v25 = vpop.permute.xlu1 %1001  ;;  %999 = vst [vmem:[#allocation4 + $0x180] sm:$0xf] %v997_v34 }
 0x146   :  { %v1007_v26 = vsel %vm2784_vm12, %v1002_v25, %v1004_v20  ;;  %v980_v35 = vpop.permute.xlu0 %979  ;;  %vm2788_vm12 = vcmask 277504  }
 0x147   :  { %v1011_v28 = vsel %vm1973_vm0, %v1007_v26, 0.0  ;;  %vm2789_vm6 = vmmov %vm2788_vm12 }
 0x148   :  { %1013 = vst [vmem:[#allocation4 + $0x138] sm:$0xf] %v1011_v28 }
 0x149   :  { %v992_v31 = vpop.permute.xlu1 %991 }
 0x14a   :  { %v994_v33 = vsel %vm2786_vm2, %v990_v24, %v992_v31  ;;  %v966_v39 = vpop.permute.xlu0 %965  ;;  %vm2790_vm2 = vmmov %vm2787_vm9 }
 0x14b   :  { %v998_v30 = vsel %vm2001_vm4, %v994_v33, 0.0 }
 0x14c   :  { %1000 = vst [vmem:[#allocation4 + $0x130] sm:$0xf] %v998_v30 }
 0x14d   :  { %v978_v36 = vpop.permute.xlu1 %977 }
 0x14e   :  { %v982_v8 = vsel %vm2787_vm9, %v978_v36, %v980_v35  ;;  %v962_v44 = vpop.permute.xlu0 %961  ;;  %vm2791_vm9 = vcmask 293888  }
 0x14f   :  { %986 = vst [vmem:[#allocation4 + $0xd8] sm:$0xf] %v982_v8 }
 0x151   :  { %v964_v12 = vpop.permute.xlu1 %963 }
 0x152   :  { %v968_v40 = vsel %vm2788_vm12, %v964_v12, %v966_v39  ;;  %v967_v46 = vsel %vm2789_vm6, %v962_v44, %v964_v12  ;;  %v952_v54 = vpop.permute.xlu0 %951  ;;  %vm2792_vm12 = vmmov %vm2791_vm9 }
 0x153   :  { %v972_v43 = vsel %vm2032_vm7, %v968_v40, 0.0  ;;  %v971_v52 = vsel %vm2036_vm8, %v967_v46, 0.0  ;;  %v1716_v40 = vld [vmem:[#allocation2] sm:$0xff] }
 0x154   :  { %974 = vst [vmem:[#allocation4 + $0x100] sm:$0xf] %v972_v43  ;;  %973 = vst [vmem:[#allocation4 + $0x148] sm:$0xf] %v971_v52 }
 0x155   :  { %v976_v45 = vpop.permute.xlu1 %975 }
 0x156   :  { %v981_v47 = vsel %vm2790_vm2, %v976_v45, %v978_v36  ;;  %v936_v9 = vpop.permute.xlu0 %935 }
 0x157   :  { %985 = vst [vmem:[#allocation4 + $0x58] sm:$0xf] %v981_v47 }
 0x159   :  { %v950_v55 = vpop.permute.xlu1 %949 }
 0x15a   :  { %v954_v56 = vsel %vm2791_vm9, %v950_v55, %v952_v54  ;;  %v934_v0 = vpop.permute.xlu0 %933 }
 0x15b   :  { %v958_v57 = vsel %vm1969_vm15, %v954_v56, 0.0  ;;  %v939_v3 = vsel %vm2754_vm1, %v934_v0, %v936_v9 }
 0x15c   :  { %960 = vst [vmem:[#allocation4 + $0x118] sm:$0xf] %v958_v57  ;;  %v943_v6 = vsel %vm1973_vm0, %v939_v3, 0.0 }
 0x15d   :  { %v948_v59 = vpop.permute.xlu1 %947  ;;  %945 = vst [vmem:[#allocation4 + $0x108] sm:$0xf] %v943_v6 }
 0x15e   :  { %v953_v62 = vsel %vm2792_vm12, %v948_v59, %v950_v55  ;;  %v2403_v15 = vpop.permute.xlu0 %923  ;;  %v1195_v60 = vld [vmem:[#allocation4 + $0x58] sm:$0xff] }
 0x15f   :  { %v957_v63 = vsel %vm1950_vm10, %v953_v62, 0.0 }
 0x160   :  { %959 = vst [vmem:[#allocation4 + $0x90] sm:$0xf] %v957_v63 }
 0x161   :  { %v2392_v1 = vpop.permute.xlu1 %937 }
 0x162   :  { %v940_v4 = vsel %vm2754_vm1, %v936_v9, %v2392_v1 }
 0x163   :  { %v944_v13 = vsel %vm1997_vm3, %v940_v4, 0.0  ;;  %v1177_v14 = vsel %vm1973_vm0, %v940_v4, 0.0 }
 0x164   :  { %946 = vst [vmem:[#allocation4 + $0x110] sm:$0xf] %v944_v13  ;;  %1179 = vst [vmem:[#allocation4 + $0x78] sm:$0xf] %v1177_v14 }
 0x165   :  { %v922_v16 = vpop.permute.xlu1 %921 }
 0x166   :  { %v926_v17 = vsel %vm2752_vm11, %v922_v16, %v2403_v15 }
 0x167   :  { %v930_v18 = vsel %vm2001_vm4, %v926_v17, 0.0  ;;  %v1169_v20 = vsel %vm2019_vm5, %v926_v17, 0.0  ;;  %v1191_v50 = vld [vmem:[#allocation4 + $0x90] sm:$0xff] }
 0x168   :  { %932 = vst [vmem:[#allocation4 + $0x178] sm:$0xf] %v930_v18  ;;  %1171 = vst [vmem:[#allocation4 + $0xc8] sm:$0xf] %v1169_v20 }
 0x169   :  { %v920_v21 = vpop.permute.xlu1 %919 }
 0x16a   :  { %v925_v23 = vsel %vm2752_vm11, %v920_v21, %v922_v16 }
 0x16b   :  { %v929_v25 = vsel %vm2019_vm5, %v925_v23, 0.0 }
 0x16c   :  { %931 = vst [vmem:[#allocation4 + $0x40] sm:$0xf] %v929_v25 }
 0x173   :  { %v1187_v38 = vld [vmem:[#allocation4 + $0x40] sm:$0xff] }
 0x1da   :  { %v635_v24 = vpop.f32.mrf.mxu0 }
 0x1db   :  { %v636_v26 = vadd.f32 %v635_v24, %v2274_v61 }
 0x1dc   :  { %v637_v28 = vpop.f32.mrf.mxu0 }
 0x1dd   :  { %v642_v29 = vmul.f32 1.442695, %v636_v26  ;;  %v638_v31 = vadd.f32 %v637_v28, %v2274_v61  ;;  %vm640_vm6 = vcmp.gt.f32.partialorder %v636_v26, 0.0 }
 0x1df   :  { %1708 = vpow2.f32 %v642_v29  ;;  %v644_v32 = vmul.f32 1.442695, %v638_v31  ;;  %vm641_vm2 = vcmp.gt.f32.partialorder %v638_v31, 0.0 }
 0x1e1   :  { %1710 = vpow2.f32 %v644_v32 }
 0x1ec   :  { %v1709_v33 = vpop.eup %1708 }
 0x1ed   :  { %v1514_v34 = vadd.f32 -1.0, %v1709_v33 }
 0x1ee   :  { %v1711_v30 = vpop.eup %1710 }
 0x1ef   :  { %v2416_v35 = vsel %vm640_vm6, %v636_v26, %v1514_v34  ;;  %v1515_v36 = vadd.f32 -1.0, %v1711_v30 }
 0x1f0   :  { %650 = vst [vmem:[%s2736_s5] sm:$0xff] %v2416_v35  ;;  %757 = vrot.lane.b32.xlu0 %v2416_v35, %s1746_s25  ;;  %742 = vrot.lane.b32.xlu1 %v2416_v35, %s1747_s26 }
 0x1f1   :  { %v2426_v8 = vsel %vm641_vm2, %v638_v31, %v1515_v36  ;;  %vm2793_vm2 = vcmask 523264  }
 0x1f2   :  { %651 = vst [vmem:[%s2736_s5 + $0x8] sm:$0xff] %v2426_v8  ;;  %v1624_v39 = vpack.i.bf16 %v2426_v8, %v2416_v35  ;;  %v1649_v12 = vpack.i.bf16 %v1741_v48, %v2426_v8 }
 0x1f4   :  { %772 = vrot.lane.b32.xlu0 %v2416_v35, %s1748_s30  ;;  %1625 = vrot.lane.b32.xlu1 %v1624_v39, %s1742_s2 }
 0x1f8   :  { %785 = vrot.lane.b32.xlu0 %v2416_v35, %s1749_s7  ;;  %911 = vrot.lane.b32.xlu1 %v1838_v10, %s1734_s12 }
 0x1fc   :  { %895 = vrot.lane.b32.xlu0 %v1843_v11, %s1735_s13  ;;  %897 = vrot.lane.b32.xlu1 %v1838_v10, %s1735_s13 }
 0x200   :  { %1630 = vrot.lane.b32.xlu0 %v1624_v39, %s1743_s15  ;;  %1650 = vrot.lane.b32.xlu1 %v1649_v12, %s1746_s25 }
 0x204   :  { %1635 = vrot.lane.b32.xlu0 %v1624_v39, %s1744_s16  ;;  %1660 = vrot.lane.b32.xlu1 %v1649_v12, %s1749_s7 }
 0x208   :  { %1640 = vrot.lane.b32.xlu0 %v1624_v39, %s1745_s21  ;;  %893 = vrot.lane.b32.xlu1 %v1716_v40, %s1735_s13 }
 0x20c   :  { %1645 = vrot.lane.b32.xlu0 %v1649_v12, %s1747_s26  ;;  %883 = vrot.lane.b32.xlu1 %v1838_v10, %s1736_s14 }
 0x210   :  { %1655 = vrot.lane.b32.xlu0 %v1649_v12, %s1748_s30  ;;  %1173 = vrot.lane.b32.xlu1 %v1995_v49, %s1732_s10 }
 0x214   :  { %907 = vrot.lane.b32.xlu0 %v1716_v40, %s1734_s12  ;;  %1159 = vrot.lane.b32.xlu1 %v1995_v49, %s1734_s12 }
 0x218   :  { %881 = vrot.lane.b32.xlu0 %v1843_v11, %s1736_s14  ;;  %1143 = vrot.lane.b32.xlu1 %v1995_v49, %s1736_s14 }
 0x21c   :  { %879 = vrot.lane.b32.xlu0 %v1716_v40, %s1736_s14  ;;  %1133 = vrot.lane.b32.xlu1 %v1995_v49, %s1737_s17 }
 0x220   :  { %1165 = vrot.lane.b32.xlu0 %v1995_v49, %s1733_s11  ;;  %1117 = vrot.lane.b32.xlu1 %v1838_v10, %s1738_s18 }
 0x224   :  { %1151 = vrot.lane.b32.xlu0 %v1995_v49, %s1735_s13  ;;  %1115 = vrot.lane.b32.xlu1 %v1843_v11, %s1738_s18 }
 0x228   :  { %1131 = vrot.lane.b32.xlu0 %v1838_v10, %s1737_s17  ;;  %1107 = vrot.lane.b32.xlu1 %v1995_v49, %s1739_s19 }
 0x22c   :  { %1129 = vrot.lane.b32.xlu0 %v1843_v11, %s1737_s17  ;;  %1093 = vrot.lane.b32.xlu1 %v1995_v49, %s1740_s20 }
 0x230   :  { %1119 = vrot.lane.b32.xlu0 %v1995_v49, %s1738_s18  ;;  %1089 = vrot.lane.b32.xlu1 %v1843_v11, %s1740_s20  ;;  %v2503_v49 = vpop.permute.xlu0 %909 }
 0x234   :  { %1105 = vrot.lane.b32.xlu0 %v1838_v10, %s1739_s19  ;;  %1324 = vrot.lane.b32.xlu1 %v1741_v48, %s1742_s2 }
 0x238   :  { %1091 = vrot.lane.b32.xlu0 %v1838_v10, %s1740_s20  ;;  %1338 = vrot.lane.b32.xlu1 %v1741_v48, %s1743_s15  ;;  %v1717_v10 = vld [vmem:[%s2732_s3] sm:$0x3] }
 0x239   :  { %v70_v45 = vadd.s32 4294967295, %v1717_v10  ;;  %v58_v47 = vadd.s32 1, %v1717_v10 }
 0x23b   :  { %vm71_vm9 = vcmp.ge.s32.totalorder %v70_v45, 0  ;;  %vm72_vm12 = vcmp.lt.s32.totalorder %v70_v45, 16  ;;  %vm59_vm14 = vcmp.ge.s32.totalorder %v58_v47, 0  ;;  %vm60_vm11 = vcmp.lt.s32.totalorder %v58_v47, 16 }
 0x23c   :  { %1103 = vrot.lane.b32.xlu0 %v1843_v11, %s1739_s19  ;;  %1350 = vrot.lane.b32.xlu1 %v1741_v48, %s1744_s16  ;;  %vm73_vm6 = vmand %vm71_vm9, %vm72_vm12  ;;  %vm2753_vm9 = vcmask 138240  }
 0x23d   :  { %v658_v56 = vsel %vm73_vm6, 1, %v1721_v2  ;;  %vm61_vm12 = vmand %vm59_vm14, %vm60_vm11  ;;  %vm2755_vm14 = vcmask 130048  }
 0x23e   :  { %v662_v59 = vrot.slane %v658_v56, %v1935_v19  ;;  %v666_v0 = vrot.slane %v658_v56, %v1943_v22  ;;  %v700_v16 = vsel %vm61_vm12, 1, %v1721_v2  ;;  %vm2757_vm12 = vcmask 7168  }
 0x23f   :  { %v704_v24 = vrot.slane %v700_v16, %v1935_v19  ;;  %v708_v25 = vrot.slane %v700_v16, %v1943_v22 }
 0x240   :  { %1364 = vrot.lane.b32.xlu1 %v1741_v48, %s1745_s21  ;;  %vm2533_vm6 = vcmp.eq.s32.totalorder %v662_v59, 1  ;;  %vm2539_vm11 = vcmp.eq.s32.totalorder %v666_v0, 1 }
 0x241   :  { %vm2558_vm1 = vcmp.eq.s32.totalorder %v708_v25, 1 }
 0x262   :  { %v2505_v43 = vpop.permute.xlu0 %757  ;;  %v2507_v44 = vpop.permute.xlu1 %742 }
 0x266   :  { %v2512_v46 = vpop.permute.xlu0 %772  ;;  %v1626_v11 = vpop.permute.xlu1 %1625 }
 0x267   :  { %v1627_v62 = vunpack.i.l.bf16 %v1626_v11  ;;  %v1628_v3 = vunpack.i.h.bf16 %v1626_v11 }
 0x269   :  { %v679_v18 = vsel %vm2753_vm9, %v2230_v42, %v1627_v62  ;;  %v680_v21 = vsel %vm2753_vm9, %v1627_v62, %v1628_v3  ;;  %vm2554_vm9 = vcmp.eq.s32.totalorder %v704_v24, 1 }
 0x26a   :  { %v2514_v52 = vpop.permute.xlu0 %785  ;;  %v2516_v54 = vpop.permute.xlu1 %911  ;;  %v683_v2 = vsel %vm2533_vm6, %v679_v18, -1e+30  ;;  %v684_v42 = vsel %vm2539_vm11, %v680_v21, -1e+30 }
 0x26b   :  { %v914_v55 = vsel %vm2793_vm2, %v2503_v49, %v2516_v54  ;;  %vm2756_vm2 = vcmask 121856   ;;  %v685_v30 = vmax.f32 %v2416_v35, %v683_v2  ;;  %v686_v36 = vmax.f32 %v2426_v8, %v684_v42 }
 0x26c   :  { %918 = vst [vmem:[#allocation4 + $0x128] sm:$0xf] %v914_v55  ;;  %1163 = vst [vmem:[#allocation4 + $0x68] sm:$0xf] %v914_v55 }
 0x26e   :  { %v896_v57 = vpop.permute.xlu0 %895  ;;  %v2522_v9 = vpop.permute.xlu1 %897 }
 0x26f   :  { %v900_v63 = vsel %vm2758_vm13, %v896_v57, %v2522_v9 }
 0x270   :  { %v904_v4 = vsel %vm2032_vm7, %v900_v63, 0.0  ;;  %v1155_v6 = vsel %vm2036_vm8, %v900_v63, 0.0 }
 0x271   :  { %906 = vst [vmem:[#allocation4 + $0x48] sm:$0xf] %v904_v4  ;;  %1157 = vst [vmem:[#allocation4 + $0x38] sm:$0xf] %v1155_v6 }
 0x272   :  { %v1631_v13 = vpop.permute.xlu0 %1630  ;;  %v1651_v14 = vpop.permute.xlu1 %1650 }
 0x273   :  { %v1632_v23 = vunpack.i.l.bf16 %v1631_v13  ;;  %v1633_v29 = vunpack.i.h.bf16 %v1631_v13  ;;  %v1653_v10 = vunpack.i.h.bf16 %v1651_v14  ;;  %v1652_v55 = vunpack.i.l.bf16 %v1651_v14 }
 0x275   :  { %v694_v19 = vsel %vm2755_vm14, %v2232_v41, %v1632_v23  ;;  %v695_v40 = vsel %vm2755_vm14, %v1632_v23, %v1633_v29  ;;  %vm748_vm14 = vcmask 1039360  }
 0x276   :  { %v1636_v26 = vpop.permute.xlu0 %1635  ;;  %v2548_v28 = vpop.permute.xlu1 %1660  ;;  %v698_v47 = vmax.f32 %v685_v30, %v694_v19  ;;  %v699_v63 = vmax.f32 %v686_v36, %v695_v40 }
 0x277   :  { %v1638_v31 = vunpack.i.h.bf16 %v1636_v26  ;;  %v1637_v32 = vunpack.i.l.bf16 %v1636_v26  ;;  %v1662_v21 = vunpack.i.l.bf16 %v2548_v28  ;;  %v1663_v2 = vunpack.i.h.bf16 %v2548_v28 }
 0x279   :  { %v718_v34 = vsel %vm2756_vm2, %v2252_v53, %v1637_v32  ;;  %v719_v39 = vsel %vm2756_vm2, %v1637_v32, %v1638_v31  ;;  %vm2760_vm2 = vcmask 908288  }
 0x27a   :  { %v1641_v12 = vpop.permute.xlu0 %1640  ;;  %v894_v41 = vpop.permute.xlu1 %893  ;;  %v722_v56 = vsel %vm2554_vm9, %v718_v34, -1e+30  ;;  %v723_v35 = vsel %vm2558_vm1, %v719_v39, -1e+30 }
 0x27b   :  { %v1643_v45 = vunpack.i.h.bf16 %v1641_v12  ;;  %v1642_v11 = vunpack.i.l.bf16 %v1641_v12  ;;  %v899_v53 = vsel %vm2758_vm13, %v894_v41, %v896_v57  ;;  %v724_v57 = vmax.f32 %v698_v47, %v722_v56 }
 0x27c   :  { %v903_v62 = vsel %vm2036_vm8, %v899_v53, 0.0  ;;  %v725_v16 = vmax.f32 %v699_v63, %v723_v35  ;;  %vm778_vm13 = vcmask 916480   ;;  %v793_v47 = vsel %vm2760_vm2, %v1662_v21, %v1663_v2 }
 0x27d   :  { %v733_v8 = vsel %vm2757_vm12, %v2266_v58, %v1642_v11  ;;  %v734_v59 = vsel %vm2757_vm12, %v1642_v11, %v1643_v45  ;;  %905 = vst [vmem:[#allocation4 + $0x10] sm:$0xf] %v903_v62  ;;  %vm2802_vm12 = vcmask 924672  }
 0x27e   :  { %v737_v0 = vsel %vm2533_vm6, %v733_v8, -1e+30  ;;  %v1646_v3 = vpop.permute.xlu0 %1645  ;;  %v884_v4 = vpop.permute.xlu1 %883  ;;  %v738_v6 = vsel %vm2539_vm11, %v734_v59, -1e+30  ;;  %v764_v14 = vsel %vm2802_vm12, %v2505_v43, %v1652_v55  ;;  %vm2803_vm8 = vmmov %vm2802_vm12  ;;  %vm2805_vm12 = vcmask 523264  }
 0x27f   :  { %v1648_v13 = vunpack.i.h.bf16 %v1646_v3  ;;  %v1647_v58 = vunpack.i.l.bf16 %v1646_v3  ;;  %v765_v18 = vsel %vm2803_vm8, %v1652_v55, %v1653_v10  ;;  %v739_v23 = vmax.f32 %v724_v57, %v737_v0 }
 0x280   :  { %v740_v43 = vmax.f32 %v725_v16, %v738_v6  ;;  %vm2804_vm8 = vcmask 490496   ;;  %v769_v39 = vsel %vm2539_vm11, %v765_v18, -1e+30  ;;  %v1211_v6 = vld [vmem:[#allocation4 + $0xf0] sm:$0xff] }
 0x281   :  { %v749_v24 = vsel %vm748_vm14, %v2507_v44, %v1647_v58  ;;  %v750_v25 = vsel %vm748_vm14, %v1647_v58, %v1648_v13  ;;  %v768_v44 = vsel %vm2533_vm6, %v764_v14, -1e+30  ;;  %v1210_v13 = vld [vmem:[#allocation4 + $0x170] sm:$0xff] }
 0x282   :  { %v753_v26 = vsel %vm2554_vm9, %v749_v24, -1e+30  ;;  %v1656_v42 = vpop.permute.xlu0 %1655  ;;  %v1174_v29 = vpop.permute.xlu1 %1173  ;;  %v754_v31 = vsel %vm2558_vm1, %v750_v25, -1e+30  ;;  %v1207_v24 = vld [vmem:[#allocation4 + $0x20] sm:$0xff]  ;;  %v1205_v25 = vld [vmem:[#allocation4 + $0xe8] sm:$0xff] }
 0x283   :  { %v755_v32 = vmax.f32 %v739_v23, %v753_v26  ;;  %v1658_v19 = vunpack.i.h.bf16 %v1656_v42  ;;  %v1657_v34 = vunpack.i.l.bf16 %v1656_v42  ;;  %v1175_v30 = vsel %vm2804_vm8, %v2392_v1, %v1174_v29  ;;  %vm2806_vm8 = vmmov %vm2805_vm12  ;;  %v1206_v23 = vld [vmem:[#allocation4 + $0xf8] sm:$0xff] }
 0x284   :  { %v1178_v28 = vsel %vm1997_vm3, %v1175_v30, 0.0  ;;  %v756_v36 = vmax.f32 %v740_v43, %v754_v31  ;;  %v792_v1 = vsel %vm2760_vm2, %v2514_v52, %v1662_v21  ;;  %v797_v52 = vsel %vm2558_vm1, %v793_v47, -1e+30  ;;  %v1208_v21 = vld [vmem:[#allocation4 + $0x88] sm:$0xff]  ;;  %v1203_v43 = vld [vmem:[#allocation4 + $0xb8] sm:$0xff]  ;;  %v1201_v30 = vld [vmem:[#allocation4 + $0xe0] sm:$0xff] }
 0x285   :  { %v779_v12 = vsel %vm778_vm13, %v2512_v46, %v1657_v34  ;;  %1180 = vst [vmem:[#allocation4 + $0x150] sm:$0xf] %v1178_v28  ;;  %v780_v41 = vsel %vm778_vm13, %v1657_v34, %v1658_v19  ;;  %v770_v40 = vmax.f32 %v755_v32, %v768_v44  ;;  %v796_v35 = vsel %vm2554_vm9, %v792_v1, -1e+30  ;;  %v1202_v31 = vld [vmem:[#allocation4 + $0xa8] sm:$0xff]  ;;  %v1200_v28 = vld [vmem:[#allocation4 + $0x120] sm:$0xff] }
 0x286   :  { %v908_v10 = vpop.permute.xlu0 %907  ;;  %v1160_v45 = vpop.permute.xlu1 %1159  ;;  %v771_v11 = vmax.f32 %v756_v36, %v769_v39  ;;  %vm2807_vm2 = vcmask 556032   ;;  %v1199_v39 = vld [vmem:[#allocation4 + $0x138] sm:$0xff] }
 0x287   :  { %v913_v55 = vsel %vm2805_vm12, %v908_v10, %v2503_v49  ;;  %v1161_v56 = vsel %vm2806_vm8, %v2516_v54, %v1160_v45  ;;  %v783_v53 = vmax.f32 %v770_v40, %v779_v12  ;;  %vm2808_vm12 = vmmov %vm2807_vm2  ;;  %v1198_v12 = vld [vmem:[#allocation4 + $0x130] sm:$0xff]  ;;  %v1197_v40 = vld [vmem:[#allocation4 + $0x180] sm:$0xff] }
 0x288   :  { %917 = vst [vmem:[#allocation4 + $0x160] sm:$0xf] %v913_v55  ;;  %1164 = vst [vmem:[#allocation4 + $0x80] sm:$0xf] %v1161_v56  ;;  %v784_v46 = vmax.f32 %v771_v11, %v780_v41  ;;  %v1196_v10 = vld [vmem:[#allocation4 + $0xd8] sm:$0xff]  ;;  %v1194_v11 = vld [vmem:[#allocation4 + $0x100] sm:$0xff] }
 0x289   :  { %v798_v8 = vmax.f32 %v783_v53, %v796_v35  ;;  %vm2810_vm8 = vmmov %vm2808_vm12  ;;  %v1193_v56 = vld [vmem:[#allocation4 + $0x148] sm:$0xff]  ;;  %v1190_v35 = vld [vmem:[#allocation4 + $0x110] sm:$0xff] }
 0x28a   :  { %v882_v59 = vpop.permute.xlu0 %881  ;;  %v799_v62 = vmax.f32 %v784_v46, %v797_v52  ;;  %v1144_v63 = vpop.permute.xlu1 %1143  ;;  %v1192_v46 = vld [vmem:[#allocation4 + $0x118] sm:$0xff] }
 0x28b   :  { %v886_v0 = vsel %vm2807_vm2, %v882_v59, %v884_v4  ;;  %v1145_v49 = vsel %vm2808_vm12, %v884_v4, %v1144_v63  ;;  %v1718_v4 = vld [vmem:[%s2733_s1 + $0x8] sm:$0xff]  ;;  %vm2809_vm2 = vcmask 588800   ;;  %vm2813_vm12 = vcmask 769024  }
 0x28c   :  { %v890_v54 = vsel %vm1969_vm15, %v886_v0, 0.0  ;;  %v1147_v3 = vsel %vm1950_vm10, %v886_v0, 0.0  ;;  %864 = vmatprep.mubr.f32.mxu1 %v799_v62  ;;  %v1148_v57 = vsel %vm1969_vm15, %v1145_v49, 0.0  ;;  %vm2811_vm15 = vcmask 506880   ;;  %v1189_v62 = vld [vmem:[#allocation4 + $0x108] sm:$0xff]  ;;  %v1188_v0 = vld [vmem:[#allocation4 + $0x178] sm:$0xff] }
 0x28d   :  { %892 = vst [vmem:[#allocation4 + $0xd0] sm:$0xf] %v890_v54  ;;  %1149 = vst [vmem:[#allocation4 + $0x28] sm:$0xf] %v1147_v3  ;;  %865 = vmatmul.mubr.f32.vlgmr.msra.gmra.mxu1 %v798_v8  ;;  %v1186_v49 = vld [vmem:[#allocation4 + $0x128] sm:$0xff] }
 0x28e   :  { %1150 = vst [vmem:[#allocation4 + $0x158] sm:$0xf] %v1148_v57  ;;  %1232 = vmatpush1.msra.mxu1 %v1211_v6  ;;  %v880_v58 = vpop.permute.xlu0 %879  ;;  %v1134_v14 = vpop.permute.xlu1 %1133  ;;  %1517 = vmatprep.mubr.msk.f32.mxu1 %vm2809_vm2, %v1718_v4  ;;  %vm2814_vm2 = vcmask 752640   ;;  %v1184_v6 = vld [vmem:[#allocation4 + $0x48] sm:$0xff] }
 0x28f   :  { %1233 = vmatprep.subr.mxu1 %v1210_v13  ;;  %v885_v16 = vsel %vm2810_vm8, %v880_v58, %v882_v59  ;;  %v1185_v57 = vld [vmem:[#allocation4 + $0x160] sm:$0xff]  ;;  %v1183_v58 = vld [vmem:[#allocation4 + $0x10] sm:$0xff] }
 0x290   :  { %v889_v18 = vsel %vm1950_vm10, %v885_v16, 0.0  ;;  %1234 = vmatpush1.msra.mxu1 %v1209_v37  ;;  %vm2812_vm10 = vcmask 539648   ;;  %v1226_v5 = vld [vmem:[#allocation4 + $0x80] sm:$0xff] }
 0x291   :  { %891 = vst [vmem:[#allocation4 + $0xb0] sm:$0xf] %v889_v18  ;;  %1235 = vmatprep.subr.mxu1 %v1208_v21  ;;  %v1230_v21 = vld [vmem:[#allocation4 + $0x150] sm:$0xff] }
 0x292   :  { %1236 = vmatpush1.msra.mxu1 %v1207_v24  ;;  %v1166_v2 = vpop.permute.xlu0 %1165  ;;  %v1118_v26 = vpop.permute.xlu1 %1117  ;;  %v1229_v24 = vld [vmem:[#allocation4 + $0x78] sm:$0xff] }
 0x293   :  { %1237 = vmatprep.subr.mxu1 %v1206_v23  ;;  %v1167_v42 = vsel %vm2811_vm15, %v2403_v15, %v1166_v2  ;;  %vm2820_vm15 = vnez %v2778_v7  ;;  %v1223_v7 = vld [vmem:[#allocation4 + $0x38] sm:$0xff] }
 0x294   :  { %v1170_v29 = vsel %vm2001_vm4, %v1167_v42, 0.0  ;;  %1238 = vmatpush1.msra.mxu1 %v1205_v25  ;;  %v1182_v51 = vld [vmem:[#allocation4 + $0xd0] sm:$0xff]  ;;  %v1227_v42 = vld [vmem:[#allocation4 + $0xc8] sm:$0xff] }
 0x295   :  { %1172 = vst [vmem:[#allocation4 + $0x60] sm:$0xf] %v1170_v29  ;;  %1239 = vmatprep.subr.mxu1 %v1204_v27  ;;  %v1225_v29 = vld [vmem:[#allocation4 + $0x68] sm:$0xff] }
 0x296   :  { %1240 = vmatpush1.msra.mxu1 %v1203_v43  ;;  %v1152_v32 = vpop.permute.xlu0 %1151  ;;  %v1116_v19 = vpop.permute.xlu1 %1115  ;;  %v1222_v43 = vld [vmem:[#allocation4 + $0x158] sm:$0xff] }
 0x297   :  { %1241 = vmatprep.subr.mxu1 %v1202_v31  ;;  %v1153_v34 = vsel %vm2812_vm10, %v2522_v9, %v1152_v32  ;;  %v1121_v44 = vsel %vm2813_vm12, %v1116_v19, %v1118_v26  ;;  %v1221_v31 = vld [vmem:[#allocation4 + $0x28] sm:$0xff] }
 0x298   :  { %v1156_v15 = vsel %vm2032_vm7, %v1153_v34, 0.0  ;;  %1242 = vmatpush1.msra.mxu1 %v1201_v30  ;;  %v1125_v36 = vsel %vm2019_vm5, %v1121_v44, 0.0  ;;  %vm2815_vm5 = vmmov %vm2814_vm2  ;;  %v1181_v16 = vld [vmem:[#allocation4 + $0xb0] sm:$0xff] }
 0x299   :  { %1158 = vst [vmem:[#allocation4 + $0x70] sm:$0xf] %v1156_v15  ;;  %1243 = vmatprep.subr.mxu1 %v1200_v28  ;;  %1127 = vst [vmem:[#allocation4 + $0x98] sm:$0xf] %v1125_v36 }
 0x29a   :  { %1244 = vmatpush1.msra.mxu1 %v1199_v39  ;;  %v1132_v41 = vpop.permute.xlu0 %1131  ;;  %v1108_v45 = vpop.permute.xlu1 %1107  ;;  %v1719_v39 = vld [vmem:[%s2733_s1] sm:$0xff] }
 0x29b   :  { %1245 = vmatprep.subr.mxu1 %v1198_v12  ;;  %v1136_v9 = vsel %vm2814_vm2, %v1132_v41, %v1134_v14 }
 0x29c   :  { %v1140_v1 = vsel %vm1997_vm3, %v1136_v9, 0.0  ;;  %1246 = vmatpush1.msra.mxu1 %v1197_v40  ;;  %vm2816_vm3 = vmmov %vm2813_vm12  ;;  %v1228_v25 = vld [vmem:[#allocation4 + $0x60] sm:$0xff] }
 0x29d   :  { %1142 = vst [vmem:[#allocation4 + $0x18] sm:$0xf] %v1140_v1  ;;  %1247 = vmatprep.subr.mxu1 %v1196_v10 }
 0x29e   :  { %1248 = vmatpush1.msra.mxu1 %v1195_v60  ;;  %v1130_v47 = vpop.permute.xlu0 %1129  ;;  %v1094_v8 = vpop.permute.xlu1 %1093 }
 0x29f   :  { %1249 = vmatprep.subr.mxu1 %v1194_v11  ;;  %v1135_v55 = vsel %vm2815_vm5, %v1130_v47, %v1132_v41  ;;  %vm2823_vm5 = vcmask 138240  }
 0x2a0   :  { %v1139_v53 = vsel %vm1973_vm0, %v1135_v55, 0.0  ;;  %1250 = vmatpush1.msra.mxu1 %v1193_v56  ;;  %vm2817_vm0 = vcmask 785408   ;;  %v1224_v27 = vld [vmem:[#allocation4 + $0x70] sm:$0xff]  ;;  %v1217_v30 = vld [vmem:[#allocation4 + $0x98] sm:$0xff] }
 0x2a1   :  { %1141 = vst [vmem:[#allocation4 + $0x188] sm:$0xf] %v1139_v53  ;;  %1251 = vmatprep.subr.mxu1 %v1192_v46  ;;  %vm2821_vm10 = vmmov %vm2817_vm0 }
 0x2a2   :  { %1252 = vmatpush1.msra.mxu1 %v1191_v50  ;;  %v1120_v52 = vpop.permute.xlu0 %1119  ;;  %v1090_v13 = vpop.permute.xlu1 %1089 }
 0x2a3   :  { %1253 = vmatprep.subr.mxu1 %v1190_v35  ;;  %v1122_v59 = vsel %vm2816_vm3, %v1118_v26, %v1120_v52  ;;  %vm2824_vm3 = vmmov %vm2823_vm5 }
 0x2a4   :  { %v1126_v63 = vsel %vm2001_vm4, %v1122_v59, 0.0  ;;  %1254 = vmatpush1.msra.mxu1 %v1189_v62  ;;  %vm2818_vm4 = vcmask 801792   ;;  %v1220_v32 = vld [vmem:[#allocation4 + $0x18] sm:$0xff] }
 0x2a5   :  { %1128 = vst [vmem:[#allocation4 + $0x30] sm:$0xf] %v1126_v63  ;;  %1255 = vmatprep.subr.mxu1 %v1188_v0  ;;  %vm2819_vm8 = vmmov %vm2818_vm4 }
 0x2a6   :  { %1256 = vmatpush1.msra.mxu1 %v1187_v38  ;;  %v1106_v54 = vpop.permute.xlu0 %1105  ;;  %v1325_v52 = vpop.permute.xlu1 %1324 }
 0x2a7   :  { %1257 = vmatprep.subr.mxu1 %v1186_v49  ;;  %v1110_v3 = vsel %vm2817_vm0, %v1106_v54, %v1108_v45  ;;  %vm2825_vm0 = vcmask 121856  }
 0x2a8   :  { %1114 = vst [vmem:[#allocation4 + $0xc0] sm:$0xf] %v1110_v3  ;;  %1258 = vmatpush1.msra.mxu1 %v1185_v57  ;;  %v1219_v19 = vld [vmem:[#allocation4 + $0x188] sm:$0xff] }
 0x2a9   :  { %1259 = vmatprep.subr.mxu1 %v1184_v6 }
 0x2aa   :  { %1260 = vmatpush1.msra.mxu1 %v1183_v58  ;;  %v1092_v14 = vpop.permute.xlu0 %1091 }
 0x2ab   :  { %1261 = vmatprep.subr.mxu1 %v1182_v51  ;;  %v1096_v4 = vsel %vm2818_vm4, %v1092_v14, %v1094_v8  ;;  %v1095_v37 = vsel %vm2819_vm8, %v1090_v13, %v1092_v14  ;;  %v1339_v8 = vpop.permute.xlu1 %1338  ;;  %vm2826_vm4 = vmmov %vm2825_vm0  ;;  %vm2827_vm8 = vcmask 130048  }
 0x2ac   :  { %v1100_v18 = vsel %vm2032_vm7, %v1096_v4, 0.0  ;;  %1262 = vmatpush1.msra.mxu1 %v1181_v16  ;;  %v1099_v23 = vsel %vm2820_vm15, %v1095_v37, 0.0  ;;  %v1218_v34 = vld [vmem:[#allocation4 + $0x30] sm:$0xff]  ;;  %vm2822_vm7 = vcmask 523264   ;;  %vm2828_vm15 = vmmov %vm2827_vm8 }
 0x2ad   :  { %1102 = vst [vmem:[#allocation4] sm:$0xf] %v1100_v18  ;;  %1277 = vmatprep.subr.mxu1 %v1230_v21  ;;  %1101 = vst [vmem:[#allocation4 + $0x50] sm:$0xf] %v1099_v23 }
 0x2ae   :  { %1278 = vmatpush2.msra.mxu1 %v1229_v24  ;;  %v1104_v2 = vpop.permute.xlu0 %1103 }
 0x2af   :  { %1279 = vmatprep.subr.mxu1 %v1228_v25  ;;  %v1109_v26 = vsel %vm2821_vm10, %v1104_v2, %v1106_v54  ;;  %v1216_v44 = vld [vmem:[#allocation4 + $0xc0] sm:$0xff]  ;;  %v1351_v59 = vpop.permute.xlu1 %1350  ;;  %vm2829_vm10 = vcmask 7168  }
 0x2b0   :  { %1113 = vst [vmem:[#allocation4 + $0x8] sm:$0xf] %v1109_v26  ;;  %1280 = vmatpush2.msra.mxu1 %v1227_v42 }
 0x2b1   :  { %1281 = vmatprep.subr.mxu1 %v1226_v5 }
 0x2b2   :  { %1282 = vmatpush2.msra.mxu1 %v1225_v29 }
 0x2b3   :  { %1283 = vmatprep.subr.mxu1 %v1224_v27  ;;  %v1365_v49 = vpop.permute.xlu1 %1364 }
 0x2b4   :  { %1284 = vmatpush2.msra.mxu1 %v1223_v7  ;;  %v1214_v28 = vld [vmem:[#allocation4] sm:$0xff]  ;;  %v1213_v36 = vld [vmem:[#allocation4 + $0x50] sm:$0xff] }
 0x2b5   :  { %1285 = vmatprep.subr.mxu1 %v1222_v43 }
 0x2b6   :  { %1286 = vmatpush2.msra.mxu1 %v1221_v31 }
 0x2b7   :  { %1287 = vmatprep.subr.mxu1 %v1220_v32  ;;  %v1215_v15 = vld [vmem:[#allocation4 + $0x8] sm:$0xff] }
 0x2b8   :  { %1288 = vmatpush2.msra.mxu1 %v1219_v19 }
 0x2b9   :  { %1289 = vmatprep.subr.mxu1 %v1218_v34 }
 0x2ba   :  { %1290 = vmatpush2.msra.mxu1 %v1217_v30 }
 0x2bb   :  { %1291 = vmatprep.subr.mxu1 %v1216_v44 }
 0x2bc   :  { %1292 = vmatpush2.msra.mxu1 %v1215_v15 }
 0x2bd   :  { %1293 = vmatprep.subr.mxu1 %v1214_v28 }
 0x2be   :  { %1294 = vmatpush2.msra.mxu1 %v1213_v36 }
 0x2bf   :  { %1296 = vmatmul.mubr.f32.vlgmr.msra.gmra.mxu1 %v1719_v39 }
 0x34d   :  { %v1555_v12 = vpop.f32.mrf.mxu1 }
 0x34f   :  { %v1556_v41 = vpop.f32.mrf.mxu1 }
 0x350   :  { %v1557_v9 = vadd.f32 %v1556_v41, %v1555_v12 }
 0x352   :  { %870 = vst.msk [vmem:[%s2737_s6] sm:$0xff] %vm2822_vm7, %v1557_v9  ;;  %vm2830_vm7 = vmmov %vm2829_vm10 }
 0x37f   :  { %v1297_v40 = vpop.f32.mrf.mxu1 }
 0x380   :  { %v1298_v1 = vadd.f32 %v1297_v40, %v2274_v61 }
 0x381   :  { %v1299_v10 = vpop.f32.mrf.mxu1 }
 0x382   :  { %v1304_v45 = vmul.f32 1.442695, %v1298_v1  ;;  %v1300_v60 = vadd.f32 %v1299_v10, %v2274_v61  ;;  %vm1302_vm12 = vcmp.gt.f32.partialorder %v1298_v1, 0.0 }
 0x384   :  { %1712 = vpow2.f32 %v1304_v45  ;;  %v1306_v11 = vmul.f32 1.442695, %v1300_v60  ;;  %vm1303_vm2 = vcmp.gt.f32.partialorder %v1300_v60, 0.0 }
 0x386   :  { %1714 = vpow2.f32 %v1306_v11 }
 0x391   :  { %v1713_v47 = vpop.eup %1712 }
 0x392   :  { %v1518_v55 = vadd.f32 -1.0, %v1713_v47 }
 0x393   :  { %v1715_v56 = vpop.eup %1714 }
 0x394   :  { %v1310_v53 = vsel %vm1302_vm12, %v1298_v1, %v1518_v55  ;;  %v1519_v46 = vadd.f32 -1.0, %v1715_v56 }
 0x395   :  { %1520 = vst [vmem:[%s2736_s5 + $0x10] sm:$0xff] %v1310_v53  ;;  %1379 = vrot.lane.b32.xlu1 %v1310_v53, %s1747_s26 }
 0x396   :  { %v1311_v50 = vsel %vm1303_vm2, %v1300_v60, %v1519_v46 }
 0x397   :  { %1521 = vst [vmem:[%s2736_s5 + $0x18] sm:$0xff] %v1311_v50  ;;  %v1664_v61 = vpack.i.bf16 %v1311_v50, %v1310_v53  ;;  %v1684_v35 = vpack.i.bf16 %v1741_v48, %v1311_v50 }
 0x399   :  { %1665 = vrot.lane.b32.xlu0 %v1664_v61, %s1742_s2  ;;  %1393 = vrot.lane.b32.xlu1 %v1310_v53, %s1746_s25 }
 0x39d   :  { %1670 = vrot.lane.b32.xlu0 %v1664_v61, %s1743_s15  ;;  %1407 = vrot.lane.b32.xlu1 %v1310_v53, %s1748_s30 }
 0x3a1   :  { %1675 = vrot.lane.b32.xlu0 %v1664_v61, %s1744_s16  ;;  %1419 = vrot.lane.b32.xlu1 %v1310_v53, %s1749_s7 }
 0x3a5   :  { %1680 = vrot.lane.b32.xlu0 %v1664_v61, %s1745_s21 }
 0x3a9   :  { %1685 = vrot.lane.b32.xlu0 %v1684_v35, %s1747_s26 }
 0x3ad   :  { %1690 = vrot.lane.b32.xlu0 %v1684_v35, %s1746_s25 }
 0x3b1   :  { %1695 = vrot.lane.b32.xlu0 %v1684_v35, %s1748_s30 }
 0x3b5   :  { %1700 = vrot.lane.b32.xlu0 %v1684_v35, %s1749_s7 }
 0x407   :  { %v1380_v13 = vpop.permute.xlu1 %1379 }
 0x40b   :  { %v1666_v62 = vpop.permute.xlu0 %1665  ;;  %v1394_v43 = vpop.permute.xlu1 %1393 }
 0x40c   :  { %v1668_v0 = vunpack.i.h.bf16 %v1666_v62  ;;  %v1667_v38 = vunpack.i.l.bf16 %v1666_v62 }
 0x40e   :  { %v1330_v3 = vsel %vm2823_vm5, %v1325_v52, %v1667_v38  ;;  %v1331_v48 = vsel %vm2824_vm3, %v1667_v38, %v1668_v0 }
 0x40f   :  { %v1671_v63 = vpop.permute.xlu0 %1670  ;;  %v1334_v58 = vsel %vm2533_vm6, %v1330_v3, -1e+30  ;;  %v1335_v51 = vsel %vm2539_vm11, %v1331_v48, -1e+30  ;;  %v1408_v47 = vpop.permute.xlu1 %1407 }
 0x410   :  { %v1673_v14 = vunpack.i.h.bf16 %v1671_v63  ;;  %v1672_v4 = vunpack.i.l.bf16 %v1671_v63  ;;  %v1336_v21 = vmax.f32 %v1310_v53, %v1334_v58  ;;  %v1337_v23 = vmax.f32 %v1311_v50, %v1335_v51 }
 0x412   :  { %v1344_v2 = vsel %vm2827_vm8, %v1339_v8, %v1672_v4  ;;  %v1345_v26 = vsel %vm2828_vm15, %v1672_v4, %v1673_v14 }
 0x413   :  { %v1676_v54 = vpop.permute.xlu0 %1675  ;;  %v1348_v19 = vmax.f32 %v1336_v21, %v1344_v2  ;;  %v1349_v34 = vmax.f32 %v1337_v23, %v1345_v26 }
 0x414   :  { %v1678_v57 = vunpack.i.h.bf16 %v1676_v54  ;;  %v1677_v6 = vunpack.i.l.bf16 %v1676_v54 }
 0x416   :  { %v1356_v24 = vsel %vm2825_vm0, %v1351_v59, %v1677_v6  ;;  %v1357_v25 = vsel %vm2826_vm4, %v1677_v6, %v1678_v57 }
 0x417   :  { %v1681_v16 = vpop.permute.xlu0 %1680  ;;  %v1360_v31 = vsel %vm2554_vm9, %v1356_v24, -1e+30  ;;  %v1361_v32 = vsel %vm2558_vm1, %v1357_v25, -1e+30 }
 0x418   :  { %v1683_v37 = vunpack.i.h.bf16 %v1681_v16  ;;  %v1682_v18 = vunpack.i.l.bf16 %v1681_v16  ;;  %v1362_v39 = vmax.f32 %v1348_v19, %v1360_v31  ;;  %v1363_v12 = vmax.f32 %v1349_v34, %v1361_v32 }
 0x41a   :  { %v1370_v5 = vsel %vm2829_vm10, %v1365_v49, %v1682_v18  ;;  %v1371_v29 = vsel %vm2830_vm7, %v1682_v18, %v1683_v37  ;;  %v1420_v49 = vpop.permute.xlu1 %1419 }
 0x41b   :  { %v1686_v42 = vpop.permute.xlu0 %1685  ;;  %v1374_v15 = vsel %vm2533_vm6, %v1370_v5, -1e+30  ;;  %v1375_v28 = vsel %vm2539_vm11, %v1371_v29, -1e+30 }
 0x41c   :  { %v1688_v27 = vunpack.i.h.bf16 %v1686_v42  ;;  %v1687_v7 = vunpack.i.l.bf16 %v1686_v42  ;;  %v1376_v10 = vmax.f32 %v1362_v39, %v1374_v15  ;;  %v1377_v45 = vmax.f32 %v1363_v12, %v1375_v28 }
 0x41e   :  { %v1385_v30 = vsel %vm748_vm14, %v1380_v13, %v1687_v7  ;;  %v1386_v44 = vsel %vm748_vm14, %v1687_v7, %v1688_v27  ;;  %vm2831_vm14 = vcmask 924672  }
 0x41f   :  { %v1691_v36 = vpop.permute.xlu0 %1690  ;;  %v1389_v40 = vsel %vm2554_vm9, %v1385_v30, -1e+30  ;;  %v1390_v1 = vsel %vm2558_vm1, %v1386_v44, -1e+30  ;;  %vm2832_vm12 = vmmov %vm2831_vm14 }
 0x420   :  { %v1693_v41 = vunpack.i.h.bf16 %v1691_v36  ;;  %v1692_v9 = vunpack.i.l.bf16 %v1691_v36  ;;  %v1391_v46 = vmax.f32 %v1376_v10, %v1389_v40  ;;  %v1392_v50 = vmax.f32 %v1377_v45, %v1390_v1 }
 0x422   :  { %v1399_v60 = vsel %vm2831_vm14, %v1394_v43, %v1692_v9  ;;  %v1400_v11 = vsel %vm2832_vm12, %v1692_v9, %v1693_v41 }
 0x423   :  { %v1403_v55 = vsel %vm2533_vm6, %v1399_v60, -1e+30  ;;  %v1404_v56 = vsel %vm2539_vm11, %v1400_v11, -1e+30  ;;  %v1696_v53 = vpop.permute.xlu0 %1695  ;;  %vm2833_vm6 = vcmask 908288  }
 0x424   :  { %v1698_v61 = vunpack.i.h.bf16 %v1696_v53  ;;  %v1697_v35 = vunpack.i.l.bf16 %v1696_v53  ;;  %v1405_v52 = vmax.f32 %v1391_v46, %v1403_v55  ;;  %v1406_v8 = vmax.f32 %v1392_v50, %v1404_v56  ;;  %vm2834_vm2 = vmmov %vm2833_vm6 }
 0x426   :  { %v1413_v59 = vsel %vm778_vm13, %v1408_v47, %v1697_v35  ;;  %v1414_v62 = vsel %vm778_vm13, %v1697_v35, %v1698_v61  ;;  %vm2835_vm13 = vcmask 523264  }
 0x427   :  { %v1701_v63 = vpop.permute.xlu0 %1700  ;;  %v1417_v17 = vmax.f32 %v1405_v52, %v1413_v59  ;;  %v1418_v3 = vmax.f32 %v1406_v8, %v1414_v62 }
 0x428   :  { %v1703_v0 = vunpack.i.h.bf16 %v1701_v63  ;;  %v1702_v38 = vunpack.i.l.bf16 %v1701_v63 }
 0x42a   :  { %v1425_v54 = vsel %vm2833_vm6, %v1420_v49, %v1702_v38  ;;  %v1426_v20 = vsel %vm2834_vm2, %v1702_v38, %v1703_v0 }
 0x42b   :  { %v1429_v48 = vsel %vm2554_vm9, %v1425_v54, -1e+30  ;;  %v1430_v57 = vsel %vm2558_vm1, %v1426_v20, -1e+30 }
 0x42c   :  { %v1431_v6 = vmax.f32 %v1417_v17, %v1429_v48  ;;  %v1432_v13 = vmax.f32 %v1418_v3, %v1430_v57 }
 0x42e   :  { %1497 = vmatprep.mubr.f32.mxu0 %v1432_v13 }
 0x42f   :  { %1498 = vmatmul.mubr.f32.vlgmr.msra.gmra.mxu0 %v1431_v6 }
 0x4ef   :  { %v1590_v58 = vpop.f32.mrf.mxu0 }
 0x4f1   :  { %v1591_v51 = vpop.f32.mrf.mxu0 }
 0x4f2   :  { %v1592_v14 = vadd.f32 %v1591_v51, %v1590_v58 }
 0x4f4   :  { %1522 = vst.msk [vmem:[%s2737_s6 + $0x8] sm:$0xff] %vm2835_vm13, %v1592_v14 }

</bundles_post_ra>
